<compile_context>
chip_gen: v5e
topology: v5e:2x2
jax: 0.10.0
libtpu: 0.0.40
codegen_flags: <defaults>
</compile_context>

<pallas_src>
import math
import numpy as np
import jax
import jax.numpy as jnp
from jax.experimental import pallas as pl
from jax.experimental.pallas import tpu as pltpu

# ----------------------- fixed MFCC hyper-parameters ------------------------
SAMPLE_RATE = 16000
WINLEN, WINSTEP = 0.025, 0.01
FRAME_LEN = int(round(WINLEN * SAMPLE_RATE))      # 400
FRAME_STEP = int(round(WINSTEP * SAMPLE_RATE))    # 160
NFFT = 512
NFREQ = NFFT // 2 + 1                             # 257
NPAD_FREQ = 384                                   # 257 padded to a lane multiple
NFILT = 26
NUMCEP = 13
PREEMPH = 0.97
CEPLIFTER = 22
EPS = float(np.finfo(np.float64).eps)
FB_COLS = 128                                     # 26 filters + 1 energy col, lane padded
CEP_COLS = 128                                    # 3 x 13 cepstra at offsets 0/13/26, lane padded
HALO = 4                                          # 2 (delta) + 2 (delta-delta) frames each side
NSHIFT = 3                                        # frame = chunks[t], chunks[t+1], chunks[t+2][:80]
KPAD = NSHIFT * FRAME_STEP                        # 480 basis rows (last 80 are zero)


# ----------------------- deterministic parameter setup ----------------------
def _hz2mel(hz):
    return 2595.0 * np.log10(1.0 + hz / 700.0)


def _mel2hz(mel):
    return 700.0 * (10.0 ** (mel / 2595.0) - 1.0)


def _get_filterbanks(nfilt, nfft, samplerate):
    highfreq = samplerate / 2
    lowmel, highmel = _hz2mel(0.0), _hz2mel(highfreq)
    melpoints = np.linspace(lowmel, highmel, nfilt + 2)
    bins = np.floor((nfft + 1) * _mel2hz(melpoints) / samplerate)
    fbank = np.zeros([nfilt, nfft // 2 + 1])
    for j in range(nfilt):
        for i in range(int(bins[j]), int(bins[j + 1])):
            fbank[j, i] = (i - bins[j]) / (bins[j + 1] - bins[j])
        for i in range(int(bins[j + 1]), int(bins[j + 2])):
            fbank[j, i] = (bins[j + 2] - i) / (bins[j + 2] - bins[j + 1])
    return fbank


def _dct2_ortho_matrix(n_in, n_out):
    # ceps = logfbank @ M  == scipy dct(type=2, norm='ortho', axis=1)[:, :n_out]
    n = np.arange(n_in)
    k = np.arange(n_out)
    mat = np.cos(np.pi * np.outer(2 * n + 1, k) / (2.0 * n_in))
    scale = np.full(n_out, np.sqrt(2.0 / n_in))
    scale[0] = np.sqrt(1.0 / n_in)
    return mat * scale[None, :]


def _build_constants():
    # merged real-DFT basis: Re at cols 0:257, Im at cols 384:641, rest zero.
    # Rows 0:400 are the 400 in-frame sample positions; rows 400:480 are zero so
    # the third chunk-shifted matmul can use a full 160-lane LHS without masking.
    n = np.arange(FRAME_LEN)
    k = np.arange(NFREQ)
    ang = 2.0 * np.pi * np.outer(n, k) / NFFT
    dft = np.zeros((KPAD, 2 * NPAD_FREQ))
    dft[:FRAME_LEN, :NFREQ] = np.cos(ang)
    dft[:FRAME_LEN, NPAD_FREQ:NPAD_FREQ + NFREQ] = np.sin(ang)

    # mel filterbank (transposed) + ones column (col 26) for total frame energy
    fb = np.zeros((NPAD_FREQ, FB_COLS))
    fb[:NFREQ, :NFILT] = _get_filterbanks(NFILT, NFFT, SAMPLE_RATE).T
    fb[:NFREQ, NFILT] = 1.0

    # DCT-II(ortho) with the ceplifter folded in; col 0 = log-energy passthrough
    # (appendEnergy=True replaces C0 with log(total energy)).
    base = np.zeros((FB_COLS, NUMCEP))
    lift = 1.0 + (CEPLIFTER / 2.0) * np.sin(np.pi * np.arange(NUMCEP) / CEPLIFTER)
    base[:NFILT, :] = _dct2_ortho_matrix(NFILT, NUMCEP) * lift[None, :]
    base[:, 0] = 0.0
    base[NFILT, 0] = 1.0
    dct = np.zeros((FB_COLS, CEP_COLS))
    for r in range(3):                      # replicate cepstra at lane offsets 0/13/26
        dct[:, r * NUMCEP:(r + 1) * NUMCEP] = base

    # hi/lo bf16 split of the DFT basis: bf16 MXU operands, ~f32 fidelity.
    dft32 = jnp.asarray(dft, jnp.float32)
    dft_hi = dft32.astype(jnp.bfloat16)
    dft_lo = (dft32 - dft_hi.astype(jnp.float32)).astype(jnp.bfloat16)

    return (dft_hi, dft_lo,
            jnp.asarray(fb, jnp.float32),
            jnp.asarray(dct, jnp.float32))


DFT_HI, DFT_LO, FB_PAD, DCT_PAD = _build_constants()


# --------------------------------- kernel -----------------------------------
def _make_kernel(T, tile, nt):
    """T: true frame count, tile: output frames per grid step, nt: grid size."""
    H = tile + 2 * HALO          # frames per tile including the halo
    HD = H - 4                   # rows of the first-order delta (2-frame halo kept)

    def kernel(chunks_ref, dfth_ref, dftl_ref, fb_ref, dct_ref, out_ref,
               ceps_sc, dlt_sc):
        i = pl.program_id(0)

        x = chunks_ref[0]                                       # [H+2, 160] f32 signal chunks

        # real DFT as 3 chunk-shifted matmuls (frame t = chunks t, t+1, t+2[:80]).
        # Each operand is hi/lo-split bf16 -> pure bf16 MXU passes, f32 accumulate:
        #   spec ~= x_hi @ B_hi + x_lo @ B_hi + x_hi @ B_lo   (lo*lo term dropped)
        spec = None
        for j in range(NSHIFT):
            xj = x[j:j + H, :]                                  # [H, 160] f32
            xj_hi = xj.astype(jnp.bfloat16)
            xj_lo = (xj - xj_hi.astype(jnp.float32)).astype(jnp.bfloat16)
            bh = dfth_ref[pl.ds(j * FRAME_STEP, FRAME_STEP), :]  # [160, 768] bf16
            bl = dftl_ref[pl.ds(j * FRAME_STEP, FRAME_STEP), :]
            part = jnp.dot(xj_hi, bh, preferred_element_type=jnp.float32)
            part = part + jnp.dot(xj_lo, bh, preferred_element_type=jnp.float32)
            part = part + jnp.dot(xj_hi, bl, preferred_element_type=jnp.float32)
            spec = part if spec is None else spec + part        # [H, 768]

        re = spec[:, :NPAD_FREQ]
        im = spec[:, NPAD_FREQ:]
        pspec = (re * re + im * im) * (1.0 / NFFT)              # [H, 384]

        # mel filterbank (cols 0:26) + total energy (col 26) in one matmul
        fbk = jnp.dot(pspec, fb_ref[...], preferred_element_type=jnp.float32)  # [H, 128]
        logfb = jnp.log(jnp.maximum(fbk, EPS))                  # fbk >= 0 by construction

        # DCT-II(ortho) + lifter + appendEnergy folded in; cepstra at lanes 0/13/26
        ceps_sc[...] = jnp.dot(logfb, dct_ref[...],
                               preferred_element_type=jnp.float32)              # [H, 128]

        # ---- edge padding of the cepstra sequence (frames <0 / >T-1), edge tiles only
        @pl.when(i == 0)
        def _():
            ceps_sc[pl.ds(0, HALO), :] = jnp.broadcast_to(
                ceps_sc[pl.ds(HALO, 1), :], (HALO, CEP_COLS))

        for i_aff in range(max(nt - 2, 0), nt):
            kc = T - 1 - i_aff * tile + HALO         # ceps row of frame T-1 in tile i_aff
            if 0 <= kc < H - 1:
                @pl.when(i == i_aff)
                def _(kc=kc):
                    nb = H - 1 - kc
                    ceps_sc[pl.ds(kc + 1, nb), :] = jnp.broadcast_to(
                        ceps_sc[pl.ds(kc, 1), :], (nb, CEP_COLS))

        # ---- first-order delta: dlt row k <-> frame i*tile + k - 2
        ceps = ceps_sc[...]                                     # [H, 128]
        dlt_sc[pl.ds(0, HD), :] = (ceps[3:3 + HD] - ceps[1:1 + HD]
                                   + 2.0 * (ceps[4:4 + HD] - ceps[0:HD])) * 0.1

        # edge padding of the delta sequence (numpy 'edge' pad of delta_feat)
        @pl.when(i == 0)
        def _():
            dlt_sc[pl.ds(0, 2), :] = jnp.broadcast_to(
                dlt_sc[pl.ds(2, 1), :], (2, CEP_COLS))

        for i_aff in range(max(nt - 2, 0), nt):
            kl = T + 1 - i_aff * tile                # dlt row holding delta(T-1) in tile i_aff
            if 0 <= kl < HD - 1:
                @pl.when(i == i_aff)
                def _(kl=kl):
                    nb = HD - 1 - kl
                    dlt_sc[pl.ds(kl + 1, nb), :] = jnp.broadcast_to(
                        dlt_sc[pl.ds(kl, 1), :], (nb, CEP_COLS))

        # ---- second-order delta for the tile's output rows (t <-> frame i*tile + t)
        dlt = dlt_sc[pl.ds(0, HD), :]                           # [HD, 128]
        dd = (dlt[3:3 + tile] - dlt[1:1 + tile]
              + 2.0 * (dlt[4:4 + tile] - dlt[0:tile])) * 0.1    # [tile, 128]

        ceps_out = ceps[4:4 + tile]
        dlt_out = dlt[2:2 + tile]

        # lane select: cols 0:13 mfcc, 13:26 delta, 26:39 delta-delta, rest zero
        lane = jax.lax.broadcasted_iota(jnp.int32, (tile, CEP_COLS), 1)
        out_ref[...] = jnp.where(lane < NUMCEP, ceps_out,
                                 jnp.where(lane < 2 * NUMCEP, dlt_out, dd))

    return kernel


# ------------------------------ module wrapper -------------------------------
def _round_up(x, m):
    return ((x + m - 1) // m) * m


def old_mfcc_transform(waveform, max_tile=504):
    """waveform: [1, N] float32  ->  features [num_frames, 3*NUMCEP] float32."""
    sig = waveform[0]                                   # squeeze(0)
    n = sig.shape[0]

    # preemphasis
    sig = jnp.concatenate([sig[:1], sig[1:] - PREEMPH * sig[:-1]])

    # framing bookkeeping (winfunc = ones, zero pad to a full last frame)
    if n <= FRAME_LEN:
        T = 1
    else:
        T = 1 + int(math.ceil((n - FRAME_LEN) / FRAME_STEP))

    # tile size: as large as possible (H = tile + 8 = 512 at the default -> MXU M
    # granule), but split long-enough audio into >= 2 tiles so the "parallel" grid
    # axis can be sharded across both v7x TensorCores.
    tile = min(max_tile, _round_up(T, 8))
    if tile >= T and T >= 128:
        tile = _round_up(-(-T // 2), 8)
    nt = -(-T // tile)
    H = tile + 2 * HALO
    win = H + 2                                        # chunk rows per tile window

    # signal -> 160-sample chunks with a HALO-chunk zero lead-in; frame t is
    # chunks[t] ++ chunks[t+1] ++ chunks[t+2][:80], so no [T,400] frame tensor
    # (and no gather) is ever materialized in HBM.
    n_chunks = nt * tile + 2 * HALO + 2
    total = n_chunks * FRAME_STEP
    sig = jnp.pad(sig, (HALO * FRAME_STEP, total - HALO * FRAME_STEP - n))
    chunks = sig.reshape(n_chunks, FRAME_STEP)

    # per-tile overlapping windows: static slices + stack (pure copies, ~2% dup).
    chunk_tiles = jnp.stack([chunks[i * tile:i * tile + win] for i in range(nt)])

    out = pl.pallas_call(
        _make_kernel(T, tile, nt),
        out_shape=jax.ShapeDtypeStruct((nt * tile, CEP_COLS), jnp.float32),
        grid=(nt,),
        in_specs=[
            pl.BlockSpec((1, win, FRAME_STEP), lambda i: (i, 0, 0)),             # signal chunks
            pl.BlockSpec((KPAD, 2 * NPAD_FREQ), lambda i: (0, 0)),               # DFT basis hi (bf16, resident)
            pl.BlockSpec((KPAD, 2 * NPAD_FREQ), lambda i: (0, 0)),               # DFT basis lo (bf16, resident)
            pl.BlockSpec((NPAD_FREQ, FB_COLS), lambda i: (0, 0)),                # mel fbank + energy col
            pl.BlockSpec((FB_COLS, CEP_COLS), lambda i: (0, 0)),                 # DCT + lifter + energy
        ],
        out_specs=pl.BlockSpec((tile, CEP_COLS), lambda i: (i, 0)),
        scratch_shapes=[
            pltpu.VMEM((H, CEP_COLS), jnp.float32),        # cepstra (with halo)
            pltpu.VMEM((H, CEP_COLS), jnp.float32),        # first-order delta
        ],
        compiler_params=pltpu.CompilerParams(
            dimension_semantics=("parallel",),
            vmem_limit_bytes=32 * 1024 * 1024,
        ),
    )(chunk_tiles, DFT_HI, DFT_LO, FB_PAD, DCT_PAD)

    # normalizer is None in the reference default -> identity
    return out[:T, :3 * NUMCEP]


if __name__ == "__main__":
    key = jax.random.PRNGKey(0)
    # 0.2 s of 16 kHz audio -> 19 frames
    waveform = jax.random.normal(key, (1, 3200), dtype=jnp.float32)

    feature = old_mfcc_transform(waveform)
    feature = jax.block_until_ready(feature)

    assert feature.shape == (19, 3 * NUMCEP), feature.shape
    assert bool(jnp.all(jnp.isfinite(feature)))
    print("KERNEL_OK")
</pallas_src>

<mosaic_0001>
module attributes {stable_mosaic.version = 11 : i64} {
  func.func @kernel(%arg0: i32, %arg1: memref<1x34x160xf32, #tpu.memory_space<vmem>>, %arg2: memref<480x768xbf16, #tpu.memory_space<vmem>>, %arg3: memref<480x768xbf16, #tpu.memory_space<vmem>>, %arg4: memref<384x128xf32, #tpu.memory_space<vmem>>, %arg5: memref<128x128xf32, #tpu.memory_space<vmem>>, %arg6: memref<24x128xf32, #tpu.memory_space<vmem>>, %arg7: memref<32x128xf32, #tpu.memory_space<vmem>>, %arg8: memref<32x128xf32, #tpu.memory_space<vmem>>) attributes {dimension_semantics = [#tpu.dimension_semantics<parallel>], iteration_bounds = array<i64: 1>, scalar_prefetch = 0 : i64, scratch_operands = 2 : i64, tpu.core_type = #tpu.core_type<tc>, window_params = [{transform_indices = @transform_0, window_bounds = array<i64: 1, 34, 160>}, {pipeline_mode = #tpu.pipeline_mode<synchronous>, transform_indices = @transform_1, window_bounds = array<i64: 480, 768>}, {pipeline_mode = #tpu.pipeline_mode<synchronous>, transform_indices = @transform_2, window_bounds = array<i64: 480, 768>}, {pipeline_mode = #tpu.pipeline_mode<synchronous>, transform_indices = @transform_3, window_bounds = array<i64: 384, 128>}, {pipeline_mode = #tpu.pipeline_mode<synchronous>, transform_indices = @transform_4, window_bounds = array<i64: 128, 128>}, {transform_indices = @transform_5, window_bounds = array<i64: 24, 128>}]} {
    %c0 = arith.constant 0 : index
    %c0_0 = arith.constant 0 : index
    %c0_1 = arith.constant 0 : index
    %0 = vector.load %arg1[%c0, %c0_0, %c0_1] : memref<1x34x160xf32, #tpu.memory_space<vmem>>, vector<1x34x160xf32>
    %1 = vector.shape_cast %0 : vector<1x34x160xf32> to vector<34x160xf32>
    %2 = vector.extract_strided_slice %1 {offsets = [0, 0], sizes = [32, 160], strides = [1, 1]} : vector<34x160xf32> to vector<32x160xf32>
    %3 = arith.truncf %2 : vector<32x160xf32> to vector<32x160xbf16>
    %4 = arith.extf %3 : vector<32x160xbf16> to vector<32x160xf32>
    %5 = arith.subf %2, %4 : vector<32x160xf32>
    %6 = arith.truncf %5 : vector<32x160xf32> to vector<32x160xbf16>
    %c0_2 = arith.constant 0 : index
    %c0_3 = arith.constant 0 : index
    %7 = vector.load %arg2[%c0_2, %c0_3] : memref<480x768xbf16, #tpu.memory_space<vmem>>, vector<160x768xbf16>
    %c0_4 = arith.constant 0 : index
    %c0_5 = arith.constant 0 : index
    %8 = vector.load %arg3[%c0_4, %c0_5] : memref<480x768xbf16, #tpu.memory_space<vmem>>, vector<160x768xbf16>
    %cst = arith.constant dense<0.000000e+00> : vector<32x768xf32>
    %9 = tpu.matmul %3, %7, %cst {dimension_numbers = #tpu.dot_dimension_numbers<[1], [0], [0], [1], [0, 0, 1, 1], [], []>} : vector<32x160xbf16>, vector<160x768xbf16>, vector<32x768xf32> -> vector<32x768xf32>
    %cst_6 = arith.constant dense<0.000000e+00> : vector<32x768xf32>
    %10 = tpu.matmul %6, %7, %cst_6 {dimension_numbers = #tpu.dot_dimension_numbers<[1], [0], [0], [1], [0, 0, 1, 1], [], []>} : vector<32x160xbf16>, vector<160x768xbf16>, vector<32x768xf32> -> vector<32x768xf32>
    %11 = arith.addf %9, %10 : vector<32x768xf32>
    %cst_7 = arith.constant dense<0.000000e+00> : vector<32x768xf32>
    %12 = tpu.matmul %3, %8, %cst_7 {dimension_numbers = #tpu.dot_dimension_numbers<[1], [0], [0], [1], [0, 0, 1, 1], [], []>} : vector<32x160xbf16>, vector<160x768xbf16>, vector<32x768xf32> -> vector<32x768xf32>
    %13 = arith.addf %11, %12 : vector<32x768xf32>
    %14 = vector.extract_strided_slice %1 {offsets = [1, 0], sizes = [32, 160], strides = [1, 1]} : vector<34x160xf32> to vector<32x160xf32>
    %15 = arith.truncf %14 : vector<32x160xf32> to vector<32x160xbf16>
    %16 = arith.extf %15 : vector<32x160xbf16> to vector<32x160xf32>
    %17 = arith.subf %14, %16 : vector<32x160xf32>
    %18 = arith.truncf %17 : vector<32x160xf32> to vector<32x160xbf16>
    %c160 = arith.constant 160 : index
    %c0_8 = arith.constant 0 : index
    %19 = vector.load %arg2[%c160, %c0_8] : memref<480x768xbf16, #tpu.memory_space<vmem>>, vector<160x768xbf16>
    %c160_9 = arith.constant 160 : index
    %c0_10 = arith.constant 0 : index
    %20 = vector.load %arg3[%c160_9, %c0_10] : memref<480x768xbf16, #tpu.memory_space<vmem>>, vector<160x768xbf16>
    %cst_11 = arith.constant dense<0.000000e+00> : vector<32x768xf32>
    %21 = tpu.matmul %15, %19, %cst_11 {dimension_numbers = #tpu.dot_dimension_numbers<[1], [0], [0], [1], [0, 0, 1, 1], [], []>} : vector<32x160xbf16>, vector<160x768xbf16>, vector<32x768xf32> -> vector<32x768xf32>
    %cst_12 = arith.constant dense<0.000000e+00> : vector<32x768xf32>
    %22 = tpu.matmul %18, %19, %cst_12 {dimension_numbers = #tpu.dot_dimension_numbers<[1], [0], [0], [1], [0, 0, 1, 1], [], []>} : vector<32x160xbf16>, vector<160x768xbf16>, vector<32x768xf32> -> vector<32x768xf32>
    %23 = arith.addf %21, %22 : vector<32x768xf32>
    %cst_13 = arith.constant dense<0.000000e+00> : vector<32x768xf32>
    %24 = tpu.matmul %15, %20, %cst_13 {dimension_numbers = #tpu.dot_dimension_numbers<[1], [0], [0], [1], [0, 0, 1, 1], [], []>} : vector<32x160xbf16>, vector<160x768xbf16>, vector<32x768xf32> -> vector<32x768xf32>
    %25 = arith.addf %23, %24 : vector<32x768xf32>
    %26 = arith.addf %13, %25 : vector<32x768xf32>
    %27 = vector.extract_strided_slice %1 {offsets = [2, 0], sizes = [32, 160], strides = [1, 1]} : vector<34x160xf32> to vector<32x160xf32>
    %28 = arith.truncf %27 : vector<32x160xf32> to vector<32x160xbf16>
    %29 = arith.extf %28 : vector<32x160xbf16> to vector<32x160xf32>
    %30 = arith.subf %27, %29 : vector<32x160xf32>
    %31 = arith.truncf %30 : vector<32x160xf32> to vector<32x160xbf16>
    %c320 = arith.constant 320 : index
    %c0_14 = arith.constant 0 : index
    %32 = vector.load %arg2[%c320, %c0_14] : memref<480x768xbf16, #tpu.memory_space<vmem>>, vector<160x768xbf16>
    %c320_15 = arith.constant 320 : index
    %c0_16 = arith.constant 0 : index
    %33 = vector.load %arg3[%c320_15, %c0_16] : memref<480x768xbf16, #tpu.memory_space<vmem>>, vector<160x768xbf16>
    %cst_17 = arith.constant dense<0.000000e+00> : vector<32x768xf32>
    %34 = tpu.matmul %28, %32, %cst_17 {dimension_numbers = #tpu.dot_dimension_numbers<[1], [0], [0], [1], [0, 0, 1, 1], [], []>} : vector<32x160xbf16>, vector<160x768xbf16>, vector<32x768xf32> -> vector<32x768xf32>
    %cst_18 = arith.constant dense<0.000000e+00> : vector<32x768xf32>
    %35 = tpu.matmul %31, %32, %cst_18 {dimension_numbers = #tpu.dot_dimension_numbers<[1], [0], [0], [1], [0, 0, 1, 1], [], []>} : vector<32x160xbf16>, vector<160x768xbf16>, vector<32x768xf32> -> vector<32x768xf32>
    %36 = arith.addf %34, %35 : vector<32x768xf32>
    %cst_19 = arith.constant dense<0.000000e+00> : vector<32x768xf32>
    %37 = tpu.matmul %28, %33, %cst_19 {dimension_numbers = #tpu.dot_dimension_numbers<[1], [0], [0], [1], [0, 0, 1, 1], [], []>} : vector<32x160xbf16>, vector<160x768xbf16>, vector<32x768xf32> -> vector<32x768xf32>
    %38 = arith.addf %36, %37 : vector<32x768xf32>
    %39 = arith.addf %26, %38 : vector<32x768xf32>
    %40 = vector.extract_strided_slice %39 {offsets = [0, 0], sizes = [32, 384], strides = [1, 1]} : vector<32x768xf32> to vector<32x384xf32>
    %41 = vector.extract_strided_slice %39 {offsets = [0, 384], sizes = [32, 384], strides = [1, 1]} : vector<32x768xf32> to vector<32x384xf32>
    %42 = arith.mulf %40, %40 : vector<32x384xf32>
    %43 = arith.mulf %41, %41 : vector<32x384xf32>
    %44 = arith.addf %42, %43 : vector<32x384xf32>
    %cst_20 = arith.constant 0.001953125 : f32
    %45 = vector.broadcast %cst_20 : f32 to vector<32x384xf32>
    %46 = arith.mulf %44, %45 : vector<32x384xf32>
    %c0_21 = arith.constant 0 : index
    %c0_22 = arith.constant 0 : index
    %47 = vector.load %arg4[%c0_21, %c0_22] : memref<384x128xf32, #tpu.memory_space<vmem>>, vector<384x128xf32>
    %cst_23 = arith.constant dense<0.000000e+00> : vector<32x128xf32>
    %48 = tpu.matmul %46, %47, %cst_23 {dimension_numbers = #tpu.dot_dimension_numbers<[1], [0], [0], [1], [0, 0, 1, 1], [], []>} : vector<32x384xf32>, vector<384x128xf32>, vector<32x128xf32> -> vector<32x128xf32>
    %cst_24 = arith.constant 2.22044605E-16 : f32
    %49 = vector.broadcast %cst_24 : f32 to vector<32x128xf32>
    %50 = arith.maximumf %48, %49 : vector<32x128xf32>
    %51 = math.log %50 : vector<32x128xf32>
    %c0_25 = arith.constant 0 : index
    %c0_26 = arith.constant 0 : index
    %52 = vector.load %arg5[%c0_25, %c0_26] : memref<128x128xf32, #tpu.memory_space<vmem>>, vector<128x128xf32>
    %cst_27 = arith.constant dense<0.000000e+00> : vector<32x128xf32>
    %53 = tpu.matmul %51, %52, %cst_27 {dimension_numbers = #tpu.dot_dimension_numbers<[1], [0], [0], [1], [0, 0, 1, 1], [], []>} : vector<32x128xf32>, vector<128x128xf32>, vector<32x128xf32> -> vector<32x128xf32>
    %c0_28 = arith.constant 0 : index
    %c0_29 = arith.constant 0 : index
    %54 = vector.load %arg7[%c0_28, %c0_29] : memref<32x128xf32, #tpu.memory_space<vmem>>, vector<32x128xf32>
    tpu.vector_store %arg7[%c0_28, %c0_29], %53 {strides = array<i32>} : memref<32x128xf32, #tpu.memory_space<vmem>>, vector<32x128xf32>,
    %c0_i32 = arith.constant 0 : i32
    %55 = arith.cmpi eq, %arg0, %c0_i32 : i32
    %56 = arith.extui %55 : i1 to i32
    %c0_i32_30 = arith.constant 0 : i32
    %57 = arith.cmpi ne, %56, %c0_i32_30 : i32
    scf.if %57 {
      %c4 = arith.constant 4 : index
      %c0_49 = arith.constant 0 : index
      %102 = vector.load %arg7[%c4, %c0_49] : memref<32x128xf32, #tpu.memory_space<vmem>>, vector<1x128xf32>
      %103 = vector.shape_cast %102 : vector<1x128xf32> to vector<1x128xf32>
      %104 = vector.broadcast %103 : vector<1x128xf32> to vector<4x128xf32>
      %c0_50 = arith.constant 0 : index
      %c0_51 = arith.constant 0 : index
      %105 = vector.load %arg7[%c0_50, %c0_51] : memref<32x128xf32, #tpu.memory_space<vmem>>, vector<4x128xf32>
      tpu.vector_store %arg7[%c0_50, %c0_51], %104 {strides = array<i32>} : memref<32x128xf32, #tpu.memory_space<vmem>>, vector<4x128xf32>,
    } else {
    }
    %c0_i32_31 = arith.constant 0 : i32
    %58 = arith.cmpi eq, %arg0, %c0_i32_31 : i32
    %59 = arith.extui %58 : i1 to i32
    %c0_i32_32 = arith.constant 0 : i32
    %60 = arith.cmpi ne, %59, %c0_i32_32 : i32
    scf.if %60 {
      %c22 = arith.constant 22 : index
      %c0_49 = arith.constant 0 : index
      %102 = vector.load %arg7[%c22, %c0_49] : memref<32x128xf32, #tpu.memory_space<vmem>>, vector<1x128xf32>
      %103 = vector.shape_cast %102 : vector<1x128xf32> to vector<1x128xf32>
      %104 = vector.broadcast %103 : vector<1x128xf32> to vector<9x128xf32>
      %c23 = arith.constant 23 : index
      %c0_50 = arith.constant 0 : index
      %105 = vector.load %arg7[%c23, %c0_50] : memref<32x128xf32, #tpu.memory_space<vmem>>, vector<9x128xf32>
      tpu.vector_store %arg7[%c23, %c0_50], %104 {strides = array<i32>} : memref<32x128xf32, #tpu.memory_space<vmem>>, vector<9x128xf32>,
    } else {
    }
    %c0_33 = arith.constant 0 : index
    %c0_34 = arith.constant 0 : index
    %61 = vector.load %arg7[%c0_33, %c0_34] : memref<32x128xf32, #tpu.memory_space<vmem>>, vector<32x128xf32>
    %62 = vector.extract_strided_slice %61 {offsets = [3, 0], sizes = [28, 128], strides = [1, 1]} : vector<32x128xf32> to vector<28x128xf32>
    %63 = vector.extract_strided_slice %61 {offsets = [1, 0], sizes = [28, 128], strides = [1, 1]} : vector<32x128xf32> to vector<28x128xf32>
    %64 = arith.subf %62, %63 : vector<28x128xf32>
    %65 = vector.extract_strided_slice %61 {offsets = [4, 0], sizes = [28, 128], strides = [1, 1]} : vector<32x128xf32> to vector<28x128xf32>
    %66 = vector.extract_strided_slice %61 {offsets = [0, 0], sizes = [28, 128], strides = [1, 1]} : vector<32x128xf32> to vector<28x128xf32>
    %67 = arith.subf %65, %66 : vector<28x128xf32>
    %cst_35 = arith.constant 2.000000e+00 : f32
    %68 = vector.broadcast %cst_35 : f32 to vector<28x128xf32>
    %69 = arith.mulf %68, %67 : vector<28x128xf32>
    %70 = arith.addf %64, %69 : vector<28x128xf32>
    %cst_36 = arith.constant 1.000000e-01 : f32
    %71 = vector.broadcast %cst_36 : f32 to vector<28x128xf32>
    %72 = arith.mulf %70, %71 : vector<28x128xf32>
    %c0_37 = arith.constant 0 : index
    %c0_38 = arith.constant 0 : index
    %73 = vector.load %arg8[%c0_37, %c0_38] : memref<32x128xf32, #tpu.memory_space<vmem>>, vector<28x128xf32>
    tpu.vector_store %arg8[%c0_37, %c0_38], %72 {strides = array<i32>} : memref<32x128xf32, #tpu.memory_space<vmem>>, vector<28x128xf32>,
    %c0_i32_39 = arith.constant 0 : i32
    %74 = arith.cmpi eq, %arg0, %c0_i32_39 : i32
    %75 = arith.extui %74 : i1 to i32
    %c0_i32_40 = arith.constant 0 : i32
    %76 = arith.cmpi ne, %75, %c0_i32_40 : i32
    scf.if %76 {
      %c2 = arith.constant 2 : index
      %c0_49 = arith.constant 0 : index
      %102 = vector.load %arg8[%c2, %c0_49] : memref<32x128xf32, #tpu.memory_space<vmem>>, vector<1x128xf32>
      %103 = vector.shape_cast %102 : vector<1x128xf32> to vector<1x128xf32>
      %104 = vector.broadcast %103 : vector<1x128xf32> to vector<2x128xf32>
      %c0_50 = arith.constant 0 : index
      %c0_51 = arith.constant 0 : index
      %105 = vector.load %arg8[%c0_50, %c0_51] : memref<32x128xf32, #tpu.memory_space<vmem>>, vector<2x128xf32>
      tpu.vector_store %arg8[%c0_50, %c0_51], %104 {strides = array<i32>} : memref<32x128xf32, #tpu.memory_space<vmem>>, vector<2x128xf32>,
    } else {
    }
    %c0_i32_41 = arith.constant 0 : i32
    %77 = arith.cmpi eq, %arg0, %c0_i32_41 : i32
    %78 = arith.extui %77 : i1 to i32
    %c0_i32_42 = arith.constant 0 : i32
    %79 = arith.cmpi ne, %78, %c0_i32_42 : i32
    scf.if %79 {
      %c20 = arith.constant 20 : index
      %c0_49 = arith.constant 0 : index
      %102 = vector.load %arg8[%c20, %c0_49] : memref<32x128xf32, #tpu.memory_space<vmem>>, vector<1x128xf32>
      %103 = vector.shape_cast %102 : vector<1x128xf32> to vector<1x128xf32>
      %104 = vector.broadcast %103 : vector<1x128xf32> to vector<7x128xf32>
      %c21 = arith.constant 21 : index
      %c0_50 = arith.constant 0 : index
      %105 = vector.load %arg8[%c21, %c0_50] : memref<32x128xf32, #tpu.memory_space<vmem>>, vector<7x128xf32>
      tpu.vector_store %arg8[%c21, %c0_50], %104 {strides = array<i32>} : memref<32x128xf32, #tpu.memory_space<vmem>>, vector<7x128xf32>,
    } else {
    }
    %c0_43 = arith.constant 0 : index
    %c0_44 = arith.constant 0 : index
    %80 = vector.load %arg8[%c0_43, %c0_44] : memref<32x128xf32, #tpu.memory_space<vmem>>, vector<28x128xf32>
    %81 = vector.extract_strided_slice %80 {offsets = [3, 0], sizes = [24, 128], strides = [1, 1]} : vector<28x128xf32> to vector<24x128xf32>
    %82 = vector.extract_strided_slice %80 {offsets = [1, 0], sizes = [24, 128], strides = [1, 1]} : vector<28x128xf32> to vector<24x128xf32>
    %83 = arith.subf %81, %82 : vector<24x128xf32>
    %84 = vector.extract_strided_slice %80 {offsets = [4, 0], sizes = [24, 128], strides = [1, 1]} : vector<28x128xf32> to vector<24x128xf32>
    %85 = vector.extract_strided_slice %80 {offsets = [0, 0], sizes = [24, 128], strides = [1, 1]} : vector<28x128xf32> to vector<24x128xf32>
    %86 = arith.subf %84, %85 : vector<24x128xf32>
    %cst_45 = arith.constant 2.000000e+00 : f32
    %87 = vector.broadcast %cst_45 : f32 to vector<24x128xf32>
    %88 = arith.mulf %87, %86 : vector<24x128xf32>
    %89 = arith.addf %83, %88 : vector<24x128xf32>
    %cst_46 = arith.constant 1.000000e-01 : f32
    %90 = vector.broadcast %cst_46 : f32 to vector<24x128xf32>
    %91 = arith.mulf %89, %90 : vector<24x128xf32>
    %92 = vector.extract_strided_slice %61 {offsets = [4, 0], sizes = [24, 128], strides = [1, 1]} : vector<32x128xf32> to vector<24x128xf32>
    %93 = vector.extract_strided_slice %80 {offsets = [2, 0], sizes = [24, 128], strides = [1, 1]} : vector<28x128xf32> to vector<24x128xf32>
    %94 = tpu.iota {dimensions = array<i32: 1>} : vector<24x128xi32>
    %c13_i32 = arith.constant 13 : i32
    %95 = vector.broadcast %c13_i32 : i32 to vector<24x128xi32>
    %96 = arith.cmpi slt, %94, %95 : vector<24x128xi32>
    %c26_i32 = arith.constant 26 : i32
    %97 = vector.broadcast %c26_i32 : i32 to vector<24x128xi32>
    %98 = arith.cmpi slt, %94, %97 : vector<24x128xi32>
    %99 = arith.select %98, %93, %91 : vector<24x128xi1>, vector<24x128xf32>
    %100 = arith.select %96, %92, %99 : vector<24x128xi1>, vector<24x128xf32>
    %c0_47 = arith.constant 0 : index
    %c0_48 = arith.constant 0 : index
    %101 = vector.load %arg6[%c0_47, %c0_48] : memref<24x128xf32, #tpu.memory_space<vmem>>, vector<24x128xf32>
    tpu.vector_store %arg6[%c0_47, %c0_48], %100 {strides = array<i32>} : memref<24x128xf32, #tpu.memory_space<vmem>>, vector<24x128xf32>,
    return
  }
  func.func @transform_0(%arg0: i32) -> (i32, i32, i32) {
    %c0_i32 = arith.constant 0 : i32
    %c0_i32_0 = arith.constant 0 : i32
    %c0_i32_1 = arith.constant 0 : i32
    return %arg0, %c0_i32, %c0_i32_0 : i32, i32, i32
  }
  func.func @transform_1(%arg0: i32) -> (i32, i32) {
    %c0_i32 = arith.constant 0 : i32
    %c0_i32_0 = arith.constant 0 : i32
    %c0_i32_1 = arith.constant 0 : i32
    return %c0_i32, %c0_i32_0 : i32, i32
  }
  func.func @transform_2(%arg0: i32) -> (i32, i32) {
    %c0_i32 = arith.constant 0 : i32
    %c0_i32_0 = arith.constant 0 : i32
    %c0_i32_1 = arith.constant 0 : i32
    return %c0_i32, %c0_i32_0 : i32, i32
  }
  func.func @transform_3(%arg0: i32) -> (i32, i32) {
    %c0_i32 = arith.constant 0 : i32
    %c0_i32_0 = arith.constant 0 : i32
    %c0_i32_1 = arith.constant 0 : i32
    return %c0_i32, %c0_i32_0 : i32, i32
  }
  func.func @transform_4(%arg0: i32) -> (i32, i32) {
    %c0_i32 = arith.constant 0 : i32
    %c0_i32_0 = arith.constant 0 : i32
    %c0_i32_1 = arith.constant 0 : i32
    return %c0_i32, %c0_i32_0 : i32, i32
  }
  func.func @transform_5(%arg0: i32) -> (i32, i32) {
    %c0_i32 = arith.constant 0 : i32
    %c0_i32_0 = arith.constant 0 : i32
    return %arg0, %c0_i32 : i32, i32
  }
}

</mosaic_0001>

<bundles_post_ra>
// kernel: tpu_custom_call.1
= control target key start
LH: loop header
LB: loop body
LE: loop exit
PB: predicated region body
PF: predicated region fallthrough
CT: control target
= control target key end

     0   :  { %10 = vsyncpa [#allocation5], 0  ;;  %s9354_s0 = inlined_call_operand.vmem [shape: f32[1,34,160], index: 0, kind: input, shape index: {}]   ;;  %s9355_s1 = inlined_call_operand.hbm [shape: bf16[480,768], index: 1, kind: input, shape index: {}]   ;;  %s9356_s2 = inlined_call_operand.hbm [shape: bf16[480,768], index: 2, kind: input, shape index: {}]   ;;  %s9357_s3 = inlined_call_operand.hbm [shape: f32[384,128], index: 3, kind: input, shape index: {}]   ;;  %s9358_s4 = inlined_call_operand.vmem [shape: f32[128,128], index: 4, kind: input, shape index: {}]   ;;  %s9359_s5 = inlined_call_operand.hbm [shape: f32[24,128], index: 5, kind: output, shape index: {}]  }
   0x1   :  { %11 = vsyncpa [#allocation8], 0 }
   0x2   :  { %12 = vsyncpa [#allocation6], 0  ;;  %s32_s20 = sshll.u32 %s9356_s2, 4  ;;  %s7127_s21 = smov [#allocation7]   ;;  %s33_s20 = int_to_ptr.hbm [resolvable:$true] %s32_s20 }
   0x3   :  { %s34_s22 = sshll.u32 %s7127_s21, 4  ;;  %s19_s25 = sshll.u32 %s9355_s1, 4  ;;  %s35_s22 = int_to_ptr.vmem [resolvable:$true] %s34_s22  ;;  %s20_s25 = int_to_ptr.hbm [resolvable:$true] %s19_s25 }
   0x4   :  { %s7128_s26 = smov 384   ;;  %s7129_s27 = smov 24  }
   0x5   :  { %40 = dma.hbm_to_vmem [thread:$0]  %s33_s20, 23040, %s35_s22, [#allocation8], %s7128_s26, %s7128_s26, %s7129_s27  }
   0x6   :  { %s7130_s28 = smov [#allocation4]   ;;  %s45_s7 = sshll.u32 %s9357_s3, 4  ;;  %s46_s7 = int_to_ptr.hbm [resolvable:$true] %s45_s7 }
   0x7   :  { %s21_s29 = sshll.u32 %s7130_s28, 4  ;;  %s7131_s2 = smov [#allocation9]   ;;  %s22_s29 = int_to_ptr.vmem [resolvable:$true] %s21_s29 }
   0x8   :  { %27 = dma.hbm_to_vmem [thread:$0]  %s20_s25, 23040, %s22_s29, [#allocation5], %s7128_s26, %s7128_s26, %s7129_s27  }
   0x9   :  { %s47_s8 = sshll.u32 %s7131_s2, 4  ;;  %s7132_s9 = smov 128   ;;  %s48_s8 = int_to_ptr.vmem [resolvable:$true] %s47_s8 }
   0xa   :  { %s7133_s10 = smov 8  }
   0xb   :  { %53 = dma.hbm_to_vmem [thread:$0]  %s46_s7, 6144, %s48_s8, [#allocation8], %s7132_s9, %s7132_s9, %s7133_s10  }
   0xc   :  { %7121 = dma.done.wait [#allocation5], 23040  }
   0xd   :  { %7122 = vsyncadd [#allocation5], 4294944256 }
   0xe   :  { %7123 = dma.done.wait [#allocation8], 29184  }
   0xf   :  { %7124 = vsyncadd [#allocation8], 4294938112  ;;  %v5249_v0 = vld [vmem:[#allocation4 + $0x150] sm:$0xf]  ;;  %v6672_v1 = vld [vmem:[#allocation4 + $0x164] sm:$0xf0] }
  0x10   :  { %v5297_v2 = vld [vmem:[#allocation4 + $0x1b0] sm:$0xf]  ;;  %v7177_v3 = vor.u32 %v6672_v1, %v5249_v0  ;;  %v6684_v4 = vld [vmem:[#allocation4 + $0x1c4] sm:$0xf0]  ;;  %v6669_v5 = vld [vmem:[#allocation4 + $0x154] sm:$0xf] }
  0x11   :  { %v5251_v6 = vld [vmem:[#allocation4 + $0x168] sm:$0xf0]  ;;  %v7179_v7 = vor.u32 %v6684_v4, %v5297_v2  ;;  %v6681_v9 = vld [vmem:[#allocation4 + $0x1b4] sm:$0xf]  ;;  %v5225_v11 = vld [vmem:[#allocation4 + $0x120] sm:$0xf] }
  0x12   :  { %v7181_v8 = vor.u32 %v6669_v5, %v5251_v6  ;;  %v5299_v10 = vld [vmem:[#allocation4 + $0x1c8] sm:$0xf0]  ;;  %530 = vmatpush.bf16.msra.mxu0 %v7177_v3  ;;  %v6666_v13 = vld [vmem:[#allocation4 + $0x134] sm:$0xf0]  ;;  %v5273_v14 = vld [vmem:[#allocation4 + $0x180] sm:$0xf] }
  0x13   :  { %v7184_v12 = vor.u32 %v6681_v9, %v5299_v10  ;;  %v6678_v15 = vld [vmem:[#allocation4 + $0x194] sm:$0xf0]  ;;  %555 = vmatpush.bf16.msra.mxu1 %v7179_v7  ;;  %v7188_v16 = vor.u32 %v6666_v13, %v5225_v11  ;;  %v6663_v18 = vld [vmem:[#allocation4 + $0x124] sm:$0xf]  ;;  %v5227_v19 = vld [vmem:[#allocation4 + $0x138] sm:$0xf0] }
  0x14   :  { %568 = vmatpush.bf16.msra.mxu2 %v7181_v8  ;;  %v7190_v17 = vor.u32 %v6678_v15, %v5273_v14  ;;  %v6675_v20 = vld [vmem:[#allocation4 + $0x184] sm:$0xf]  ;;  %v7193_v21 = vor.u32 %v6663_v18, %v5227_v19  ;;  %v5275_v22 = vld [vmem:[#allocation4 + $0x198] sm:$0xf0]  ;;  %v70_v24 = vld [vmem:[%s9354_s0 + $0x8] sm:$0xff]  ;;  %vm523_vm0 = vcmask 261120  }
  0x15   :  { %593 = vmatpush.bf16.msra.mxu3 %v7184_v12  ;;  %v7198_v23 = vld [vmem:[%s9354_s0] sm:$0xff]  ;;  %v7203_v25 = vor.u32 %v6675_v20, %v5275_v22  ;;  %v7208_v26 = vld [vmem:[%s9354_s0 + $0x10] sm:$0xff]  ;;  %v72_v27 = vld [vmem:[%s9354_s0 + $0x18] sm:$0xff]  ;;  %vm1689_vm1 = vsmask.f32 7424  ;;  %vm3245_vm2 = vcmask 1046528  }
  0x16   :  { %v7214_v28 = vpack.c.bf16 %v70_v24, %v7198_v23  ;;  %v5305_v29 = vld [vmem:[#allocation4 + $0x1b8] sm:$0xf]  ;;  %531 = vmatpush.bf16.msra.mxu0 %v7188_v16  ;;  %v7218_v30 = vpack.c.bf16 %v72_v27, %v7208_v26  ;;  %v6685_v31 = vld [vmem:[#allocation4 + $0x1cc] sm:$0xf0]  ;;  %v6660_v33 = vld [vmem:[#allocation4 + $0x104] sm:$0xf0] }
  0x17   :  { %v5201_v32 = vld [vmem:[#allocation4 + $0xf0] sm:$0xf]  ;;  %556 = vmatpush.bf16.msra.mxu1 %v7190_v17  ;;  %v7225_v37 = vor.u32 %v6685_v31, %v5305_v29  ;;  %v6657_v38 = vld [vmem:[#allocation4 + $0xf4] sm:$0xf]  ;;  %v5203_v39 = vld [vmem:[#allocation4 + $0x108] sm:$0xf0] }
  0x18   :  { %569 = vmatpush.bf16.msra.mxu2 %v7193_v21  ;;  %v84_v34 = vunpack.c.h.bf16 %v7214_v28  ;;  %v762_v35 = vunpack.c.l.b16 %v7214_v28  ;;  %v763_v36 = vunpack.c.h.b16 %v7214_v28  ;;  %v5257_v40 = vld [vmem:[#allocation4 + $0x158] sm:$0xf]  ;;  %v86_v41 = vunpack.c.h.bf16 %v7218_v30  ;;  %v6673_v45 = vld [vmem:[#allocation4 + $0x16c] sm:$0xf0]  ;;  %v5177_v46 = vld [vmem:[#allocation4 + $0xc0] sm:$0xf] }
  0x19   :  { %594 = vmatpush.bf16.msra.mxu3 %v7203_v25  ;;  %v764_v42 = vunpack.c.l.b16 %v7218_v30  ;;  %v765_v43 = vunpack.c.h.b16 %v7218_v30  ;;  %v7231_v44 = vor.u32 %v6660_v33, %v5201_v32  ;;  %v6654_v47 = vld [vmem:[#allocation4 + $0xd4] sm:$0xf0]  ;;  %v7234_v49 = vor.u32 %v6657_v38, %v5203_v39  ;;  %v6651_v51 = vld [vmem:[#allocation4 + $0xc4] sm:$0xf]  ;;  %v5179_v52 = vld [vmem:[#allocation4 + $0xd8] sm:$0xf0] }
  0x1a   :  { %v92_v48 = vsub.f32 %v70_v24, %v84_v34  ;;  %v7236_v50 = vor.u32 %v6673_v45, %v5257_v40  ;;  %v5233_v53 = vld [vmem:[#allocation4 + $0x128] sm:$0xf]  ;;  %v94_v54 = vsub.f32 %v72_v27, %v86_v41  ;;  %v6667_v57 = vld [vmem:[#allocation4 + $0x13c] sm:$0xf0]  ;;  %v7245_v58 = vor.u32 %v6654_v47, %v5177_v46  ;;  %v5153_v60 = vld [vmem:[#allocation4 + $0x90] sm:$0xf] }
  0x1b   :  { %v7238_v55 = vpack.c.b16 %v764_v42, %v762_v35  ;;  %v7240_v56 = vpack.c.b16 %v765_v43, %v763_v36  ;;  %532 = vmatpush.bf16.msra.mxu0 %v7231_v44  ;;  %v7247_v59 = vor.u32 %v6651_v51, %v5179_v52  ;;  %v7251_v62 = vor.u32 %v6667_v57, %v5233_v53  ;;  %v6648_v63 = vld [vmem:[#allocation4 + $0xa4] sm:$0xf0]  ;;  %v6645_v0 = vld [vmem:[#allocation4 + $0x94] sm:$0xf]  ;;  %v5155_v1 = vld [vmem:[#allocation4 + $0xa8] sm:$0xf0] }
  0x1c   :  { %570 = vmatpush.bf16.msra.mxu2 %v7234_v49  ;;  %606 = vmatpush.bf16.msrb.mxu1 %v7236_v50  ;;  %v7249_v61 = vpack.c.bf16 %v94_v54, %v92_v48  ;;  %v5209_v2 = vld [vmem:[#allocation4 + $0xf8] sm:$0xf]  ;;  %v6661_v4 = vld [vmem:[#allocation4 + $0x10c] sm:$0xf0]  ;;  %v5129_v5 = vld [vmem:[#allocation4 + $0x60] sm:$0xf]  ;;  %v7267_v11 = vor.u32 %v6648_v63, %v5153_v60  ;;  %v7269_v13 = vor.u32 %v6645_v0, %v5155_v1  ;;  %v83_v0 = vunpack.c.l.bf16 %v7214_v28 }
  0x1d   :  { %631 = vmatpush.bf16.msrb.mxu3 %v7225_v37  ;;  %9431 = vst [vmem:[#allocation14_spill] sm:$0xff] %v7238_v55  ;;  %v6642_v6 = vld [vmem:[#allocation4 + $0x74] sm:$0xf0]  ;;  %v7260_v9 = vld [vmem:[%s9354_s0 + $0x20] sm:$0xff]  ;;  %v74_v10 = vld [vmem:[%s9354_s0 + $0x28] sm:$0xff]  ;;  %v7283_v20 = vor.u32 %v6661_v4, %v5209_v2  ;;  %v85_v1 = vunpack.c.l.bf16 %v7218_v30  ;;  %vm4893_vm3 = vcmask 1043456  }
  0x1e   :  { %9432 = vst [vmem:[#allocation15_spill] sm:$0xff] %v7240_v56  ;;  %5319 = vmatmul.msk.bf16.vlgmr.msra.gmra.mxu1 %vm523_vm0, %v7249_v61  ;;  %5321 = vmatmul.msk.bf16.vlgmr.msra.gmra.mxu3 %vm523_vm0, %v7249_v61  ;;  %v7274_v14 = vld [vmem:[%s9354_s0 + $0x30] sm:$0xff]  ;;  %v76_v15 = vld [vmem:[%s9354_s0 + $0x38] sm:$0xff]  ;;  %v7280_v18 = vpack.c.bf16 %v74_v10, %v7260_v9  ;;  %v5281_v19 = vld [vmem:[#allocation4 + $0x188] sm:$0xf]  ;;  %v7298_v41 = vor.u32 %v6642_v6, %v5129_v5  ;;  %vm4877_vm4 = vcmask 1041408  }
  0x1f   :  { %9433 = vst [vmem:[#allocation16_spill] sm:$0xff] %v7249_v61  ;;  %533 = vmatpush.bf16.msra.mxu0 %v7245_v58  ;;  %v6639_v22 = vld [vmem:[#allocation4 + $0x64] sm:$0xf]  ;;  %v5131_v24 = vld [vmem:[#allocation4 + $0x78] sm:$0xf0]  ;;  %v7286_v27 = vpack.c.bf16 %v76_v15, %v7274_v14  ;;  %s5065_s3 = sshll.u32 %s9359_s5, 4  ;;  %s5066_s3 = int_to_ptr.hbm [resolvable:$true] %s5065_s3 }
  0x20   :  { %571 = vmatpush.bf16.msra.mxu2 %v7247_v59  ;;  %607 = vmatpush.bf16.msrb.mxu1 %v7251_v62  ;;  %v6679_v29 = vld [vmem:[#allocation4 + $0x19c] sm:$0xf0]  ;;  %v5185_v31 = vld [vmem:[#allocation4 + $0xc8] sm:$0xf]  ;;  %v766_v33 = vunpack.c.l.b16 %v7280_v18  ;;  %v767_v34 = vunpack.c.h.b16 %v7280_v18  ;;  %v88_v36 = vunpack.c.h.bf16 %v7280_v18  ;;  %v7300_v42 = vor.u32 %v6639_v22, %v5131_v24  ;;  %v5105_v43 = vld [vmem:[#allocation4 + $0x30] sm:$0xf] }
  0x21   :  { %v6655_v32 = vld [vmem:[#allocation4 + $0xdc] sm:$0xf0]  ;;  %v7290_v35 = vor.u32 %v6679_v29, %v5281_v19  ;;  %v90_v38 = vunpack.c.h.bf16 %v7286_v27  ;;  %v768_v39 = vunpack.c.l.b16 %v7286_v27  ;;  %v769_v40 = vunpack.c.h.b16 %v7286_v27  ;;  %v6636_v48 = vld [vmem:[#allocation4 + $0x44] sm:$0xf0]  ;;  %v6633_v51 = vld [vmem:[#allocation4 + $0x34] sm:$0xf] }
  0x22   :  { %v7303_v45 = vor.u32 %v6655_v32, %v5185_v31  ;;  %v5107_v52 = vld [vmem:[#allocation4 + $0x48] sm:$0xf0]  ;;  %v5161_v53 = vld [vmem:[#allocation4 + $0x98] sm:$0xf]  ;;  %v6649_v54 = vld [vmem:[#allocation4 + $0xac] sm:$0xf0]  ;;  %v96_v57 = vsub.f32 %v74_v10, %v88_v36  ;;  %v7314_v2 = vor.u32 %v6636_v48, %v5105_v43 }
  0x23   :  { %534 = vmatpush.bf16.msra.mxu0 %v7267_v11  ;;  %v7305_v46 = vpack.c.b16 %v768_v39, %v766_v33  ;;  %v7307_v47 = vpack.c.b16 %v769_v40, %v767_v34  ;;  %632 = vmatpush.bf16.msrb.mxu3 %v7290_v35  ;;  %v98_v60 = vsub.f32 %v76_v15, %v90_v38  ;;  %v5081_v63 = vld [vmem:[#allocation4] sm:$0xf]  ;;  %v6630_v5 = vld [vmem:[#allocation4 + $0x14] sm:$0xf0]  ;;  %v6682_v6 = vld [vmem:[#allocation4 + $0x1bc] sm:$0xf] }
  0x24   :  { %572 = vmatpush.bf16.msra.mxu2 %v7269_v13  ;;  %608 = vmatpush.bf16.msrb.mxu1 %v7283_v20  ;;  %v7316_v4 = vor.u32 %v6633_v51, %v5107_v52  ;;  %v5307_v19 = vld [vmem:[#allocation4 + $0x1d0] sm:$0xf0]  ;;  %v7319_v10 = vor.u32 %v6649_v54, %v5161_v53  ;;  %v6627_v15 = vld [vmem:[#allocation4 + $0x4] sm:$0xf]  ;;  %v5083_v22 = vld [vmem:[#allocation4 + $0x18] sm:$0xf0]  ;;  %v91_v33 = vsub.f32 %v7198_v23, %v83_v0 }
  0x25   :  { %9434 = vst [vmem:[#allocation17_spill] sm:$0xff] %v7305_v46  ;;  %v5137_v28 = vld [vmem:[#allocation4 + $0x68] sm:$0xf]  ;;  %v7321_v24 = vor.u32 %v6682_v6, %v5307_v19  ;;  %v6643_v30 = vld [vmem:[#allocation4 + $0x7c] sm:$0xf0]  ;;  %v7323_v32 = vpack.c.bf16 %v98_v60, %v96_v57  ;;  %v93_v34 = vsub.f32 %v7208_v26, %v85_v1  ;;  %v7330_v36 = vor.u32 %v6630_v5, %v5081_v63 }
  0x26   :  { %9435 = vst [vmem:[#allocation18_spill] sm:$0xff] %v7307_v47  ;;  %v6670_v29 = vld [vmem:[#allocation4 + $0x15c] sm:$0xf]  ;;  %v5259_v31 = vld [vmem:[#allocation4 + $0x170] sm:$0xf0]  ;;  %v7332_v38 = vor.u32 %v6627_v15, %v5083_v22  ;;  %v7335_v39 = vor.u32 %v6643_v30, %v5137_v28 }
  0x27   :  { %535 = vmatpush.bf16.msra.mxu0 %v7298_v41  ;;  %9436 = vst [vmem:[#allocation19_spill] sm:$0xff] %v7323_v32  ;;  %6987 = vmatpush.bf16.msra.mxu3 %v7321_v24  ;;  %v5113_v40 = vld [vmem:[#allocation4 + $0x38] sm:$0xf]  ;;  %v7337_v43 = vor.u32 %v6670_v29, %v5259_v31  ;;  %v6637_v23 = vld [vmem:[#allocation4 + $0x4c] sm:$0xf0]  ;;  %v7343_v51 = vpack.c.bf16 %v93_v34, %v91_v33  ;;  %v87_v34 = vunpack.c.l.bf16 %v7280_v18 }
  0x28   :  { %573 = vmatpush.bf16.msra.mxu2 %v7300_v42  ;;  %609 = vmatpush.bf16.msrb.mxu1 %v7303_v45  ;;  %v6664_v48 = vld [vmem:[#allocation4 + $0x12c] sm:$0xf]  ;;  %v5235_v26 = vld [vmem:[#allocation4 + $0x140] sm:$0xf0]  ;;  %v7350_v57 = vor.u32 %v6637_v23, %v5113_v40  ;;  %v5089_v60 = vld [vmem:[#allocation4 + $0x8] sm:$0xf]  ;;  %v89_v40 = vunpack.c.l.bf16 %v7286_v27 }
  0x29   :  { %9437 = vst [vmem:[#allocation20_spill] sm:$0xff] %v7343_v51  ;;  %v6676_v52 = vld [vmem:[#allocation4 + $0x18c] sm:$0xf]  ;;  %v5283_v53 = vld [vmem:[#allocation4 + $0x1a0] sm:$0xf0]  ;;  %v7353_v63 = vor.u32 %v6664_v48, %v5235_v26 }
  0x2a   :  { %v7347_v54 = vor.u32 %v6676_v52, %v5283_v53  ;;  %v6631_v0 = vld [vmem:[#allocation4 + $0x1c] sm:$0xf0]  ;;  %v6658_v1 = vld [vmem:[#allocation4 + $0xfc] sm:$0xf]  ;;  %v5211_v5 = vld [vmem:[#allocation4 + $0x110] sm:$0xf0]  ;;  %v95_v53 = vsub.f32 %v7260_v9, %v87_v34 }
  0x2b   :  { %536 = vmatpush.bf16.msra.mxu0 %v7314_v2  ;;  %v5265_v6 = vld [vmem:[#allocation4 + $0x160] sm:$0xf]  ;;  %v6674_v19 = vld [vmem:[#allocation4 + $0x174] sm:$0xf0]  ;;  %v7360_v15 = vor.u32 %v6631_v0, %v5089_v60  ;;  %v7363_v22 = vor.u32 %v6658_v1, %v5211_v5  ;;  %v6652_v30 = vld [vmem:[#allocation4 + $0xcc] sm:$0xf]  ;;  %v97_v60 = vsub.f32 %v7274_v14, %v89_v40 }
  0x2c   :  { %574 = vmatpush.bf16.msra.mxu2 %v7316_v4  ;;  %610 = vmatpush.bf16.msrb.mxu1 %v7319_v10  ;;  %v7365_v28 = vor.u32 %v6674_v19, %v5265_v6  ;;  %v5187_v29 = vld [vmem:[#allocation4 + $0xe0] sm:$0xf0]  ;;  %v5241_v31 = vld [vmem:[#allocation4 + $0x130] sm:$0xf]  ;;  %v6668_v33 = vld [vmem:[#allocation4 + $0x144] sm:$0xf0] }
  0x2d   :  { %6988 = vmatpush.bf16.msra.mxu3 %v7347_v54  ;;  %v7372_v23 = vor.u32 %v6652_v30, %v5187_v29  ;;  %v7375_v48 = vor.u32 %v6668_v33, %v5241_v31  ;;  %v6646_v26 = vld [vmem:[#allocation4 + $0x9c] sm:$0xf]  ;;  %v5163_v52 = vld [vmem:[#allocation4 + $0xb0] sm:$0xf0]  ;;  %v5217_v0 = vld [vmem:[#allocation4 + $0x100] sm:$0xf]  ;;  %v7388_v9 = vpack.c.bf16 %v97_v60, %v95_v53 }
  0x2e   :  { %5320 = vmatmul.msk.bf16.gmra.mxu1 %vm523_vm0, %v7323_v32  ;;  %5322 = vmatmul.msk.bf16.gmra.mxu3 %vm523_vm0, %v7323_v32  ;;  %v6662_v18 = vld [vmem:[#allocation4 + $0x114] sm:$0xf0]  ;;  %v7380_v27 = vor.u32 %v6646_v26, %v5163_v52  ;;  %v6640_v5 = vld [vmem:[#allocation4 + $0x6c] sm:$0xf]  ;;  %v5139_v6 = vld [vmem:[#allocation4 + $0x80] sm:$0xf0] }
  0x2f   :  { %537 = vmatpush.bf16.msra.mxu0 %v7330_v36  ;;  %9438 = vst [vmem:[#allocation21_spill] sm:$0xff] %v7372_v23  ;;  %v7383_v1 = vor.u32 %v6662_v18, %v5217_v0  ;;  %v5193_v19 = vld [vmem:[#allocation4 + $0xd0] sm:$0xf]  ;;  %v6656_v14 = vld [vmem:[#allocation4 + $0xe4] sm:$0xf0]  ;;  %v7393_v33 = vor.u32 %v6640_v5, %v5139_v6 }
  0x30   :  { %575 = vmatpush.bf16.msra.mxu2 %v7332_v38  ;;  %611 = vmatpush.bf16.msrb.mxu1 %v7335_v39  ;;  %9439 = vst [vmem:[#allocation22_spill] sm:$0xff] %v7375_v48  ;;  %v5313_v30 = vld [vmem:[#allocation4 + $0x1c0] sm:$0xf]  ;;  %v6686_v29 = vld [vmem:[#allocation4 + $0x1d4] sm:$0xf0]  ;;  %v7396_v40 = vor.u32 %v6656_v14, %v5193_v19 }
  0x31   :  { %9440 = vst [vmem:[#allocation23_spill] sm:$0xff] %v7380_v27  ;;  %v7390_v31 = vor.u32 %v6686_v29, %v5313_v30  ;;  %v6634_v34 = vld [vmem:[#allocation4 + $0x3c] sm:$0xf]  ;;  %v5115_v26 = vld [vmem:[#allocation4 + $0x50] sm:$0xf0] }
  0x32   :  { %538 = vmatmul.bf16.vlgmr.msra.gmra.mxu0 %v7343_v51  ;;  %9441 = vst [vmem:[#allocation24_spill] sm:$0xff] %v7383_v1  ;;  %v5169_v52 = vld [vmem:[#allocation4 + $0xa0] sm:$0xf]  ;;  %v6650_v0 = vld [vmem:[#allocation4 + $0xb4] sm:$0xf0]  ;;  %v7404_v6 = vor.u32 %v6634_v34, %v5115_v26 }
  0x33   :  { %644 = vmatpush.bf16.msrb.mxu0 %v7337_v43  ;;  %576 = vmatmul.bf16.vlgmr.msra.gmra.mxu2 %v7343_v51  ;;  %9442 = vst [vmem:[#allocation25_spill] sm:$0xff] %v7388_v9  ;;  %v5289_v53 = vld [vmem:[#allocation4 + $0x190] sm:$0xf]  ;;  %v6680_v60 = vld [vmem:[#allocation4 + $0x1a4] sm:$0xf0] }
  0x34   :  { %669 = vmatpush.bf16.msrb.mxu2 %v7321_v24  ;;  %612 = vmatpush.bf16.msrb.mxu1 %v7350_v57  ;;  %9443 = vst [vmem:[#allocation26_spill] sm:$0xff] %v7393_v33  ;;  %v6683_v18 = vld [vmem:[#allocation4 + $0x1c4] sm:$0xf]  ;;  %v7401_v30 = vor.u32 %v6680_v60, %v5289_v53  ;;  %v5315_v5 = vld [vmem:[#allocation4 + $0x1d8] sm:$0xf0] }
  0x35   :  { %9444 = vst [vmem:[#allocation27_spill] sm:$0xff] %v7396_v40  ;;  %v6628_v19 = vld [vmem:[#allocation4 + $0xc] sm:$0xf]  ;;  %v7406_v14 = vor.u32 %v6683_v18, %v5315_v5  ;;  %v6677_v29 = vld [vmem:[#allocation4 + $0x194] sm:$0xf] }
  0x36   :  { %v6644_v53 = vld [vmem:[#allocation4 + $0x84] sm:$0xf0]  ;;  %v6671_v60 = vld [vmem:[#allocation4 + $0x164] sm:$0xf]  ;;  %v5267_v47 = vld [vmem:[#allocation4 + $0x178] sm:$0xf0] }
  0x37   :  { %645 = vmatpush.bf16.msrb.mxu0 %v7353_v63  ;;  %v7421_v18 = vor.u32 %v6671_v60, %v5267_v47  ;;  %v6638_v5 = vld [vmem:[#allocation4 + $0x54] sm:$0xf0]  ;;  %v6632_v47 = vld [vmem:[#allocation4 + $0x24] sm:$0xf0] }
  0x38   :  { %670 = vmatpush.bf16.msrb.mxu2 %v7347_v54  ;;  %613 = vmatpush.bf16.msrb.mxu1 %v7360_v15 }
  0x3b   :  { %646 = vmatpush.bf16.msrb.mxu0 %v7363_v22 }
  0x3c   :  { %682 = vmatpush.bf16.msra.mxu1 %v7365_v28  ;;  %745 = vmatpush.bf16.msra.mxu2 %v7406_v14 }
  0x3e   :  { %614 = vmatmul.bf16.vlgmr.msrb.gmra.mxu1 %v7343_v51  ;;  %5323 = vmatmul.msk.bf16.vlgmr.msrb.gmra.mxu3 %vm523_vm0, %v7249_v61 }
  0x3f   :  { %647 = vmatpush.bf16.msrb.mxu0 %v7372_v23  ;;  %707 = vmatpush.bf16.msrb.mxu3 %v7390_v31  ;;  %v5291_v23 = vld [vmem:[#allocation4 + $0x1a8] sm:$0xf0] }
  0x40   :  { %683 = vmatpush.bf16.msra.mxu1 %v7375_v48  ;;  %v5145_v48 = vld [vmem:[#allocation4 + $0x70] sm:$0xf]  ;;  %v7413_v34 = vor.u32 %v6677_v29, %v5291_v23  ;;  %v5219_v29 = vld [vmem:[#allocation4 + $0x118] sm:$0xf0] }
  0x42   :  { %543 = vmatmul.bf16.gmra.mxu0 %v7388_v9  ;;  %746 = vmatpush.bf16.msra.mxu2 %v7413_v34 }
  0x43   :  { %648 = vmatpush.bf16.msrb.mxu0 %v7380_v27  ;;  %581 = vmatmul.bf16.gmra.mxu2 %v7388_v9  ;;  %v5091_v27 = vld [vmem:[#allocation4 + $0x20] sm:$0xf0] }
  0x44   :  { %684 = vmatpush.bf16.msra.mxu1 %v7383_v1  ;;  %v7409_v1 = vor.u32 %v6650_v0, %v5169_v52  ;;  %708 = vmatpush.bf16.msrb.mxu3 %v7401_v30  ;;  %v7416_v26 = vor.u32 %v6628_v19, %v5091_v27  ;;  %v7419_v52 = vor.u32 %v6644_v53, %v5145_v48  ;;  %v5121_v0 = vld [vmem:[#allocation4 + $0x40] sm:$0xf]  ;;  %v5097_v27 = vld [vmem:[#allocation4 + $0x10] sm:$0xf]  ;;  %v6659_v48 = vld [vmem:[#allocation4 + $0x104] sm:$0xf] }
  0x45   :  { %v7426_v23 = vor.u32 %v6638_v5, %v5121_v0  ;;  %v7435_v53 = vor.u32 %v6632_v47, %v5097_v27  ;;  %v7438_v60 = vor.u32 %v6659_v48, %v5219_v29  ;;  %v6647_v5 = vld [vmem:[#allocation4 + $0xa4] sm:$0xf]  ;;  %v5171_v27 = vld [vmem:[#allocation4 + $0xb8] sm:$0xf0]  ;;  %v6641_v48 = vld [vmem:[#allocation4 + $0x74] sm:$0xf] }
  0x46   :  { %v7451_v47 = vor.u32 %v6647_v5, %v5171_v27  ;;  %v6729_v5 = vld [vmem:[#allocation7 + $0x154] sm:$0xf]  ;;  %v5515_v27 = vld [vmem:[#allocation7 + $0x168] sm:$0xf0] }
  0x47   :  { %649 = vmatpush.bf16.msrb.mxu0 %v7393_v33  ;;  %v5243_v33 = vld [vmem:[#allocation4 + $0x148] sm:$0xf0] }
  0x48   :  { %685 = vmatpush.bf16.msra.mxu1 %v7396_v40  ;;  %v6665_v40 = vld [vmem:[#allocation4 + $0x134] sm:$0xf] }
  0x49   :  { %v7429_v19 = vor.u32 %v6665_v40, %v5243_v33  ;;  %v6653_v33 = vld [vmem:[#allocation4 + $0xd4] sm:$0xf]  ;;  %v5195_v40 = vld [vmem:[#allocation4 + $0xe8] sm:$0xf0] }
  0x4a   :  { %v7446_v0 = vor.u32 %v6653_v33, %v5195_v40  ;;  %v5123_v33 = vld [vmem:[#allocation4 + $0x58] sm:$0xf0]  ;;  %v5099_v40 = vld [vmem:[#allocation4 + $0x28] sm:$0xf0] }
  0x4b   :  { %650 = vmatpush.bf16.msrb.mxu0 %v7404_v6 }
  0x4c   :  { %686 = vmatpush.bf16.msra.mxu1 %v7409_v1 }
  0x4e   :  { %619 = vmatmul.bf16.gmra.mxu1 %v7388_v9  ;;  %5324 = vmatmul.msk.bf16.gmra.mxu3 %vm523_vm0, %v7323_v32 }
  0x4f   :  { %651 = vmatpush.bf16.msrb.mxu0 %v7416_v26 }
  0x50   :  { %687 = vmatpush.bf16.msra.mxu1 %v7419_v52 }
  0x52   :  { %652 = vmatmul.bf16.vlgmr.msrb.gmra.mxu0 %v7343_v51 }
  0x53   :  { %720 = vmatpush.bf16.msra.mxu0 %v7421_v18  ;;  %5325 = vmatmul.msk.bf16.vlgmr.msrb.gmra.mxu2 %vm523_vm0, %v7249_v61 }
  0x54   :  { %688 = vmatpush.bf16.msra.mxu1 %v7426_v23  ;;  %845 = vmatpush.bf16.msrb.mxu2 %v7184_v12  ;;  %v5147_v12 = vld [vmem:[#allocation4 + $0x88] sm:$0xf0] }
  0x55   :  { %v7455_v29 = vor.u32 %v6641_v48, %v5147_v12  ;;  %v5537_v12 = vld [vmem:[#allocation7 + $0x180] sm:$0xf] }
  0x57   :  { %721 = vmatpush.bf16.msra.mxu0 %v7429_v19 }
  0x58   :  { %689 = vmatpush.bf16.msra.mxu1 %v7435_v53  ;;  %846 = vmatpush.bf16.msrb.mxu2 %v7203_v25  ;;  %v6629_v25 = vld [vmem:[#allocation4 + $0x14] sm:$0xf] }
  0x5b   :  { %722 = vmatpush.bf16.msra.mxu0 %v7438_v60 }
  0x5c   :  { %782 = vmatpush.bf16.msrb.mxu1 %v7177_v3  ;;  %v6635_v3 = vld [vmem:[#allocation4 + $0x44] sm:$0xf] }
  0x5e   :  { %5326 = vmatmul.msk.bf16.vlgmr.msra.gmra.mxu3 %vm523_vm0, %v7323_v32  ;;  %690 = vmatmul.bf16.vlgmr.msra.gmra.mxu1 %v7343_v51 }
  0x5f   :  { %723 = vmatpush.bf16.msra.mxu0 %v7446_v0  ;;  %807 = vmatpush.bf16.msra.mxu3 %v7179_v7  ;;  %v7472_v7 = vor.u32 %v6629_v25, %v5099_v40  ;;  %v5369_v25 = vld [vmem:[#allocation7 + $0x30] sm:$0xf]  ;;  %v5518_v40 = vor.u32 %v6729_v5, %v5515_v27 }
  0x60   :  { %783 = vmatpush.bf16.msrb.mxu1 %v7188_v16  ;;  %v7463_v16 = vor.u32 %v6635_v3, %v5123_v33  ;;  %v6738_v3 = vld [vmem:[#allocation7 + $0x194] sm:$0xf0]  ;;  %v6745_v5 = vld [vmem:[#allocation7 + $0x1cc] sm:$0xf0] }
  0x62   :  { %657 = vmatmul.bf16.gmra.mxu0 %v7388_v9 }
  0x63   :  { %724 = vmatpush.bf16.msra.mxu0 %v7451_v47  ;;  %5329 = vmatmul.msk.bf16.vlgmr.msra.gmra.mxu2 %vm523_vm0, %v7249_v61 }
  0x64   :  { %784 = vmatpush.bf16.msrb.mxu1 %v7231_v44  ;;  %808 = vmatpush.bf16.msra.mxu3 %v7190_v17  ;;  %v9446_v17 = vld [vmem:[#allocation21_spill] sm:$0xff]  ;;  %v9449_v44 = vld [vmem:[#allocation24_spill] sm:$0xff] }
  0x65   :  { %921 = vmatpush.bf16.msra.mxu2 %v7321_v24 }
  0x67   :  { %725 = vmatpush.bf16.msra.mxu0 %v7455_v29 }
  0x68   :  { %785 = vmatpush.bf16.msrb.mxu1 %v7245_v58  ;;  %v9451_v58 = vld [vmem:[#allocation27_spill] sm:$0xff] }
  0x69   :  { %922 = vmatpush.bf16.msra.mxu2 %v7347_v54 }
  0x6b   :  { %726 = vmatpush.bf16.msra.mxu0 %v7463_v16 }
  0x6c   :  { %786 = vmatpush.bf16.msrb.mxu1 %v7267_v11  ;;  %v5513_v11 = vld [vmem:[#allocation7 + $0x150] sm:$0xf] }
  0x6e   :  { %695 = vmatmul.bf16.gmra.mxu1 %v7388_v9  ;;  %5327 = vmatmul.msk.bf16.vlgmr.msrb.gmra.mxu3 %vm523_vm0, %v7249_v61 }
  0x6f   :  { %727 = vmatpush.bf16.msra.mxu0 %v7472_v7  ;;  %883 = vmatpush.bf16.msrb.mxu3 %v7225_v37  ;;  %v9448_v37 = vld [vmem:[#allocation23_spill] sm:$0xff] }
  0x70   :  { %787 = vmatpush.bf16.msrb.mxu1 %v7298_v41 }
  0x72   :  { %728 = vmatmul.bf16.vlgmr.msra.gmra.mxu0 %v7343_v51 }
  0x73   :  { %820 = vmatpush.bf16.msrb.mxu0 %v7181_v8  ;;  %5330 = vmatmul.msk.bf16.gmra.mxu2 %vm523_vm0, %v7323_v32  ;;  %v9445_v8 = vld [vmem:[#allocation18_spill] sm:$0xff] }
  0x74   :  { %788 = vmatpush.bf16.msrb.mxu1 %v7314_v2  ;;  %884 = vmatpush.bf16.msrb.mxu3 %v7290_v35  ;;  %v5561_v2 = vld [vmem:[#allocation7 + $0x1b0] sm:$0xf] }
  0x77   :  { %821 = vmatpush.bf16.msrb.mxu0 %v7193_v21  ;;  %v9447_v21 = vld [vmem:[#allocation22_spill] sm:$0xff] }
  0x78   :  { %789 = vmatpush.bf16.msrb.mxu1 %v7330_v36 }
  0x7b   :  { %822 = vmatpush.bf16.msrb.mxu0 %v7234_v49 }
  0x7c   :  { %858 = vmatpush.bf16.msra.mxu1 %v7236_v50  ;;  %v9450_v50 = vld [vmem:[#allocation26_spill] sm:$0xff] }
  0x7e   :  { %5328 = vmatmul.msk.bf16.gmra.mxu3 %vm523_vm0, %v7323_v32  ;;  %790 = vmatmul.bf16.vlgmr.msrb.gmra.mxu1 %v7238_v55 }
  0x7f   :  { %823 = vmatpush.bf16.msrb.mxu0 %v7247_v59 }
  0x80   :  { %859 = vmatpush.bf16.msra.mxu1 %v7251_v62 }
  0x82   :  { %733 = vmatmul.bf16.gmra.mxu0 %v7388_v9 }
  0x83   :  { %824 = vmatpush.bf16.msrb.mxu0 %v7269_v13  ;;  %5333 = vmatmul.msk.bf16.vlgmr.msrb.gmra.mxu2 %vm523_vm0, %v7240_v56  ;;  %v6732_v13 = vld [vmem:[#allocation7 + $0x164] sm:$0xf0] }
  0x84   :  { %860 = vmatpush.bf16.msra.mxu1 %v7283_v20  ;;  %997 = vmatpush.bf16.msrb.mxu2 %v7406_v14  ;;  %v5514_v41 = vor.u32 %v6732_v13, %v5513_v11  ;;  %v6735_v13 = vld [vmem:[#allocation7 + $0x184] sm:$0xf] }
  0x87   :  { %825 = vmatpush.bf16.msrb.mxu0 %v7300_v42  ;;  %v5489_v42 = vld [vmem:[#allocation7 + $0x120] sm:$0xf] }
  0x88   :  { %861 = vmatpush.bf16.msra.mxu1 %v7303_v45  ;;  %998 = vmatpush.bf16.msrb.mxu2 %v7413_v34  ;;  %v6726_v45 = vld [vmem:[#allocation7 + $0x134] sm:$0xf0] }
  0x89   :  { %v5490_v24 = vor.u32 %v6726_v45, %v5489_v42  ;;  %v5467_v42 = vld [vmem:[#allocation7 + $0x108] sm:$0xf0] }
  0x8b   :  { %826 = vmatpush.bf16.msrb.mxu0 %v7316_v4  ;;  %v6744_v4 = vld [vmem:[#allocation7 + $0x1c4] sm:$0xf0] }
  0x8c   :  { %862 = vmatpush.bf16.msra.mxu1 %v7319_v10  ;;  %v5562_v36 = vor.u32 %v6744_v4, %v5561_v2  ;;  %v5521_v2 = vld [vmem:[#allocation7 + $0x158] sm:$0xf]  ;;  %v6733_v4 = vld [vmem:[#allocation7 + $0x16c] sm:$0xf0] }
  0x8e   :  { %795 = vmatmul.bf16.gmra.mxu1 %v7305_v46  ;;  %5331 = vmatmul.msk.bf16.vlgmr.msra.gmra.mxu3 %vm523_vm0, %v7240_v56 }
  0x8f   :  { %827 = vmatpush.bf16.msrb.mxu0 %v7332_v38  ;;  %959 = vmatpush.bf16.msra.mxu3 %v7390_v31 }
  0x90   :  { %863 = vmatpush.bf16.msra.mxu1 %v7335_v39  ;;  %v5465_v39 = vld [vmem:[#allocation7 + $0xf0] sm:$0xf] }
  0x92   :  { %828 = vmatmul.bf16.vlgmr.msrb.gmra.mxu0 %v7238_v55 }
  0x93   :  { %896 = vmatpush.bf16.msra.mxu0 %v7337_v43  ;;  %5334 = vmatmul.msk.bf16.gmra.mxu2 %vm523_vm0, %v9445_v8  ;;  %v6720_v43 = vld [vmem:[#allocation7 + $0x104] sm:$0xf0] }
  0x94   :  { %864 = vmatpush.bf16.msra.mxu1 %v7350_v57  ;;  %960 = vmatpush.bf16.msra.mxu3 %v7401_v30 }
  0x97   :  { %897 = vmatpush.bf16.msra.mxu0 %v7353_v63  ;;  %v5466_v63 = vor.u32 %v6720_v43, %v5465_v39 }
  0x98   :  { %865 = vmatpush.bf16.msra.mxu1 %v7360_v15  ;;  %v6741_v15 = vld [vmem:[#allocation7 + $0x1b4] sm:$0xf] }
  0x9b   :  { %898 = vmatpush.bf16.msra.mxu0 %v7363_v22  ;;  %v558_v49 = vpop.f32.mrf.mxu1  ;;  %v5563_v22 = vld [vmem:[#allocation7 + $0x1c8] sm:$0xf0] }
  0x9c   :  { %934 = vmatpush.bf16.msrb.mxu1 %v7365_v28  ;;  %v5441_v28 = vld [vmem:[#allocation7 + $0xc0] sm:$0xf]  ;;  %v5566_v31 = vor.u32 %v6741_v15, %v5563_v22  ;;  %v6711_v15 = vld [vmem:[#allocation7 + $0xc4] sm:$0xf]  ;;  %v5443_v22 = vld [vmem:[#allocation7 + $0xd8] sm:$0xf0] }
  0x9e   :  { %5332 = vmatmul.msk.bf16.gmra.mxu3 %vm523_vm0, %v9445_v8  ;;  %866 = vmatmul.bf16.vlgmr.msra.gmra.mxu1 %v7238_v55 }
  0x9f   :  { %899 = vmatpush.bf16.msra.mxu0 %v9446_v17  ;;  %v5538_v17 = vor.u32 %v6738_v3, %v5537_v12 }
  0xa0   :  { %935 = vmatpush.bf16.msrb.mxu1 %v9447_v21 }
  0xa1   :  { %v596_v59 = vpop.f32.mrf.mxu3 }
  0xa2   :  { %833 = vmatmul.bf16.gmra.mxu0 %v7305_v46 }
  0xa3   :  { %900 = vmatpush.bf16.msra.mxu0 %v9448_v37  ;;  %5337 = vmatmul.msk.bf16.vlgmr.msra.gmra.mxu2 %vm523_vm0, %v7240_v56  ;;  %v560_v62 = vpop.f32.mrf.mxu1  ;;  %v6696_v37 = vld [vmem:[#allocation7 + $0x44] sm:$0xf0] }
  0xa4   :  { %936 = vmatpush.bf16.msrb.mxu1 %v9449_v44  ;;  %1373 = vmatpush.bf16.msra.mxu2 %v5566_v31  ;;  %v6723_v44 = vld [vmem:[#allocation7 + $0x124] sm:$0xf]  ;;  %v6727_v31 = vld [vmem:[#allocation7 + $0x13c] sm:$0xf0] }
  0xa7   :  { %901 = vmatpush.bf16.msra.mxu0 %v9450_v50 }
  0xa8   :  { %937 = vmatpush.bf16.msrb.mxu1 %v9451_v58 }
  0xa9   :  { %v598_v20 = vpop.f32.mrf.mxu3 }
  0xab   :  { %902 = vmatpush.bf16.msra.mxu0 %v7404_v6  ;;  %v563_v35 = vpop.f32.mrf.mxu1 }
  0xac   :  { %938 = vmatpush.bf16.msrb.mxu1 %v7409_v1  ;;  %v6714_v1 = vld [vmem:[#allocation7 + $0xd4] sm:$0xf0] }
  0xad   :  { %v5442_v34 = vor.u32 %v6714_v1, %v5441_v28  ;;  %v5497_v1 = vld [vmem:[#allocation7 + $0x128] sm:$0xf] }
  0xae   :  { %871 = vmatmul.bf16.gmra.mxu1 %v7305_v46  ;;  %5335 = vmatmul.msk.bf16.vlgmr.msrb.gmra.mxu3 %vm523_vm0, %v7240_v56 }
  0xaf   :  { %903 = vmatpush.bf16.msra.mxu0 %v7416_v26  ;;  %v539_v10 = vpop.f32.mrf.mxu0  ;;  %1335 = vmatpush.bf16.msrb.mxu3 %v5562_v36 }
  0xb0   :  { %939 = vmatpush.bf16.msrb.mxu1 %v7419_v52  ;;  %v7548_v38 = vadd.f32 %v558_v49, %v539_v10  ;;  %v5417_v52 = vld [vmem:[#allocation7 + $0x90] sm:$0xf] }
  0xb1   :  { %v7550_v54 = vpop.f32.mrf.mxu3 }
  0xb2   :  { %904 = vmatmul.bf16.vlgmr.msra.gmra.mxu0 %v7238_v55 }
  0xb3   :  { %972 = vmatpush.bf16.msrb.mxu0 %v7421_v18  ;;  %5338 = vmatmul.msk.bf16.gmra.mxu2 %vm523_vm0, %v9445_v8  ;;  %v7556_v57 = vpop.f32.mrf.mxu1  ;;  %v6708_v18 = vld [vmem:[#allocation7 + $0xa4] sm:$0xf0] }
  0xb4   :  { %940 = vmatpush.bf16.msrb.mxu1 %v7426_v23  ;;  %1336 = vmatpush.bf16.msrb.mxu3 %v5538_v17  ;;  %v6715_v17 = vld [vmem:[#allocation7 + $0xdc] sm:$0xf0] }
  0xb6   :  { %v577_v30 = vpop.f32.mrf.mxu2 }
  0xb7   :  { %973 = vmatpush.bf16.msrb.mxu0 %v7429_v19  ;;  %v7559_v6 = vadd.f32 %v596_v59, %v577_v30  ;;  %v541_v14 = vpop.f32.mrf.mxu0  ;;  %v5370_v59 = vor.u32 %v6696_v37, %v5369_v25 }
  0xb8   :  { %941 = vmatpush.bf16.msrb.mxu1 %v7435_v53  ;;  %v7561_v26 = vadd.f32 %v560_v62, %v541_v14  ;;  %v5418_v53 = vor.u32 %v6708_v18, %v5417_v52  ;;  %v5345_v62 = vld [vmem:[#allocation7] sm:$0xf]  ;;  %v6705_v52 = vld [vmem:[#allocation7 + $0x94] sm:$0xf]  ;;  %v5419_v18 = vld [vmem:[#allocation7 + $0xa8] sm:$0xf0] }
  0xb9   :  { %v7563_v23 = vpop.f32.mrf.mxu3 }
  0xbb   :  { %974 = vmatpush.bf16.msrb.mxu0 %v7438_v60  ;;  %v615_v19 = vpop.f32.mrf.mxu1  ;;  %v5393_v60 = vld [vmem:[#allocation7 + $0x60] sm:$0xf] }
  0xbc   :  { %1310 = vmatpush.bf16.msra.mxu1 %v5514_v41  ;;  %v6717_v41 = vld [vmem:[#allocation7 + $0xf4] sm:$0xf] }
  0xbd   :  { %v5470_v39 = vor.u32 %v6717_v41, %v5467_v42 }
  0xbe   :  { %5336 = vmatmul.msk.bf16.gmra.mxu3 %vm523_vm0, %v9445_v8  ;;  %942 = vmatmul.bf16.vlgmr.msrb.gmra.mxu1 %v7238_v55 }
  0xbf   :  { %975 = vmatpush.bf16.msrb.mxu0 %v7446_v0  ;;  %v6702_v0 = vld [vmem:[#allocation7 + $0x74] sm:$0xf0] }
  0xc0   :  { %1311 = vmatpush.bf16.msra.mxu1 %v5490_v24  ;;  %v5394_v33 = vor.u32 %v6702_v0, %v5393_v60  ;;  %v5569_v0 = vld [vmem:[#allocation7 + $0x1b8] sm:$0xf] }
  0xc1   :  { %v634_v49 = vpop.f32.mrf.mxu3  ;;  %v5570_v12 = vor.u32 %v6745_v5, %v5569_v0  ;;  %v6739_v0 = vld [vmem:[#allocation7 + $0x19c] sm:$0xf0] }
  0xc2   :  { %v7575_v50 = vadd.f32 %v634_v49, %v615_v19  ;;  %909 = vmatmul.bf16.gmra.mxu0 %v7305_v46  ;;  %v5571_v49 = vld [vmem:[#allocation7 + $0x1d0] sm:$0xf0] }
  0xc3   :  { %976 = vmatpush.bf16.msrb.mxu0 %v7451_v47  ;;  %v579_v47 = vpop.f32.mrf.mxu2  ;;  %5341 = vmatmul.msk.bf16.vlgmr.msrb.gmra.mxu2 %vm523_vm0, %v7240_v56  ;;  %v617_v58 = vpop.f32.mrf.mxu1 }
  0xc4   :  { %1312 = vmatpush.bf16.msra.mxu1 %v5466_v63  ;;  %v7570_v48 = vadd.f32 %v598_v20, %v579_v47  ;;  %v5539_v20 = vld [vmem:[#allocation7 + $0x198] sm:$0xf0]  ;;  %v5522_v63 = vor.u32 %v6733_v4, %v5521_v2  ;;  %v5422_v47 = vor.u32 %v6705_v52, %v5419_v18  ;;  %v6687_v2 = vld [vmem:[#allocation7 + $0x4] sm:$0xf]  ;;  %v6697_v52 = vld [vmem:[#allocation7 + $0x4c] sm:$0xf0] }
  0xc5   :  { %v5347_v4 = vld [vmem:[#allocation7 + $0x18] sm:$0xf0]  ;;  %v6724_v18 = vld [vmem:[#allocation7 + $0x12c] sm:$0xf] }
  0xc7   :  { %977 = vmatpush.bf16.msrb.mxu0 %v7455_v29  ;;  %v544_v29 = vpop.f32.mrf.mxu0 }
  0xc8   :  { %1313 = vmatpush.bf16.msra.mxu1 %v5442_v34  ;;  %v7572_v21 = vadd.f32 %v563_v35, %v544_v29  ;;  %v6690_v35 = vld [vmem:[#allocation7 + $0x14] sm:$0xf0]  ;;  %v5498_v34 = vor.u32 %v6727_v31, %v5497_v1  ;;  %v6699_v29 = vld [vmem:[#allocation7 + $0x64] sm:$0xf]  ;;  %v5350_v1 = vor.u32 %v6687_v2, %v5347_v4 }
  0xc9   :  { %v5346_v36 = vor.u32 %v6690_v35, %v5345_v62  ;;  %v636_v28 = vpop.f32.mrf.mxu3  ;;  %v5371_v62 = vld [vmem:[#allocation7 + $0x48] sm:$0xf0]  ;;  %v6709_v35 = vld [vmem:[#allocation7 + $0xac] sm:$0xf0] }
  0xca   :  { %v7586_v30 = vadd.f32 %v636_v28, %v617_v58 }
  0xcb   :  { %978 = vmatpush.bf16.msrb.mxu0 %v7463_v16  ;;  %v5491_v16 = vld [vmem:[#allocation7 + $0x138] sm:$0xf0]  ;;  %v582_v45 = vpop.f32.mrf.mxu2  ;;  %v620_v14 = vpop.f32.mrf.mxu1 }
  0xcc   :  { %1314 = vmatpush.bf16.msra.mxu1 %v5418_v53  ;;  %v5494_v11 = vor.u32 %v6723_v44, %v5491_v16  ;;  %v7581_v10 = vadd.f32 %v7550_v54, %v582_v45  ;;  %v5446_v54 = vor.u32 %v6711_v15, %v5443_v22  ;;  %v5473_v53 = vld [vmem:[#allocation7 + $0xf8] sm:$0xf]  ;;  %v6742_v16 = vld [vmem:[#allocation7 + $0x1bc] sm:$0xf]  ;;  %v5523_v15 = vld [vmem:[#allocation7 + $0x170] sm:$0xf0] }
  0xce   :  { %947 = vmatmul.bf16.gmra.mxu1 %v7305_v46  ;;  %5339 = vmatmul.msk.bf16.vlgmr.msra.gmra.mxu3 %vm523_vm0, %v7240_v56 }
  0xcf   :  { %979 = vmatpush.bf16.msrb.mxu0 %v7472_v7  ;;  %v5542_v7 = vor.u32 %v6735_v13, %v5539_v20  ;;  %v546_v24 = vpop.f32.mrf.mxu0  ;;  %1411 = vmatpush.bf16.msra.mxu3 %v5570_v12  ;;  %v5425_v20 = vld [vmem:[#allocation7 + $0x98] sm:$0xf]  ;;  %v5353_v12 = vld [vmem:[#allocation7 + $0x8] sm:$0xf] }
  0xd0   :  { %1315 = vmatpush.bf16.msra.mxu1 %v5394_v33  ;;  %v7584_v43 = vadd.f32 %v7556_v57, %v546_v24  ;;  %v6721_v57 = vld [vmem:[#allocation7 + $0x10c] sm:$0xf0]  ;;  %v5395_v33 = vld [vmem:[#allocation7 + $0x78] sm:$0xf0]  ;;  %v5426_v45 = vor.u32 %v6709_v35, %v5425_v20  ;;  %v5401_v24 = vld [vmem:[#allocation7 + $0x68] sm:$0xf] }
  0xd1   :  { %1374 = vmatpush.bf16.msra.mxu2 %v5542_v7  ;;  %v5474_v3 = vor.u32 %v6721_v57, %v5473_v53  ;;  %v639_v25 = vpop.f32.mrf.mxu3  ;;  %v5398_v44 = vor.u32 %v6699_v29, %v5395_v33  ;;  %v5545_v57 = vld [vmem:[#allocation7 + $0x188] sm:$0xf]  ;;  %v6691_v33 = vld [vmem:[#allocation7 + $0x1c] sm:$0xf0]  ;;  %v6712_v20 = vld [vmem:[#allocation7 + $0xcc] sm:$0xf] }
  0xd2   :  { %v7594_v37 = vadd.f32 %v639_v25, %v620_v14  ;;  %980 = vmatmul.bf16.vlgmr.msrb.gmra.mxu0 %v7238_v55  ;;  %v5377_v14 = vld [vmem:[#allocation7 + $0x38] sm:$0xf]  ;;  %v6718_v25 = vld [vmem:[#allocation7 + $0xfc] sm:$0xf]  ;;  %v5451_v35 = vld [vmem:[#allocation7 + $0xe0] sm:$0xf0] }
  0xd3   :  { %1348 = vmatpush.bf16.msra.mxu0 %v5518_v40  ;;  %v584_v19 = vpop.f32.mrf.mxu2  ;;  %v5449_v40 = vld [vmem:[#allocation7 + $0xc8] sm:$0xf]  ;;  %5342 = vmatmul.msk.bf16.gmra.mxu2 %vm523_vm0, %v9445_v8  ;;  %v5454_v4 = vor.u32 %v6712_v20, %v5451_v35 }
  0xd4   :  { %1316 = vmatpush.bf16.msra.mxu1 %v5370_v59  ;;  %v7592_v60 = vadd.f32 %v7563_v23, %v584_v19  ;;  %v622_v23 = vpop.f32.mrf.mxu1  ;;  %v5450_v58 = vor.u32 %v6715_v17, %v5449_v40  ;;  %v6693_v59 = vld [vmem:[#allocation7 + $0x34] sm:$0xf]  ;;  %v5499_v19 = vld [vmem:[#allocation7 + $0x140] sm:$0xf0] }
  0xd5   :  { %v5374_v7 = vor.u32 %v6693_v59, %v5371_v62  ;;  %v5475_v40 = vld [vmem:[#allocation7 + $0x110] sm:$0xf0]  ;;  %v6736_v59 = vld [vmem:[#allocation7 + $0x18c] sm:$0xf]  ;;  %v5547_v62 = vld [vmem:[#allocation7 + $0x1a0] sm:$0xf0] }
  0xd7   :  { %1349 = vmatpush.bf16.msra.mxu0 %v5494_v11  ;;  %v653_v27 = vpop.f32.mrf.mxu0  ;;  %v5574_v11 = vor.u32 %v6742_v16, %v5571_v49  ;;  %v5354_v49 = vor.u32 %v6691_v33, %v5353_v12 }
  0xd8   :  { %1317 = vmatpush.bf16.msra.mxu1 %v5346_v36 }
  0xd9   :  { %1449 = vmatpush.bf16.msrb.mxu2 %v5574_v11  ;;  %v641_v36 = vpop.f32.mrf.mxu3 }
  0xda   :  { %v7601_v22 = vadd.f32 %v641_v36, %v622_v23  ;;  %v5529_v23 = vld [vmem:[#allocation7 + $0x160] sm:$0xf] }
  0xdb   :  { %1350 = vmatpush.bf16.msra.mxu0 %v5470_v39  ;;  %v672_v13 = vpop.f32.mrf.mxu2  ;;  %v6703_v39 = vld [vmem:[#allocation7 + $0x7c] sm:$0xf0] }
  0xdc   :  { %1386 = vmatpush.bf16.msrb.mxu1 %v5522_v63  ;;  %v7599_v41 = vadd.f32 %v672_v13, %v653_v27  ;;  %v6730_v63 = vld [vmem:[#allocation7 + $0x15c] sm:$0xf]  ;;  %v7603_v28 = vpop.f32.mrf.mxu1  ;;  %v5402_v31 = vor.u32 %v6703_v39, %v5401_v24  ;;  %v5546_v27 = vor.u32 %v6739_v0, %v5545_v57  ;;  %v5457_v57 = vld [vmem:[#allocation7 + $0xd0] sm:$0xf]  ;;  %v6716_v0 = vld [vmem:[#allocation7 + $0xe4] sm:$0xf0] }
  0xdd   :  { %v6706_v39 = vld [vmem:[#allocation7 + $0x9c] sm:$0xf] }
  0xde   :  { %5340 = vmatmul.msk.bf16.gmra.mxu3 %vm523_vm0, %v9445_v8  ;;  %1318 = vmatmul.bf16.vlgmr.msra.gmra.mxu1 %v7238_v55 }
  0xdf   :  { %1351 = vmatpush.bf16.msra.mxu0 %v5446_v54  ;;  %v655_v42 = vpop.f32.mrf.mxu0  ;;  %v5526_v54 = vor.u32 %v6730_v63, %v5523_v15  ;;  %1412 = vmatpush.bf16.msra.mxu3 %v5546_v27  ;;  %v5427_v63 = vld [vmem:[#allocation7 + $0xb0] sm:$0xf0]  ;;  %v6746_v27 = vld [vmem:[#allocation7 + $0x1d4] sm:$0xf0] }
  0xe0   :  { %1387 = vmatpush.bf16.msrb.mxu1 %v5498_v34 }
  0xe1   :  { %v677_v29 = vpop.f32.mrf.mxu3 }
  0xe2   :  { %985 = vmatmul.bf16.gmra.mxu0 %v7305_v46 }
  0xe3   :  { %1352 = vmatpush.bf16.msra.mxu0 %v5422_v47  ;;  %v674_v34 = vpop.f32.mrf.mxu2  ;;  %v5378_v47 = vor.u32 %v6697_v52, %v5377_v14  ;;  %5585 = vmatmul.msk.bf16.vlgmr.msra.gmra.mxu2 %vm523_vm0, %v7240_v56 }
  0xe4   :  { %1388 = vmatpush.bf16.msrb.mxu1 %v5474_v3  ;;  %v7608_v53 = vadd.f32 %v674_v34, %v655_v42  ;;  %v5502_v3 = vor.u32 %v6724_v18, %v5499_v19  ;;  %v7615_v16 = vpop.f32.mrf.mxu1  ;;  %v5550_v42 = vor.u32 %v6736_v59, %v5547_v62  ;;  %v6700_v18 = vld [vmem:[#allocation7 + $0x6c] sm:$0xf]  ;;  %v5403_v19 = vld [vmem:[#allocation7 + $0x80] sm:$0xf0] }
  0xe6   :  { %1450 = vmatpush.bf16.msrb.mxu2 %v5550_v42  ;;  %v6688_v42 = vld [vmem:[#allocation7 + $0xc] sm:$0xf] }
  0xe7   :  { %1353 = vmatpush.bf16.msra.mxu0 %v5398_v44  ;;  %v658_v5 = vpop.f32.mrf.mxu0  ;;  %v6734_v44 = vld [vmem:[#allocation7 + $0x174] sm:$0xf0] }
  0xe8   :  { %1389 = vmatpush.bf16.msrb.mxu1 %v5450_v58  ;;  %v7610_v17 = vadd.f32 %v677_v29, %v658_v5  ;;  %v5478_v58 = vor.u32 %v6718_v25, %v5475_v40  ;;  %v5530_v13 = vor.u32 %v6734_v44, %v5529_v23  ;;  %v5577_v5 = vld [vmem:[#allocation7 + $0x1c0] sm:$0xf]  ;;  %v5406_v29 = vor.u32 %v6700_v18, %v5403_v19  ;;  %v6694_v40 = vld [vmem:[#allocation7 + $0x3c] sm:$0xf]  ;;  %v5379_v23 = vld [vmem:[#allocation7 + $0x50] sm:$0xf0] }
  0xe9   :  { %v679_v24 = vpop.f32.mrf.mxu3  ;;  %v5578_v12 = vor.u32 %v6746_v27, %v5577_v5  ;;  %v5458_v25 = vor.u32 %v6716_v0, %v5457_v57  ;;  %v5382_v62 = vor.u32 %v6694_v40, %v5379_v23  ;;  %v6698_v19 = vld [vmem:[#allocation7 + $0x54] sm:$0xf0]  ;;  %v6725_v57 = vld [vmem:[#allocation7 + $0x134] sm:$0xf]  ;;  %v5507_v0 = vld [vmem:[#allocation7 + $0x148] sm:$0xf0] }
  0xea   :  { %v6740_v40 = vld [vmem:[#allocation7 + $0x1a4] sm:$0xf0]  ;;  %v5483_v23 = vld [vmem:[#allocation7 + $0x118] sm:$0xf0] }
  0xeb   :  { %1354 = vmatpush.bf16.msra.mxu0 %v5374_v7  ;;  %v748_v11 = vpop.f32.mrf.mxu2  ;;  %v5505_v7 = vld [vmem:[#allocation7 + $0x130] sm:$0xf] }
  0xec   :  { %1390 = vmatpush.bf16.msrb.mxu1 %v5426_v45  ;;  %v6728_v45 = vld [vmem:[#allocation7 + $0x144] sm:$0xf0]  ;;  %v7619_v14 = vpop.f32.mrf.mxu1 }
  0xed   :  { %v5506_v36 = vor.u32 %v6728_v45, %v5505_v7  ;;  %v5355_v7 = vld [vmem:[#allocation7 + $0x20] sm:$0xf0] }
  0xee   :  { %1323 = vmatmul.bf16.gmra.mxu1 %v7305_v46  ;;  %5583 = vmatmul.msk.bf16.vlgmr.msrb.gmra.mxu3 %vm523_vm0, %v7240_v56 }
  0xef   :  { %1355 = vmatpush.bf16.msra.mxu0 %v5350_v1  ;;  %v660_v2 = vpop.f32.mrf.mxu0  ;;  %v5481_v1 = vld [vmem:[#allocation7 + $0x100] sm:$0xf]  ;;  %1487 = vmatpush.bf16.msrb.mxu3 %v5578_v12  ;;  %v5361_v12 = vld [vmem:[#allocation7 + $0x10] sm:$0xf] }
  0xf0   :  { %1391 = vmatpush.bf16.msrb.mxu1 %v5402_v31  ;;  %v7617_v15 = vadd.f32 %v679_v24, %v660_v2  ;;  %v6722_v31 = vld [vmem:[#allocation7 + $0x114] sm:$0xf0]  ;;  %v6704_v2 = vld [vmem:[#allocation7 + $0x84] sm:$0xf0]  ;;  %v5531_v24 = vld [vmem:[#allocation7 + $0x178] sm:$0xf0] }
  0xf1   :  { %v5482_v52 = vor.u32 %v6722_v31, %v5481_v1  ;;  %v710_v33 = vpop.f32.mrf.mxu3 }
  0xf2   :  { %v7627_v44 = vadd.f32 %v710_v33, %v7603_v28  ;;  %1356 = vmatmul.bf16.vlgmr.msra.gmra.mxu0 %v7238_v55  ;;  %v5409_v28 = vld [vmem:[#allocation7 + $0x70] sm:$0xf]  ;;  %v5510_v33 = vor.u32 %v6725_v57, %v5507_v0  ;;  %v5435_v57 = vld [vmem:[#allocation7 + $0xb8] sm:$0xf0] }
  0xf3   :  { %1424 = vmatpush.bf16.msrb.mxu0 %v5526_v54  ;;  %v5430_v54 = vor.u32 %v6706_v39, %v5427_v63  ;;  %v750_v34 = vpop.f32.mrf.mxu2  ;;  %5586 = vmatmul.msk.bf16.gmra.mxu2 %vm523_vm0, %v9445_v8  ;;  %v5358_v63 = vor.u32 %v6688_v42, %v5355_v7  ;;  %v5410_v31 = vor.u32 %v6704_v2, %v5409_v28  ;;  %v5459_v2 = vld [vmem:[#allocation7 + $0xe8] sm:$0xf0] }
  0xf4   :  { %1392 = vmatpush.bf16.msrb.mxu1 %v5378_v47  ;;  %v7632_v59 = vpop.f32.mrf.mxu1 }
  0xf7   :  { %1425 = vmatpush.bf16.msrb.mxu0 %v5502_v3  ;;  %v729_v47 = vpop.f32.mrf.mxu0 }
  0xf8   :  { %1393 = vmatpush.bf16.msrb.mxu1 %v5354_v49  ;;  %v7624_v3 = vadd.f32 %v748_v11, %v729_v47  ;;  %v5433_v49 = vld [vmem:[#allocation7 + $0xa0] sm:$0xf]  ;;  %v6743_v11 = vld [vmem:[#allocation7 + $0x1c4] sm:$0xf] }
  0xf9   :  { %v712_v1 = vpop.f32.mrf.mxu3 }
  0xfa   :  { %v7637_v18 = vadd.f32 %v712_v1, %v7615_v16  ;;  %v5553_v16 = vld [vmem:[#allocation7 + $0x190] sm:$0xf]  ;;  %v5555_v1 = vld [vmem:[#allocation7 + $0x1a8] sm:$0xf0] }
  0xfb   :  { %1426 = vmatpush.bf16.msrb.mxu0 %v5478_v58  ;;  %v6710_v58 = vld [vmem:[#allocation7 + $0xb4] sm:$0xf0]  ;;  %v753_v20 = vpop.f32.mrf.mxu2 }
  0xfc   :  { %1462 = vmatpush.bf16.msra.mxu1 %v5530_v13  ;;  %v5579_v13 = vld [vmem:[#allocation7 + $0x1d8] sm:$0xf0]  ;;  %v5434_v35 = vor.u32 %v6710_v58, %v5433_v49  ;;  %v791_v5 = vpop.f32.mrf.mxu1  ;;  %v5765_v58 = vld [vmem:[#allocation4 + $0x330] sm:$0xf] }
  0xfd   :  { %v5582_v45 = vor.u32 %v6743_v11, %v5579_v13  ;;  %v7640_v27 = vadd.f32 %v791_v5, %v7548_v38  ;;  %v5554_v38 = vor.u32 %v6740_v40, %v5553_v16  ;;  %v5411_v16 = vld [vmem:[#allocation7 + $0x88] sm:$0xf0] }
  0xfe   :  { %5584 = vmatmul.msk.bf16.gmra.mxu3 %vm523_vm0, %v9445_v8  ;;  %1394 = vmatmul.bf16.vlgmr.msrb.gmra.mxu1 %v7238_v55 }
  0xff   :  { %1427 = vmatpush.bf16.msrb.mxu0 %v5454_v4  ;;  %v6731_v4 = vld [vmem:[#allocation7 + $0x164] sm:$0xf]  ;;  %1525 = vmatpush.bf16.msra.mxu2 %v5582_v45  ;;  %v6713_v45 = vld [vmem:[#allocation7 + $0xd4] sm:$0xf] }
 0x100   :  { %1463 = vmatpush.bf16.msra.mxu1 %v5506_v36  ;;  %v731_v36 = vpop.f32.mrf.mxu0  ;;  %1488 = vmatpush.bf16.msrb.mxu3 %v5554_v38  ;;  %v6774_v38 = vld [vmem:[#allocation4 + $0x2b4] sm:$0xf0] }
 0x101   :  { %v7634_v39 = vadd.f32 %v750_v34, %v731_v36  ;;  %v715_v13 = vpop.f32.mrf.mxu3 }
 0x102   :  { %v7648_v7 = vadd.f32 %v715_v13, %v7619_v14  ;;  %1361 = vmatmul.bf16.gmra.mxu0 %v7305_v46  ;;  %v6695_v13 = vld [vmem:[#allocation7 + $0x44] sm:$0xf] }
 0x103   :  { %1428 = vmatpush.bf16.msrb.mxu0 %v5430_v54  ;;  %v5385_v54 = vld [vmem:[#allocation7 + $0x40] sm:$0xf]  ;;  %v755_v34 = vpop.f32.mrf.mxu2  ;;  %5589 = vmatmul.msk.bf16.vlgmr.msrb.gmra.mxu2 %vm523_vm0, %v7240_v56 }
 0x104   :  { %1464 = vmatpush.bf16.msra.mxu1 %v5482_v52  ;;  %v5534_v52 = vor.u32 %v6731_v4, %v5531_v24  ;;  %v5386_v47 = vor.u32 %v6698_v19, %v5385_v54  ;;  %v793_v4 = vpop.f32.mrf.mxu1  ;;  %v6786_v24 = vld [vmem:[#allocation4 + $0x314] sm:$0xf0]  ;;  %v6707_v19 = vld [vmem:[#allocation7 + $0xa4] sm:$0xf] }
 0x105   :  { %v7656_v36 = vadd.f32 %v793_v4, %v7561_v26  ;;  %v6780_v26 = vld [vmem:[#allocation4 + $0x2e4] sm:$0xf0] }
 0x107   :  { %1429 = vmatpush.bf16.msrb.mxu0 %v5406_v29  ;;  %v6692_v29 = vld [vmem:[#allocation7 + $0x24] sm:$0xf0] }
 0x108   :  { %1465 = vmatpush.bf16.msra.mxu1 %v5458_v25  ;;  %v6719_v25 = vld [vmem:[#allocation7 + $0x104] sm:$0xf]  ;;  %v734_v49 = vpop.f32.mrf.mxu0 }
 0x109   :  { %v7645_v11 = vadd.f32 %v753_v20, %v734_v49  ;;  %v5486_v42 = vor.u32 %v6719_v25, %v5483_v23  ;;  %v5741_v20 = vld [vmem:[#allocation4 + $0x300] sm:$0xf]  ;;  %v6701_v25 = vld [vmem:[#allocation7 + $0x74] sm:$0xf] }
 0x10b   :  { %1430 = vmatpush.bf16.msrb.mxu0 %v5382_v62  ;;  %v6792_v62 = vld [vmem:[#allocation4 + $0x344] sm:$0xf0]  ;;  %v848_v14 = vpop.f32.mrf.mxu2 }
 0x10c   :  { %1466 = vmatpush.bf16.msra.mxu1 %v5434_v35  ;;  %v5362_v35 = vor.u32 %v6692_v29, %v5361_v12  ;;  %v7653_v28 = vor.u32 %v6792_v62, %v5765_v58  ;;  %v717_v12 = vpop.f32.mrf.mxu3  ;;  %v5438_v29 = vor.u32 %v6707_v19, %v5435_v57  ;;  %v796_v40 = vpop.f32.mrf.mxu1  ;;  %v5414_v62 = vor.u32 %v6701_v25, %v5411_v16  ;;  %v6689_v19 = vld [vmem:[#allocation7 + $0x14] sm:$0xf]  ;;  %v5363_v57 = vld [vmem:[#allocation7 + $0x28] sm:$0xf0] }
 0x10d   :  { %v7670_v49 = vadd.f32 %v796_v40, %v7572_v21  ;;  %v5366_v25 = vor.u32 %v6689_v19, %v5363_v57  ;;  %v6789_v40 = vld [vmem:[#allocation4 + $0x334] sm:$0xf]  ;;  %v5597_v19 = vld [vmem:[#allocation4 + $0x1e0] sm:$0xf] }
 0x10e   :  { %1399 = vmatmul.bf16.gmra.mxu1 %v7305_v46  ;;  %5587 = vmatmul.msk.bf16.vlgmr.msra.gmra.mxu3 %vm523_vm0, %v7240_v56 }
 0x10f   :  { %1431 = vmatpush.bf16.msrb.mxu0 %v5358_v63  ;;  %v6737_v63 = vld [vmem:[#allocation7 + $0x194] sm:$0xf] }
 0x110   :  { %1467 = vmatpush.bf16.msra.mxu1 %v5410_v31  ;;  %v5462_v31 = vor.u32 %v6713_v45, %v5459_v2  ;;  %v5558_v54 = vor.u32 %v6737_v63, %v5555_v1  ;;  %v736_v0 = vpop.f32.mrf.mxu0 }
 0x111   :  { %v7661_v5 = vadd.f32 %v755_v34, %v736_v0  ;;  %v5693_v34 = vld [vmem:[#allocation4 + $0x2a0] sm:$0xf] }
 0x112   :  { %1526 = vmatpush.bf16.msra.mxu2 %v5558_v54  ;;  %v7676_v2 = vor.u32 %v6774_v38, %v5693_v34  ;;  %1432 = vmatmul.bf16.vlgmr.msrb.gmra.mxu0 %v7238_v55  ;;  %v5767_v34 = vld [vmem:[#allocation4 + $0x348] sm:$0xf0] }
 0x113   :  { %1500 = vmatpush.bf16.msra.mxu0 %v5534_v52  ;;  %v7659_v52 = vor.u32 %v6786_v24, %v5741_v20  ;;  %v850_v58 = vpop.f32.mrf.mxu2  ;;  %v5669_v20 = vld [vmem:[#allocation4 + $0x270] sm:$0xf]  ;;  %v6768_v24 = vld [vmem:[#allocation4 + $0x284] sm:$0xf0]  ;;  %5590 = vmatmul.msk.bf16.gmra.mxu2 %vm523_vm0, %v9445_v8  ;;  %v7698_v38 = vor.u32 %v6789_v40, %v5767_v34 }
 0x114   :  { %1468 = vmatpush.bf16.msra.mxu1 %v5386_v47  ;;  %v5717_v47 = vld [vmem:[#allocation4 + $0x2d0] sm:$0xf]  ;;  %v810_v63 = vpop.f32.mrf.mxu3  ;;  %v7691_v0 = vor.u32 %v6768_v24, %v5669_v20 }
 0x115   :  { %v7667_v23 = vor.u32 %v6780_v26, %v5717_v47  ;;  %v5645_v47 = vld [vmem:[#allocation4 + $0x240] sm:$0xf] }
 0x117   :  { %1501 = vmatpush.bf16.msra.mxu0 %v5510_v33  ;;  %v7664_v33 = vadd.f32 %v717_v12, %v7632_v59  ;;  %v5813_v59 = vld [vmem:[#allocation4 + $0x390] sm:$0xf]  ;;  %v6801_v12 = vld [vmem:[#allocation4 + $0x394] sm:$0xf] }
 0x118   :  { %1469 = vmatpush.bf16.msra.mxu1 %v5362_v35  ;;  %v6804_v35 = vld [vmem:[#allocation4 + $0x3a4] sm:$0xf0]  ;;  %v829_v45 = vpop.f32.mrf.mxu0 }
 0x119   :  { %v7678_v21 = vor.u32 %v6804_v35, %v5813_v59  ;;  %v830_v4 = vadd.f32 %v829_v45, %v7559_v6  ;;  %v798_v6 = vpop.f32.mrf.mxu1  ;;  %v5621_v59 = vld [vmem:[#allocation4 + $0x210] sm:$0xf]  ;;  %v6756_v35 = vld [vmem:[#allocation4 + $0x224] sm:$0xf0] }
 0x11a   :  { %v7694_v26 = vadd.f32 %v798_v6, %v7584_v43  ;;  %v6750_v6 = vld [vmem:[#allocation4 + $0x1f4] sm:$0xf0] }
 0x11b   :  { %1502 = vmatpush.bf16.msra.mxu0 %v5486_v42  ;;  %v5387_v42 = vld [vmem:[#allocation7 + $0x58] sm:$0xf0]  ;;  %2061 = vmatpush.bf16.msra.mxu3 %v7678_v21  ;;  %v7685_v54 = vadd.f32 %v848_v14, %v830_v4  ;;  %v5815_v14 = vld [vmem:[#allocation4 + $0x3a8] sm:$0xf0]  ;;  %v7723_v34 = vor.u32 %v6750_v6, %v5597_v19 }
 0x11c   :  { %2036 = vmatpush.bf16.msrb.mxu1 %v7653_v28  ;;  %v5390_v1 = vor.u32 %v6695_v13, %v5387_v42  ;;  %v7696_v16 = vor.u32 %v6801_v12, %v5815_v14  ;;  %v6783_v42 = vld [vmem:[#allocation4 + $0x304] sm:$0xf]  ;;  %v812_v45 = vpop.f32.mrf.mxu3  ;;  %v5743_v4 = vld [vmem:[#allocation4 + $0x318] sm:$0xf0]  ;;  %v5773_v12 = vld [vmem:[#allocation4 + $0x338] sm:$0xf] }
 0x11d   :  { %v7706_v20 = vadd.f32 %v812_v45, %v7656_v36  ;;  %v5789_v14 = vld [vmem:[#allocation4 + $0x360] sm:$0xf] }
 0x11e   :  { %2099 = vmatpush.bf16.msrb.mxu2 %v7696_v16  ;;  %5588 = vmatmul.msk.bf16.gmra.mxu3 %vm523_vm0, %v9445_v8 }
 0x11f   :  { %1503 = vmatpush.bf16.msra.mxu0 %v5462_v31  ;;  %v7683_v31 = vadd.f32 %v810_v63, %v7640_v27  ;;  %v6762_v27 = vld [vmem:[#allocation4 + $0x254] sm:$0xf0]  ;;  %1470 = vmatmul.bf16.vlgmr.msra.gmra.mxu1 %v7238_v55 }
 0x120   :  { %2037 = vmatpush.bf16.msrb.mxu1 %v7659_v52  ;;  %v7701_v13 = vor.u32 %v6762_v27, %v5645_v47  ;;  %v6777_v47 = vld [vmem:[#allocation4 + $0x2d4] sm:$0xf]  ;;  %v5719_v27 = vld [vmem:[#allocation4 + $0x2e8] sm:$0xf0] }
 0x121   :  { %v867_v63 = vpop.f32.mrf.mxu1 }
 0x122   :  { %v7717_v57 = vadd.f32 %v867_v63, %v7575_v50  ;;  %v6787_v63 = vld [vmem:[#allocation4 + $0x31c] sm:$0xf0]  ;;  %1437 = vmatmul.bf16.gmra.mxu0 %v7305_v46 }
 0x123   :  { %1504 = vmatpush.bf16.msra.mxu0 %v5438_v29  ;;  %v853_v29 = vpop.f32.mrf.mxu2  ;;  %5593 = vmatmul.msk.bf16.vlgmr.msra.gmra.mxu2 %vm523_vm0, %v7240_v56 }
 0x124   :  { %2038 = vmatpush.bf16.msrb.mxu1 %v7667_v23  ;;  %v815_v45 = vpop.f32.mrf.mxu3 }
 0x125   :  { %v7735_v19 = vadd.f32 %v815_v45, %v7670_v49  ;;  %v6781_v45 = vld [vmem:[#allocation4 + $0x2ec] sm:$0xf0] }
 0x127   :  { %1505 = vmatpush.bf16.msra.mxu0 %v5414_v62  ;;  %v831_v62 = vpop.f32.mrf.mxu0  ;;  %9454 = vst [vmem:[#allocation23_spill] sm:$0xff] %v7735_v19 }
 0x128   :  { %2039 = vmatpush.bf16.msrb.mxu1 %v7676_v2  ;;  %v832_v43 = vadd.f32 %v831_v62, %v7570_v48  ;;  %v7714_v48 = vor.u32 %v6783_v42, %v5743_v4  ;;  %v7728_v62 = vor.u32 %v6777_v47, %v5719_v27  ;;  %v5695_v42 = vld [vmem:[#allocation4 + $0x2b8] sm:$0xf0]  ;;  %v5749_v4 = vld [vmem:[#allocation4 + $0x308] sm:$0xf] }
 0x129   :  { %v7750_v49 = vor.u32 %v6787_v63, %v5749_v4  ;;  %v6759_v4 = vld [vmem:[#allocation4 + $0x244] sm:$0xf]  ;;  %v5647_v63 = vld [vmem:[#allocation4 + $0x258] sm:$0xf0] }
 0x12a   :  { %v7708_v24 = vadd.f32 %v850_v58, %v832_v43  ;;  %v6793_v58 = vld [vmem:[#allocation4 + $0x34c] sm:$0xf0]  ;;  %9452 = vst [vmem:[#allocation21_spill] sm:$0xff] %v7728_v62 }
 0x12b   :  { %1506 = vmatpush.bf16.msra.mxu0 %v5390_v1  ;;  %v7712_v1 = vor.u32 %v6756_v35, %v5621_v59  ;;  %v855_v36 = vpop.f32.mrf.mxu2  ;;  %v7731_v59 = vor.u32 %v6793_v58, %v5773_v12  ;;  %v6771_v35 = vld [vmem:[#allocation4 + $0x2a4] sm:$0xf]  ;;  %9457 = vst [vmem:[#allocation27_spill] sm:$0xff] %v7750_v49  ;;  %v5791_v12 = vld [vmem:[#allocation4 + $0x378] sm:$0xf0] }
 0x12c   :  { %2040 = vmatpush.bf16.msrb.mxu1 %v7691_v0  ;;  %v7744_v47 = vor.u32 %v6771_v35, %v5695_v42  ;;  %v6765_v58 = vld [vmem:[#allocation4 + $0x274] sm:$0xf] }
 0x12d   :  { %9453 = vst [vmem:[#allocation22_spill] sm:$0xff] %v7731_v59 }
 0x12e   :  { %9456 = vst [vmem:[#allocation26_spill] sm:$0xff] %v7744_v47  ;;  %5591 = vmatmul.msk.bf16.vlgmr.msrb.gmra.mxu3 %vm523_vm0, %v7240_v56 }
 0x12f   :  { %1507 = vmatpush.bf16.msra.mxu0 %v5366_v25  ;;  %v6798_v25 = vld [vmem:[#allocation4 + $0x374] sm:$0xf0]  ;;  %v834_v40 = vpop.f32.mrf.mxu0  ;;  %1475 = vmatmul.bf16.gmra.mxu1 %v7305_v46 }
 0x130   :  { %2041 = vmatpush.bf16.msrb.mxu1 %v7701_v13  ;;  %v7726_v50 = vor.u32 %v6798_v25, %v5789_v14  ;;  %v835_v43 = vadd.f32 %v834_v40, %v7581_v10  ;;  %v869_v10 = vpop.f32.mrf.mxu1  ;;  %v5671_v40 = vld [vmem:[#allocation4 + $0x288] sm:$0xf0] }
 0x131   :  { %v7747_v27 = vadd.f32 %v869_v10, %v7586_v30  ;;  %v7756_v30 = vor.u32 %v6765_v58, %v5671_v40  ;;  %v817_v10 = vpop.f32.mrf.mxu3  ;;  %v7768_v58 = vor.u32 %v6759_v4, %v5647_v63  ;;  %v1691_v63 = vshrl.u32 %v7343_v51, 16 }
 0x132   :  { %2062 = vmatpush.bf16.msra.mxu3 %v7726_v50  ;;  %v7737_v6 = vadd.f32 %v853_v29, %v835_v43  ;;  %v6795_v29 = vld [vmem:[#allocation4 + $0x364] sm:$0xf]  ;;  %v5725_v43 = vld [vmem:[#allocation4 + $0x2d8] sm:$0xf]  ;;  %1508 = vmatmul.bf16.vlgmr.msra.gmra.mxu0 %v7238_v55 }
 0x133   :  { %2074 = vmatpush.bf16.msrb.mxu0 %v7698_v38  ;;  %v924_v14 = vpop.f32.mrf.mxu2  ;;  %v7752_v25 = vor.u32 %v6795_v29, %v5791_v12  ;;  %9458 = vst [vmem:[#allocation28_spill] sm:$0xff] %v7756_v30  ;;  %v7760_v42 = vor.u32 %v6781_v45, %v5725_v43  ;;  %v5701_v29 = vld [vmem:[#allocation4 + $0x2a8] sm:$0xf]  ;;  %v6775_v12 = vld [vmem:[#allocation4 + $0x2bc] sm:$0xf0]  ;;  %5594 = vmatmul.msk.bf16.gmra.mxu2 %vm523_vm0, %v9445_v8 }
 0x134   :  { %2042 = vmatpush.bf16.msrb.mxu1 %v7712_v1  ;;  %9455 = vst [vmem:[#allocation24_spill] sm:$0xff] %v7737_v6  ;;  %v7763_v6 = vadd.f32 %v817_v10, %v7694_v26  ;;  %v7775_v40 = vor.u32 %v6775_v12, %v5701_v29  ;;  %v6753_v43 = vld [vmem:[#allocation4 + $0x214] sm:$0xf]  ;;  %v5623_v45 = vld [vmem:[#allocation4 + $0x228] sm:$0xf0]  ;;  %v1698_v29 = vshll.u32 %v7388_v9, 16 }
 0x135   :  { %2100 = vmatpush.bf16.msrb.mxu2 %v7752_v25  ;;  %9459 = vst [vmem:[#allocation29_spill] sm:$0xff] %v7760_v42  ;;  %v5677_v12 = vld [vmem:[#allocation4 + $0x278] sm:$0xf] }
 0x136   :  { %9460 = vst [vmem:[#allocation30_spill] sm:$0xff] %v7763_v6  ;;  %v5821_v6 = vld [vmem:[#allocation4 + $0x398] sm:$0xf] }
 0x137   :  { %2075 = vmatpush.bf16.msrb.mxu0 %v7714_v48  ;;  %v836_v19 = vpop.f32.mrf.mxu0  ;;  %9462 = vst [vmem:[#allocation32_spill] sm:$0xff] %v7768_v58 }
 0x138   :  { %2043 = vmatpush.bf16.msrb.mxu1 %v7723_v34  ;;  %v837_v35 = vadd.f32 %v836_v19, %v7592_v60  ;;  %v1693_v19 = vshll.u32 %v7343_v51, 16  ;;  %9463 = vst [vmem:[#allocation33_spill] sm:$0xff] %v7775_v40  ;;  %v5653_v51 = vld [vmem:[#allocation4 + $0x248] sm:$0xf] }
 0x139   :  { %v886_v56 = vpop.f32.mrf.mxu3 }
 0x13a   :  { %v1695_v10 = vrot.slane %v1693_v19, 1  ;;  %v6747_v19 = vld [vmem:[#allocation4 + $0x1e4] sm:$0xf] }
 0x13b   :  { %2076 = vmatpush.bf16.msrb.mxu0 %v7728_v62  ;;  %v7777_v26 = vpop.f32.mrf.mxu2 }
 0x13c   :  { %2112 = vmatpush.bf16.msra.mxu1 %v7731_v59  ;;  %v7765_v59 = vadd.f32 %v855_v36, %v837_v35  ;;  %v7791_v35 = vor.u32 %v6753_v43, %v5623_v45  ;;  %v5599_v43 = vld [vmem:[#allocation4 + $0x1f8] sm:$0xf0]  ;;  %v1696_v55 = vor.u32 %v1695_v10, %v1691_v63  ;;  %v1702_v10 = vshrl.u32 %v7249_v61, 16 }
 0x13d   :  { %v7821_v62 = vor.u32 %v6747_v19, %v5599_v43 }
 0x13e   :  { %9461 = vst [vmem:[#allocation31_spill] sm:$0xff] %v7765_v59  ;;  %v6805_v59 = vld [vmem:[#allocation4 + $0x3ac] sm:$0xf0]  ;;  %5592 = vmatmul.msk.bf16.gmra.mxu3 %vm523_vm0, %v9445_v8 }
 0x13f   :  { %2077 = vmatpush.bf16.msrb.mxu0 %v7744_v47  ;;  %v872_v47 = vpop.f32.mrf.mxu1  ;;  %v905_v36 = vpop.f32.mrf.mxu0  ;;  %9464 = vst [vmem:[#allocation34_spill] sm:$0xff] %v7791_v35 }
 0x140   :  { %2113 = vmatpush.bf16.msra.mxu1 %v7750_v49  ;;  %v7771_v60 = vadd.f32 %v872_v47, %v7594_v37  ;;  %v77_v37 = vld [vmem:[%s9354_s0 + $0x40] sm:$0x3]  ;;  %v7789_v47 = vld [vmem:[%s9354_s0 + $0x48] sm:$0x3]  ;;  %v906_v4 = vadd.f32 %v905_v36, %v7599_v41  ;;  %v1704_v36 = vshll.u32 %v7249_v61, 16  ;;  %9470 = vst [vmem:[#allocation40_spill] sm:$0xff] %v7821_v62 }
 0x141   :  { %v7806_v41 = vpack.c.bf16 %v7789_v47, %v77_v37 }
 0x142   :  { %1513 = vmatmul.bf16.gmra.mxu0 %v7305_v46 }
 0x143   :  { %2078 = vmatpush.bf16.msrb.mxu0 %v7756_v30  ;;  %v7800_v30 = vadd.f32 %v924_v14, %v906_v4  ;;  %9467 = vst [vmem:[#allocation37_spill] sm:$0xff] %v7806_v41  ;;  %v7813_v14 = vor.u32 %v6805_v59, %v5821_v6  ;;  %v7819_v49 = vpop.f32.mrf.mxu2  ;;  %v6790_v6 = vld [vmem:[#allocation4 + $0x33c] sm:$0xf] }
 0x144   :  { %2114 = vmatpush.bf16.msra.mxu1 %v7760_v42  ;;  %v7798_v42 = vadd.f32 %v886_v56, %v7717_v57  ;;  %v6763_v56 = vld [vmem:[#allocation4 + $0x25c] sm:$0xf0] }
 0x145   :  { %9466 = vst [vmem:[#allocation36_spill] sm:$0xff] %v7800_v30  ;;  %v5823_v30 = vld [vmem:[#allocation4 + $0x3b0] sm:$0xf0]  ;;  %2137 = vmatpush.bf16.msrb.mxu3 %v7813_v14 }
 0x146   :  { %9465 = vst [vmem:[#allocation35_spill] sm:$0xff] %v7798_v42  ;;  %v6802_v42 = vld [vmem:[#allocation4 + $0x39c] sm:$0xf] }
 0x147   :  { %2079 = vmatpush.bf16.msrb.mxu0 %v7768_v58  ;;  %v6769_v58 = vld [vmem:[#allocation4 + $0x28c] sm:$0xf0]  ;;  %v874_v45 = vpop.f32.mrf.mxu1  ;;  %9468 = vst [vmem:[#allocation38_spill] sm:$0xff] %v7813_v14  ;;  %v7828_v59 = vor.u32 %v6802_v42, %v5823_v30  ;;  %v907_v63 = vpop.f32.mrf.mxu0  ;;  %v6784_v30 = vld [vmem:[#allocation4 + $0x30c] sm:$0xf] }
 0x148   :  { %2115 = vmatpush.bf16.msra.mxu1 %v7775_v40  ;;  %v7811_v57 = vadd.f32 %v874_v45, %v7601_v22  ;;  %v7815_v4 = vor.u32 %v6769_v58, %v5677_v12  ;;  %v7817_v40 = vrot.slane %v1698_v29, 1  ;;  %v7826_v22 = vor.u32 %v6763_v56, %v5653_v51  ;;  %v5775_v58 = vld [vmem:[#allocation4 + $0x350] sm:$0xf0]  ;;  %v5629_v51 = vld [vmem:[#allocation4 + $0x218] sm:$0xf]  ;;  %v888_v42 = vpop.f32.mrf.mxu3 }
 0x149   :  { %v1706_v29 = vrot.slane %v1704_v36, 1  ;;  %v1708_v12 = vshll.u32 %v7323_v32, 16  ;;  %v7833_v19 = vor.u32 %v6790_v6, %v5775_v58  ;;  %v908_v43 = vadd.f32 %v907_v63, %v7608_v53  ;;  %2175 = vmatpush.bf16.msra.mxu2 %v7828_v59  ;;  %v6757_v45 = vld [vmem:[#allocation4 + $0x22c] sm:$0xf0]  ;;  %v5751_v36 = vld [vmem:[#allocation4 + $0x320] sm:$0xf0] }
 0x14a   :  { %9469 = vst [vmem:[#allocation39_spill] sm:$0xff] %v7815_v4  ;;  %v7839_v56 = vsel %vm1689_vm1, %v1696_v55, %v7817_v40  ;;  %v7843_v61 = vadd.f32 %v888_v42, %v7747_v27  ;;  %v7849_v58 = vor.u32 %v6784_v30, %v5751_v36  ;;  %v7853_v55 = vor.u32 %v6757_v45, %v5629_v51  ;;  %v5605_v14 = vld [vmem:[#allocation4 + $0x1e8] sm:$0xf]  ;;  %v6751_v42 = vld [vmem:[#allocation4 + $0x1fc] sm:$0xf0] }
 0x14b   :  { %2080 = vmatpush.bf16.msrb.mxu0 %v7791_v35  ;;  %v1563_v35 = vunpack.c.l.bf16 %v7806_v41  ;;  %9471 = vst [vmem:[#allocation41_spill] sm:$0xff] %v7833_v19  ;;  %v7846_v6 = vadd.f32 %v7777_v26, %v908_v43  ;;  %v6778_v26 = vld [vmem:[#allocation4 + $0x2dc] sm:$0xf]  ;;  %v5727_v43 = vld [vmem:[#allocation4 + $0x2f0] sm:$0xf0]  ;;  %2044 = vmatmul.bf16.vlgmr.msrb.gmra.mxu1 %v7839_v56  ;;  %v7874_v36 = vor.u32 %v6751_v42, %v5605_v14 }
 0x14c   :  { %2116 = vmatpush.bf16.msra.mxu1 %v7815_v4  ;;  %9472 = vst [vmem:[#allocation42_spill] sm:$0xff] %v7843_v61  ;;  %v7851_v4 = vrot.slane %v1708_v12, 1  ;;  %v6799_v51 = vld [vmem:[#allocation4 + $0x37c] sm:$0xf0]  ;;  %v6788_v14 = vld [vmem:[#allocation4 + $0x324] sm:$0xf0] }
 0x14d   :  { %9473 = vst [vmem:[#allocation43_spill] sm:$0xff] %v7846_v6  ;;  %v1565_v53 = vsub.f32 %v77_v37, %v1563_v35  ;;  %v7859_v37 = vpop.f32.mrf.mxu2  ;;  %v7862_v35 = vor.u32 %v6778_v26, %v5727_v43 }
 0x14e   :  { %9474 = vst [vmem:[#allocation44_spill] sm:$0xff] %v7849_v58 }
 0x14f   :  { %2081 = vmatpush.bf16.msrb.mxu0 %v7821_v62  ;;  %v943_v63 = vpop.f32.mrf.mxu1  ;;  %v1707_v62 = vor.u32 %v1706_v29, %v1702_v10  ;;  %v5781_v10 = vld [vmem:[#allocation4 + $0x340] sm:$0xf]  ;;  %v6794_v29 = vld [vmem:[#allocation4 + $0x354] sm:$0xf0]  ;;  %v7867_v12 = vpack.c.bf16 %v1565_v53, %v1565_v53  ;;  %v910_v45 = vpop.f32.mrf.mxu0  ;;  %v6772_v53 = vld [vmem:[#allocation4 + $0x2ac] sm:$0xf] }
 0x150   :  { %2117 = vmatpush.bf16.msra.mxu1 %v7826_v22  ;;  %v7857_v27 = vadd.f32 %v943_v63, %v7627_v44  ;;  %v5797_v44 = vld [vmem:[#allocation4 + $0x368] sm:$0xf]  ;;  %v911_v43 = vadd.f32 %v910_v45, %v7610_v17  ;;  %v7880_v61 = vor.u32 %v6794_v29, %v5781_v10  ;;  %v891_v6 = vpop.f32.mrf.mxu3  ;;  %v1712_v17 = vshrl.u32 %v7388_v9, 16  ;;  %v6796_v29 = vld [vmem:[#allocation4 + $0x36c] sm:$0xf] }
 0x151   :  { %9475 = vst [vmem:[#allocation45_spill] sm:$0xff] %v7867_v12  ;;  %v7871_v30 = vsel %vm1689_vm1, %v1707_v62, %v7851_v4  ;;  %v7877_v26 = vor.u32 %v6799_v51, %v5797_v44  ;;  %v7887_v42 = vadd.f32 %v891_v6, %v7771_v60  ;;  %v5799_v60 = vld [vmem:[#allocation4 + $0x380] sm:$0xf0]  ;;  %v6766_v6 = vld [vmem:[#allocation4 + $0x27c] sm:$0xf] }
 0x152   :  { %5837 = vmatmul.msk.bf16.vlgmr.msrb.gmra.mxu2 %vm523_vm0, %v7871_v30  ;;  %v7906_v51 = vor.u32 %v6796_v29, %v5799_v60  ;;  %v5679_v45 = vld [vmem:[#allocation4 + $0x290] sm:$0xf0]  ;;  %v6760_v60 = vld [vmem:[#allocation4 + $0x24c] sm:$0xf]  ;;  %5835 = vmatmul.msk.bf16.vlgmr.msra.gmra.mxu3 %vm523_vm0, %v7871_v30 }
 0x153   :  { %2150 = vmatpush.bf16.msra.mxu0 %v7833_v19  ;;  %v1564_v19 = vunpack.c.h.bf16 %v7806_v41  ;;  %v5703_v41 = vld [vmem:[#allocation4 + $0x2c0] sm:$0xf0]  ;;  %2138 = vmatpush.bf16.msrb.mxu3 %v7877_v26  ;;  %9477 = vst [vmem:[#allocation47_spill] sm:$0xff] %v7887_v42  ;;  %v1720_v42 = vshrl.u32 %v7323_v32, 16 }
 0x154   :  { %2118 = vmatpush.bf16.msra.mxu1 %v7853_v55  ;;  %v7884_v62 = vor.u32 %v6772_v53, %v5703_v41  ;;  %v7909_v53 = vor.u32 %v6766_v6, %v5679_v45  ;;  %2176 = vmatpush.bf16.msra.mxu2 %v7906_v51  ;;  %v5655_v6 = vld [vmem:[#allocation4 + $0x260] sm:$0xf0] }
 0x155   :  { %v1566_v63 = vsub.f32 %v7789_v47, %v1564_v19  ;;  %v7890_v47 = vadd.f32 %v7819_v49, %v911_v43  ;;  %v1716_v19 = vshll.u32 %v7867_v12, 16  ;;  %v1000_v43 = vpop.f32.mrf.mxu2  ;;  %v6782_v12 = vld [vmem:[#allocation4 + $0x2f4] sm:$0xf0]  ;;  %2082 = vmatmul.bf16.vlgmr.msrb.gmra.mxu0 %v7839_v56 }
 0x156   :  { %9476 = vst [vmem:[#allocation46_spill] sm:$0xff] %v7884_v62 }
 0x157   :  { %2151 = vmatpush.bf16.msra.mxu0 %v7849_v58  ;;  %v5757_v58 = vld [vmem:[#allocation4 + $0x310] sm:$0xf]  ;;  %9478 = vst [vmem:[#allocation48_spill] sm:$0xff] %v7890_v47  ;;  %v945_v10 = vpop.f32.mrf.mxu1  ;;  %v7898_v41 = vpack.c.bf16 %v1566_v63, %v1566_v63  ;;  %v5733_v63 = vld [vmem:[#allocation4 + $0x2e0] sm:$0xf]  ;;  %v912_v9 = vpop.f32.mrf.mxu0  ;;  %v7920_v47 = vor.u32 %v6760_v60, %v5655_v6 }
 0x158   :  { %2119 = vmatpush.bf16.msra.mxu1 %v7874_v36  ;;  %v7901_v49 = vadd.f32 %v945_v10, %v7637_v18  ;;  %v7904_v44 = vor.u32 %v6788_v14, %v5757_v58  ;;  %v1714_v18 = vor.u32 %v1712_v17, %v7817_v40  ;;  %v1718_v10 = vrot.slane %v1716_v19, 1  ;;  %v893_v45 = vpop.f32.mrf.mxu3  ;;  %v6776_v40 = vld [vmem:[#allocation4 + $0x2c4] sm:$0xf0]  ;;  %v6754_v6 = vld [vmem:[#allocation4 + $0x21c] sm:$0xf] }
 0x159   :  { %9479 = vst [vmem:[#allocation49_spill] sm:$0xff] %v7898_v41  ;;  %v1724_v58 = vshll.u32 %v7898_v41, 16  ;;  %v913_v14 = vadd.f32 %v912_v9, %v7617_v15  ;;  %v7917_v29 = vor.u32 %v6782_v12, %v5733_v63  ;;  %v7923_v17 = vadd.f32 %v893_v45, %v7811_v57  ;;  %v5631_v57 = vld [vmem:[#allocation4 + $0x230] sm:$0xf0] }
 0x15a   :  { %v7929_v15 = vsel %vm1689_vm1, %v1714_v18, %v1718_v10  ;;  %v1722_v12 = vor.u32 %v1720_v42, %v7851_v4  ;;  %v6770_v18 = vld [vmem:[#allocation4 + $0x294] sm:$0xf0] }
 0x15b   :  { %2152 = vmatpush.bf16.msra.mxu0 %v7862_v35  ;;  %9480 = vst [vmem:[#allocation50_spill] sm:$0xff] %v7923_v17  ;;  %v7926_v19 = vadd.f32 %v7859_v37, %v913_v14  ;;  %v1726_v63 = vrot.slane %v1724_v58, 1  ;;  %v7939_v37 = vor.u32 %v6754_v6, %v5631_v57  ;;  %v5685_v14 = vld [vmem:[#allocation4 + $0x280] sm:$0xf]  ;;  %2049 = vmatmul.bf16.gmra.mxu1 %v7929_v15  ;;  %v6806_v4 = vld [vmem:[#allocation4 + $0x3b4] sm:$0xf0] }
 0x15c   :  { %2188 = vmatpush.bf16.msrb.mxu1 %v7880_v61  ;;  %v5607_v6 = vld [vmem:[#allocation4 + $0x200] sm:$0xf0]  ;;  %v5661_v17 = vld [vmem:[#allocation4 + $0x250] sm:$0xf] }
 0x15d   :  { %v1002_v45 = vpop.f32.mrf.mxu2 }
 0x15f   :  { %2153 = vmatpush.bf16.msra.mxu0 %v7884_v62  ;;  %v5709_v62 = vld [vmem:[#allocation4 + $0x2b0] sm:$0xf]  ;;  %v948_v9 = vpop.f32.mrf.mxu1  ;;  %v981_v42 = vpop.f32.mrf.mxu0 }
 0x160   :  { %2189 = vmatpush.bf16.msrb.mxu1 %v7904_v44  ;;  %v7933_v41 = vadd.f32 %v948_v9, %v7648_v7  ;;  %v7936_v60 = vor.u32 %v6776_v40, %v5709_v62  ;;  %v5829_v7 = vld [vmem:[#allocation4 + $0x3a0] sm:$0xf]  ;;  %v7945_v62 = vsel %vm1689_vm1, %v1722_v12, %v1726_v63  ;;  %v982_v58 = vadd.f32 %v981_v42, %v7624_v3  ;;  %v6748_v9 = vld [vmem:[#allocation4 + $0x1ec] sm:$0xf]  ;;  %v962_v57 = vpop.f32.mrf.mxu3  ;;  %v6764_v12 = vld [vmem:[#allocation4 + $0x264] sm:$0xf0] }
 0x161   :  { %v7947_v10 = vor.u32 %v6806_v4, %v5829_v7  ;;  %v7951_v40 = vor.u32 %v6770_v18, %v5685_v14  ;;  %v7955_v32 = vor.u32 %v6748_v9, %v5607_v6  ;;  %v7958_v63 = vadd.f32 %v962_v57, %v7857_v27  ;;  %v6803_v4 = vld [vmem:[#allocation4 + $0x3a4] sm:$0xf]  ;;  %v5831_v42 = vld [vmem:[#allocation4 + $0x3b8] sm:$0xf0]  ;;  %v5637_v9 = vld [vmem:[#allocation4 + $0x220] sm:$0xf] }
 0x162   :  { %v7960_v7 = vadd.f32 %v1000_v43, %v982_v58  ;;  %5838 = vmatmul.msk.bf16.gmra.mxu2 %vm523_vm0, %v7945_v62  ;;  %v7969_v18 = vor.u32 %v6764_v12, %v5661_v17  ;;  %v7972_v43 = vor.u32 %v6803_v4, %v5831_v42  ;;  %v6758_v58 = vld [vmem:[#allocation4 + $0x234] sm:$0xf0]  ;;  %v6791_v6 = vld [vmem:[#allocation4 + $0x344] sm:$0xf]  ;;  %v5783_v57 = vld [vmem:[#allocation4 + $0x358] sm:$0xf0]  ;;  %5836 = vmatmul.msk.bf16.gmra.mxu3 %vm523_vm0, %v7945_v62 }
 0x163   :  { %2154 = vmatpush.bf16.msra.mxu0 %v7909_v53  ;;  %9481 = vst [vmem:[#allocation51_spill] sm:$0xff] %v7947_v10  ;;  %2213 = vmatpush.bf16.msra.mxu3 %v7947_v10  ;;  %v7979_v17 = vor.u32 %v6758_v58, %v5637_v9  ;;  %v6785_v12 = vld [vmem:[#allocation4 + $0x314] sm:$0xf]  ;;  %v5613_v4 = vld [vmem:[#allocation4 + $0x1f0] sm:$0xf] }
 0x164   :  { %2190 = vmatpush.bf16.msrb.mxu1 %v7917_v29  ;;  %9482 = vst [vmem:[#allocation52_spill] sm:$0xff] %v7951_v40  ;;  %2251 = vmatpush.bf16.msrb.mxu2 %v7972_v43  ;;  %v6752_v42 = vld [vmem:[#allocation4 + $0x204] sm:$0xf0]  ;;  %v5735_v9 = vld [vmem:[#allocation4 + $0x2f8] sm:$0xf0] }
 0x165   :  { %9483 = vst [vmem:[#allocation53_spill] sm:$0xff] %v7955_v32  ;;  %v1005_v27 = vpop.f32.mrf.mxu2  ;;  %2087 = vmatmul.bf16.gmra.mxu0 %v7929_v15 }
 0x166   :  { %9484 = vst [vmem:[#allocation54_spill] sm:$0xff] %v7958_v63  ;;  %v7974_v63 = vor.u32 %v6791_v6, %v5783_v57 }
 0x167   :  { %2155 = vmatpush.bf16.msra.mxu0 %v7920_v47  ;;  %9485 = vst [vmem:[#allocation55_spill] sm:$0xff] %v7960_v7  ;;  %v950_v3 = vpop.f32.mrf.mxu1  ;;  %v983_v7 = vpop.f32.mrf.mxu0 }
 0x168   :  { %2191 = vmatpush.bf16.msrb.mxu1 %v7936_v60  ;;  %v7966_v14 = vadd.f32 %v950_v3, %v7664_v33  ;;  %9486 = vst [vmem:[#allocation56_spill] sm:$0xff] %v7974_v63  ;;  %v984_v33 = vadd.f32 %v983_v7, %v7634_v39  ;;  %v964_v3 = vpop.f32.mrf.mxu3  ;;  %v7992_v39 = vor.u32 %v6752_v42, %v5613_v4  ;;  %v6779_v7 = vld [vmem:[#allocation4 + $0x2e4] sm:$0xf]  ;;  %v5711_v4 = vld [vmem:[#allocation4 + $0x2c8] sm:$0xf0] }
 0x16a   :  { %v7985_v6 = vadd.f32 %v1002_v45, %v984_v33 }
 0x16b   :  { %2156 = vmatpush.bf16.msra.mxu0 %v7939_v37  ;;  %2120 = vmatmul.bf16.vlgmr.msra.gmra.mxu1 %v7839_v56 }
 0x16c   :  { %2192 = vmatpush.bf16.msrb.mxu1 %v7951_v40  ;;  %v7983_v40 = vadd.f32 %v964_v3, %v7901_v49  ;;  %v6800_v49 = vld [vmem:[#allocation4 + $0x384] sm:$0xf0]  ;;  %v6773_v3 = vld [vmem:[#allocation4 + $0x2b4] sm:$0xf] }
 0x16d   :  { %v1007_v58 = vpop.f32.mrf.mxu2 }
 0x16e   :  { %9487 = vst [vmem:[#allocation57_spill] sm:$0xff] %v7983_v40  ;;  %v6767_v40 = vld [vmem:[#allocation4 + $0x284] sm:$0xf] }
 0x16f   :  { %2157 = vmatpush.bf16.msra.mxu0 %v7955_v32  ;;  %v5759_v32 = vld [vmem:[#allocation4 + $0x328] sm:$0xf0]  ;;  %v7989_v10 = vpop.f32.mrf.mxu1  ;;  %v986_v45 = vpop.f32.mrf.mxu0 }
 0x170   :  { %2193 = vmatpush.bf16.msrb.mxu1 %v7969_v18  ;;  %v7987_v57 = vor.u32 %v6785_v12, %v5759_v32  ;;  %v5805_v32 = vld [vmem:[#allocation4 + $0x370] sm:$0xf]  ;;  %v987_v12 = vadd.f32 %v986_v45, %v7645_v11  ;;  %v967_v42 = vpop.f32.mrf.mxu3  ;;  %v5807_v45 = vld [vmem:[#allocation4 + $0x388] sm:$0xf0] }
 0x171   :  { %v8000_v33 = vor.u32 %v6800_v49, %v5805_v32  ;;  %v6797_v49 = vld [vmem:[#allocation4 + $0x374] sm:$0xf] }
 0x172   :  { %v8012_v32 = vadd.f32 %v1005_v27, %v987_v12  ;;  %5841 = vmatmul.msk.bf16.vlgmr.msra.gmra.mxu2 %vm523_vm0, %v7871_v30  ;;  %5839 = vmatmul.msk.bf16.vlgmr.msrb.gmra.mxu3 %vm523_vm0, %v7871_v30 }
 0x173   :  { %2226 = vmatpush.bf16.msrb.mxu0 %v7974_v63  ;;  %v7995_v63 = vor.u32 %v6779_v7, %v5735_v9  ;;  %2214 = vmatpush.bf16.msra.mxu3 %v8000_v33  ;;  %v8007_v7 = vor.u32 %v6773_v3, %v5711_v4  ;;  %v8010_v9 = vadd.f32 %v967_v42, %v7933_v41  ;;  %v5687_v41 = vld [vmem:[#allocation4 + $0x298] sm:$0xf0]  ;;  %v6761_v4 = vld [vmem:[#allocation4 + $0x254] sm:$0xf]  ;;  %v5663_v42 = vld [vmem:[#allocation4 + $0x268] sm:$0xf0] }
 0x174   :  { %2194 = vmatpush.bf16.msrb.mxu1 %v7979_v17  ;;  %v8021_v3 = vor.u32 %v6767_v40, %v5687_v41  ;;  %v5639_v41 = vld [vmem:[#allocation4 + $0x238] sm:$0xf0] }
 0x175   :  { %9488 = vst [vmem:[#allocation58_spill] sm:$0xff] %v7995_v63  ;;  %2158 = vmatmul.bf16.vlgmr.msra.gmra.mxu0 %v7839_v56 }
 0x176   :  { %9489 = vst [vmem:[#allocation59_spill] sm:$0xff] %v8010_v9 }
 0x177   :  { %2227 = vmatpush.bf16.msrb.mxu0 %v7987_v57  ;;  %v1321_v11 = vpop.f32.mrf.mxu1  ;;  %v988_v27 = vpop.f32.mrf.mxu0  ;;  %2340 = vmatpush.bf16.msrb.mxu3 %v7678_v21 }
 0x178   :  { %2195 = vmatpush.bf16.msrb.mxu1 %v7992_v39  ;;  %v989_v12 = vadd.f32 %v988_v27, %v7661_v5  ;;  %v969_v9 = vpop.f32.mrf.mxu3  ;;  %v6755_v5 = vld [vmem:[#allocation4 + $0x224] sm:$0xf] }
 0x17a   :  { %v8033_v40 = vadd.f32 %v1007_v58, %v989_v12  ;;  %v6749_v58 = vld [vmem:[#allocation4 + $0x1f4] sm:$0xf] }
 0x17b   :  { %2228 = vmatpush.bf16.msrb.mxu0 %v7995_v63  ;;  %v1376_v63 = vpop.f32.mrf.mxu2  ;;  %2125 = vmatmul.bf16.gmra.mxu1 %v7929_v15 }
 0x17c   :  { %2315 = vmatpush.bf16.msra.mxu1 %v7653_v28  ;;  %v8019_v28 = vor.u32 %v6797_v49, %v5807_v45  ;;  %v8031_v49 = vadd.f32 %v969_v9, %v7966_v14  ;;  %v5615_v9 = vld [vmem:[#allocation4 + $0x208] sm:$0xf0]  ;;  %2341 = vmatpush.bf16.msrb.mxu3 %v7726_v50 }
 0x17e   :  { %2252 = vmatpush.bf16.msrb.mxu2 %v8019_v28 }
 0x17f   :  { %2229 = vmatpush.bf16.msrb.mxu0 %v8007_v7  ;;  %v1324_v45 = vpop.f32.mrf.mxu1 }
 0x180   :  { %2316 = vmatpush.bf16.msra.mxu1 %v7659_v52  ;;  %v8028_v52 = vor.u32 %v6761_v4, %v5663_v42  ;;  %v1338_v12 = vpop.f32.mrf.mxu3 }
 0x182   :  { %2378 = vmatpush.bf16.msra.mxu2 %v7696_v16  ;;  %v8038_v16 = vor.u32 %v6755_v5, %v5639_v41  ;;  %5840 = vmatmul.msk.bf16.gmra.mxu3 %vm523_vm0, %v7945_v62 }
 0x183   :  { %2230 = vmatpush.bf16.msrb.mxu0 %v8021_v3  ;;  %v1378_v27 = vpop.f32.mrf.mxu2  ;;  %5842 = vmatmul.msk.bf16.gmra.mxu2 %vm523_vm0, %v7945_v62 }
 0x184   :  { %2317 = vmatpush.bf16.msra.mxu1 %v7667_v23  ;;  %v1357_v23 = vpop.f32.mrf.mxu0 }
 0x185   :  { %v1377_v14 = vadd.f32 %v1376_v63, %v1357_v23  ;;  %2163 = vmatmul.bf16.gmra.mxu0 %v7929_v15 }
 0x186   :  { %2379 = vmatpush.bf16.msra.mxu2 %v7752_v25  ;;  %v8046_v25 = vor.u32 %v6749_v58, %v5615_v9  ;;  %v9495_v58 = vld [vmem:[#allocation27_spill] sm:$0xff] }
 0x187   :  { %2231 = vmatpush.bf16.msrb.mxu0 %v8028_v52  ;;  %v8050_v4 = vadd.f32 %v1377_v14, %v7685_v54  ;;  %v1326_v21 = vpop.f32.mrf.mxu1  ;;  %v9496_v9 = vld [vmem:[#allocation23_spill] sm:$0xff] }
 0x188   :  { %2318 = vmatpush.bf16.msra.mxu1 %v7676_v2  ;;  %v1339_v2 = vadd.f32 %v1338_v12, %v7989_v10  ;;  %v1340_v42 = vpop.f32.mrf.mxu3 }
 0x189   :  { %v1341_v5 = vadd.f32 %v1340_v42, %v1321_v11  ;;  %v9492_v11 = vld [vmem:[#allocation26_spill] sm:$0xff] }
 0x18a   :  { %v8057_v63 = vadd.f32 %v1339_v2, %v7683_v31 }
 0x18b   :  { %2232 = vmatpush.bf16.msrb.mxu0 %v8038_v16  ;;  %v8068_v41 = vadd.f32 %v1341_v5, %v7706_v20  ;;  %2196 = vmatmul.bf16.vlgmr.msrb.gmra.mxu1 %v7839_v56  ;;  %v9493_v20 = vld [vmem:[#allocation24_spill] sm:$0xff] }
 0x18c   :  { %2319 = vmatpush.bf16.msra.mxu1 %v7691_v0  ;;  %v1381_v0 = vpop.f32.mrf.mxu2  ;;  %v1359_v54 = vpop.f32.mrf.mxu0  ;;  %v9500_v5 = vld [vmem:[#allocation32_spill] sm:$0xff] }
 0x18d   :  { %v1379_v10 = vadd.f32 %v1378_v27, %v1359_v54  ;;  %v9499_v54 = vld [vmem:[#allocation29_spill] sm:$0xff] }
 0x18f   :  { %2233 = vmatpush.bf16.msrb.mxu0 %v8046_v25  ;;  %v8065_v50 = vadd.f32 %v1379_v10, %v7708_v24  ;;  %v1395_v31 = vpop.f32.mrf.mxu1 }
 0x190   :  { %2320 = vmatpush.bf16.msra.mxu1 %v7701_v13  ;;  %v9490_v13 = vld [vmem:[#allocation21_spill] sm:$0xff]  ;;  %v1343_v24 = vpop.f32.mrf.mxu3 }
 0x191   :  { %v1344_v27 = vadd.f32 %v1343_v24, %v1324_v45  ;;  %v9504_v24 = vld [vmem:[#allocation30_spill] sm:$0xff] }
 0x192   :  { %5843 = vmatmul.msk.bf16.vlgmr.msra.gmra.mxu3 %vm523_vm0, %v7871_v30 }
 0x193   :  { %2353 = vmatpush.bf16.msra.mxu0 %v7698_v38  ;;  %5845 = vmatmul.msk.bf16.vlgmr.msrb.gmra.mxu2 %vm523_vm0, %v7871_v30  ;;  %v8086_v12 = vadd.f32 %v1344_v27, %v9496_v9  ;;  %v9509_v9 = vld [vmem:[#allocation39_spill] sm:$0xff]  ;;  %v2277_v30 = vshll.u32 %v7305_v46, 16 }
 0x194   :  { %2321 = vmatpush.bf16.msra.mxu1 %v7712_v1  ;;  %v1383_v23 = vpop.f32.mrf.mxu2  ;;  %v1362_v38 = vpop.f32.mrf.mxu0  ;;  %v9491_v1 = vld [vmem:[#allocation22_spill] sm:$0xff]  ;;  %2454 = vmatpush.bf16.msrb.mxu2 %v7828_v59 }
 0x195   :  { %9497 = vst [vmem:[#allocation22_spill] sm:$0xff] %v8086_v12  ;;  %2234 = vmatmul.bf16.vlgmr.msrb.gmra.mxu0 %v7839_v56 }
 0x197   :  { %2354 = vmatpush.bf16.msra.mxu0 %v7714_v48  ;;  %v1382_v48 = vadd.f32 %v1381_v0, %v1362_v38  ;;  %v9498_v0 = vld [vmem:[#allocation28_spill] sm:$0xff]  ;;  %v9501_v38 = vld [vmem:[#allocation31_spill] sm:$0xff] }
 0x198   :  { %2322 = vmatpush.bf16.msra.mxu1 %v7723_v34  ;;  %v1397_v34 = vpop.f32.mrf.mxu1  ;;  %2455 = vmatpush.bf16.msrb.mxu2 %v7906_v51  ;;  %v1345_v42 = vpop.f32.mrf.mxu3 }
 0x199   :  { %v8078_v14 = vadd.f32 %v1382_v48, %v9493_v20  ;;  %v9503_v48 = vld [vmem:[#allocation33_spill] sm:$0xff]  ;;  %v9506_v20 = vld [vmem:[#allocation34_spill] sm:$0xff] }
 0x19b   :  { %2355 = vmatpush.bf16.msra.mxu0 %v9490_v13  ;;  %9494 = vst [vmem:[#allocation21_spill] sm:$0xff] %v8078_v14  ;;  %v1346_v13 = vadd.f32 %v1345_v42, %v1326_v21  ;;  %2201 = vmatmul.bf16.gmra.mxu1 %v7929_v15  ;;  %v9511_v42 = vld [vmem:[#allocation36_spill] sm:$0xff]  ;;  %v6163_v14 = vld [vmem:[#allocation4 + $0x438] sm:$0xf0] }
 0x19c   :  { %2391 = vmatpush.bf16.msrb.mxu1 %v9491_v1  ;;  %v1452_v2 = vpop.f32.mrf.mxu2  ;;  %v1364_v45 = vpop.f32.mrf.mxu0 }
 0x19d   :  { %v1384_v10 = vadd.f32 %v1383_v23, %v1364_v45  ;;  %v9507_v23 = vld [vmem:[#allocation14_spill] sm:$0xff] }
 0x19e   :  { %v2272_v21 = vshll.u32 %v9507_v23, 16 }
 0x19f   :  { %2356 = vmatpush.bf16.msra.mxu0 %v9492_v11  ;;  %v8093_v1 = vadd.f32 %v1384_v10, %v9501_v38  ;;  %v8097_v11 = vadd.f32 %v1346_v13, %v9504_v24  ;;  %v2270_v38 = vshrl.u32 %v9507_v23, 16 }
 0x1a0   :  { %2392 = vmatpush.bf16.msrb.mxu1 %v9495_v58  ;;  %v1400_v59 = vpop.f32.mrf.mxu1  ;;  %v9508_v58 = vld [vmem:[#allocation38_spill] sm:$0xff]  ;;  %v1414_v45 = vpop.f32.mrf.mxu3 }
 0x1a1   :  { %9502 = vst [vmem:[#allocation26_spill] sm:$0xff] %v8093_v1  ;;  %2416 = vmatpush.bf16.msra.mxu3 %v9508_v58  ;;  %v1415_v10 = vadd.f32 %v1414_v45, %v1395_v31  ;;  %v9514_v31 = vld [vmem:[#allocation41_spill] sm:$0xff]  ;;  %v2287_v58 = vshll.u32 %v9445_v8, 16 }
 0x1a2   :  { %9505 = vst [vmem:[#allocation24_spill] sm:$0xff] %v8097_v11  ;;  %5844 = vmatmul.msk.bf16.gmra.mxu3 %vm523_vm0, %v7945_v62  ;;  %v6901_v1 = vld [vmem:[#allocation4 + $0x4cc] sm:$0xf0] }
 0x1a3   :  { %2357 = vmatpush.bf16.msra.mxu0 %v9498_v0  ;;  %5846 = vmatmul.msk.bf16.gmra.mxu2 %vm523_vm0, %v7945_v62 }
 0x1a4   :  { %2393 = vmatpush.bf16.msrb.mxu1 %v9499_v54  ;;  %v1454_v27 = vpop.f32.mrf.mxu2  ;;  %v1433_v51 = vpop.f32.mrf.mxu0  ;;  %v9510_v54 = vld [vmem:[#allocation40_spill] sm:$0xff] }
 0x1a5   :  { %v1453_v0 = vadd.f32 %v1452_v2, %v1433_v51  ;;  %v9513_v2 = vld [vmem:[#allocation15_spill] sm:$0xff]  ;;  %2417 = vmatpush.bf16.msra.mxu3 %v7877_v26  ;;  %v9520_v26 = vld [vmem:[#allocation37_spill] sm:$0xff]  ;;  %2239 = vmatmul.bf16.gmra.mxu0 %v7929_v15 }
 0x1a6   :  { %v2283_v24 = vshll.u32 %v9513_v2, 16 }
 0x1a7   :  { %2358 = vmatpush.bf16.msra.mxu0 %v9500_v5  ;;  %v8108_v5 = vadd.f32 %v1453_v0, %v9511_v42  ;;  %v9517_v42 = vld [vmem:[#allocation44_spill] sm:$0xff] }
 0x1a8   :  { %2394 = vmatpush.bf16.msrb.mxu1 %v9503_v48  ;;  %v8114_v13 = vpop.f32.mrf.mxu1  ;;  %v2274_v48 = vrot.slane %v2272_v21, 1  ;;  %v2285_v21 = vrot.slane %v2283_v24, 1 }
 0x1a9   :  { %9512 = vst [vmem:[#allocation27_spill] sm:$0xff] %v8108_v5  ;;  %v2289_v5 = vrot.slane %v2287_v58, 1 }
 0x1aa   :  { %v2275_v45 = vor.u32 %v2274_v48, %v2270_v38 }
 0x1ab   :  { %2359 = vmatpush.bf16.msra.mxu0 %v9506_v20  ;;  %v9515_v20 = vld [vmem:[#allocation35_spill] sm:$0xff] }
 0x1ac   :  { %2395 = vmatpush.bf16.msrb.mxu1 %v9509_v9  ;;  %v8121_v51 = vadd.f32 %v1415_v10, %v9515_v20  ;;  %v1457_v56 = vpop.f32.mrf.mxu2  ;;  %v2279_v9 = vrot.slane %v2277_v30, 1  ;;  %v1435_v0 = vpop.f32.mrf.mxu0  ;;  %v9518_v10 = vld [vmem:[#allocation43_spill] sm:$0xff] }
 0x1ae   :  { %9516 = vst [vmem:[#allocation23_spill] sm:$0xff] %v8121_v51  ;;  %v2265_v51 = vunpack.c.l.b16 %v9520_v26  ;;  %v8133_v30 = vsel %vm1689_vm1, %v2275_v45, %v2279_v9 }
 0x1af   :  { %2360 = vmatpush.bf16.msra.mxu0 %v9510_v54  ;;  %v2281_v54 = vshrl.u32 %v9513_v2, 16  ;;  %2323 = vmatmul.bf16.vlgmr.msra.gmra.mxu1 %v8133_v30 }
 0x1b0   :  { %2396 = vmatpush.bf16.msrb.mxu1 %v7826_v22  ;;  %v1455_v22 = vadd.f32 %v1454_v27, %v1435_v0  ;;  %v1471_v11 = vpop.f32.mrf.mxu1  ;;  %v8144_v24 = vpack.c.b16 %v2265_v51, %v2265_v51  ;;  %v2291_v51 = vshrl.u32 %v7305_v46, 16  ;;  %v6907_v46 = vld [vmem:[#allocation4 + $0x4fc] sm:$0xf0] }
 0x1b1   :  { %v2286_v38 = vor.u32 %v2285_v21, %v2281_v54  ;;  %v9525_v54 = vld [vmem:[#allocation48_spill] sm:$0xff] }
 0x1b2   :  { %v8129_v20 = vadd.f32 %v1455_v22, %v9518_v10  ;;  %9523 = vst [vmem:[#allocation32_spill] sm:$0xff] %v8144_v24  ;;  %v2293_v22 = vor.u32 %v2291_v51, %v2279_v9  ;;  %v2299_v10 = vshrl.u32 %v9445_v8, 16 }
 0x1b3   :  { %2429 = vmatpush.bf16.msrb.mxu0 %v9514_v31  ;;  %v1416_v31 = vpop.f32.mrf.mxu3  ;;  %v8147_v0 = vsel %vm1689_vm1, %v2286_v38, %v2289_v5 }
 0x1b4   :  { %2397 = vmatpush.bf16.msrb.mxu1 %v7853_v55  ;;  %v1417_v23 = vadd.f32 %v1416_v31, %v1397_v34  ;;  %9519 = vst [vmem:[#allocation28_spill] sm:$0xff] %v8129_v20  ;;  %v9521_v55 = vld [vmem:[#allocation42_spill] sm:$0xff]  ;;  %v1459_v27 = vpop.f32.mrf.mxu2  ;;  %v2266_v34 = vunpack.c.h.b16 %v9520_v26  ;;  %v1438_v58 = vpop.f32.mrf.mxu0  ;;  %5849 = vmatmul.msk.bf16.vlgmr.msra.gmra.mxu2 %vm523_vm0, %v8147_v0 }
 0x1b5   :  { %2530 = vmatpush.bf16.msra.mxu2 %v7972_v43  ;;  %5847 = vmatmul.msk.bf16.vlgmr.msrb.gmra.mxu3 %vm523_vm0, %v8147_v0 }
 0x1b6   :  { %v8138_v48 = vadd.f32 %v1417_v23, %v9521_v55  ;;  %v8157_v62 = vpack.c.b16 %v2266_v34, %v2266_v34  ;;  %v2301_v34 = vor.u32 %v2299_v10, %v2289_v5  ;;  %v9533_v5 = vld [vmem:[#allocation51_spill] sm:$0xff]  ;;  %2361 = vmatmul.bf16.vlgmr.msra.gmra.mxu0 %v8133_v30 }
 0x1b7   :  { %2430 = vmatpush.bf16.msrb.mxu0 %v9517_v42  ;;  %v2295_v42 = vshll.u32 %v8144_v24, 16  ;;  %2492 = vmatpush.bf16.msrb.mxu3 %v9533_v5 }
 0x1b8   :  { %2398 = vmatpush.bf16.msrb.mxu1 %v7874_v36  ;;  %9522 = vst [vmem:[#allocation29_spill] sm:$0xff] %v8138_v48  ;;  %v1458_v36 = vadd.f32 %v1457_v56, %v1438_v58  ;;  %v2303_v26 = vshll.u32 %v8157_v62, 16  ;;  %v6235_v48 = vld [vmem:[#allocation4 + $0x4c8] sm:$0xf0] }
 0x1b9   :  { %9527 = vst [vmem:[#allocation33_spill] sm:$0xff] %v8157_v62  ;;  %v2297_v31 = vrot.slane %v2295_v42, 1  ;;  %2531 = vmatpush.bf16.msra.mxu2 %v8019_v28  ;;  %v9538_v42 = vld [vmem:[#allocation56_spill] sm:$0xff]  ;;  %v6882_v62 = vld [vmem:[#allocation4 + $0x434] sm:$0xf0] }
 0x1ba   :  { %v8152_v21 = vadd.f32 %v1458_v36, %v9525_v54  ;;  %v2305_v58 = vrot.slane %v2303_v26, 1  ;;  %v9535_v36 = vld [vmem:[#allocation53_spill] sm:$0xff] }
 0x1bb   :  { %2431 = vmatpush.bf16.msrb.mxu0 %v7862_v35  ;;  %v9524_v35 = vld [vmem:[#allocation46_spill] sm:$0xff]  ;;  %v1419_v23 = vpop.f32.mrf.mxu3  ;;  %v8177_v9 = vsel %vm1689_vm1, %v2293_v22, %v2297_v31  ;;  %2493 = vmatpush.bf16.msrb.mxu3 %v8000_v33  ;;  %v6029_v33 = vld [vmem:[#allocation7 + $0x330] sm:$0xf] }
 0x1bc   :  { %2467 = vmatpush.bf16.msra.mxu1 %v7880_v61  ;;  %v1420_v45 = vadd.f32 %v1419_v23, %v1400_v59  ;;  %9526 = vst [vmem:[#allocation31_spill] sm:$0xff] %v8152_v21  ;;  %v1473_v61 = vpop.f32.mrf.mxu1  ;;  %v9528_v59 = vld [vmem:[#allocation47_spill] sm:$0xff]  ;;  %v1528_v15 = vpop.f32.mrf.mxu2  ;;  %v6259_v21 = vld [vmem:[#allocation4 + $0x4f8] sm:$0xf0] }
 0x1bd   :  { %v1440_v38 = vpop.f32.mrf.mxu0 }
 0x1be   :  { %v8164_v56 = vadd.f32 %v1420_v45, %v9528_v59  ;;  %v9536_v45 = vld [vmem:[#allocation55_spill] sm:$0xff]  ;;  %v9539_v59 = vld [vmem:[#allocation54_spill] sm:$0xff] }
 0x1bf   :  { %2432 = vmatpush.bf16.msrb.mxu0 %v9524_v35  ;;  %2328 = vmatmul.bf16.gmra.mxu1 %v8177_v9 }
 0x1c0   :  { %2468 = vmatpush.bf16.msra.mxu1 %v7904_v44  ;;  %9529 = vst [vmem:[#allocation30_spill] sm:$0xff] %v8164_v56  ;;  %v1460_v44 = vadd.f32 %v1459_v27, %v1440_v38  ;;  %v9534_v27 = vld [vmem:[#allocation52_spill] sm:$0xff] }
 0x1c2   :  { %v8174_v43 = vadd.f32 %v1460_v44, %v7926_v19  ;;  %v8188_v19 = vsel %vm1689_vm1, %v2301_v34, %v2305_v58  ;;  %v9542_v44 = vld [vmem:[#allocation58_spill] sm:$0xff]  ;;  %v6852_v34 = vld [vmem:[#allocation7 + $0x344] sm:$0xf0] }
 0x1c3   :  { %2433 = vmatpush.bf16.msrb.mxu0 %v7909_v53  ;;  %v1421_v53 = vpop.f32.mrf.mxu3 }
 0x1c4   :  { %2469 = vmatpush.bf16.msra.mxu1 %v7917_v29  ;;  %v1422_v55 = vadd.f32 %v1421_v53, %v8114_v13  ;;  %9530 = vst [vmem:[#allocation34_spill] sm:$0xff] %v8174_v43  ;;  %v1476_v35 = vpop.f32.mrf.mxu1  ;;  %v1530_v28 = vpop.f32.mrf.mxu2  ;;  %5850 = vmatmul.msk.bf16.gmra.mxu2 %vm523_vm0, %v8188_v19  ;;  %v9543_v53 = vld [vmem:[#allocation57_spill] sm:$0xff]  ;;  %v6894_v43 = vld [vmem:[#allocation4 + $0x494] sm:$0xf0] }
 0x1c5   :  { %v1509_v13 = vpop.f32.mrf.mxu0  ;;  %5848 = vmatmul.msk.bf16.gmra.mxu3 %vm523_vm0, %v8188_v19 }
 0x1c6   :  { %2366 = vmatmul.bf16.gmra.mxu0 %v8177_v9 }
 0x1c7   :  { %2434 = vmatpush.bf16.msrb.mxu0 %v7920_v47  ;;  %v9531_v47 = vld [vmem:[#allocation50_spill] sm:$0xff] }
 0x1c8   :  { %2470 = vmatpush.bf16.msra.mxu1 %v7936_v60  ;;  %v8182_v29 = vadd.f32 %v1422_v55, %v9531_v47  ;;  %v1529_v60 = vadd.f32 %v1528_v15, %v1509_v13 }
 0x1ca   :  { %9532 = vst [vmem:[#allocation38_spill] sm:$0xff] %v8182_v29  ;;  %v8194_v54 = vadd.f32 %v1529_v60, %v9536_v45  ;;  %v6840_v60 = vld [vmem:[#allocation7 + $0x2e4] sm:$0xf0] }
 0x1cb   :  { %2435 = vmatpush.bf16.msrb.mxu0 %v7939_v37  ;;  %v1490_v37 = vpop.f32.mrf.mxu3 }
 0x1cc   :  { %2471 = vmatpush.bf16.msra.mxu1 %v9534_v27  ;;  %v1491_v23 = vadd.f32 %v1490_v37, %v1471_v11  ;;  %9537 = vst [vmem:[#allocation39_spill] sm:$0xff] %v8194_v54  ;;  %v1478_v51 = vpop.f32.mrf.mxu1  ;;  %v1533_v15 = vpop.f32.mrf.mxu2 }
 0x1cd   :  { %v1511_v11 = vpop.f32.mrf.mxu0 }
 0x1ce   :  { %v8202_v22 = vadd.f32 %v1491_v23, %v9539_v59  ;;  %v1531_v31 = vadd.f32 %v1530_v28, %v1511_v11  ;;  %v6834_v59 = vld [vmem:[#allocation7 + $0x2b4] sm:$0xf0] }
 0x1cf   :  { %2436 = vmatpush.bf16.msrb.mxu0 %v9535_v36  ;;  %2399 = vmatmul.bf16.vlgmr.msrb.gmra.mxu1 %v8133_v30  ;;  %v9546_v36 = vld [vmem:[#allocation59_spill] sm:$0xff] }
 0x1d0   :  { %2472 = vmatpush.bf16.msra.mxu1 %v7969_v18  ;;  %9540 = vst [vmem:[#allocation40_spill] sm:$0xff] %v8202_v22  ;;  %v8208_v38 = vadd.f32 %v1531_v31, %v7985_v6 }
 0x1d2   :  { %9541 = vst [vmem:[#allocation36_spill] sm:$0xff] %v8208_v38  ;;  %v6023_v38 = vld [vmem:[#allocation7 + $0x328] sm:$0xf0] }
 0x1d3   :  { %2505 = vmatpush.bf16.msra.mxu0 %v9538_v42  ;;  %v1492_v10 = vpop.f32.mrf.mxu3  ;;  %v5957_v42 = vld [vmem:[#allocation7 + $0x2a0] sm:$0xf] }
 0x1d4   :  { %2473 = vmatpush.bf16.msra.mxu1 %v7979_v17  ;;  %v1493_v26 = vadd.f32 %v1492_v10, %v1473_v61  ;;  %v2045_v18 = vpop.f32.mrf.mxu1  ;;  %v1535_v58 = vpop.f32.mrf.mxu2  ;;  %v6030_v17 = vor.u32 %v6852_v34, %v6029_v33  ;;  %v6846_v61 = vld [vmem:[#allocation7 + $0x314] sm:$0xf0]  ;;  %5853 = vmatmul.msk.bf16.vlgmr.msrb.gmra.mxu2 %vm523_vm0, %v8147_v0  ;;  %v5958_v11 = vor.u32 %v6834_v59, %v5957_v42  ;;  %v5861_v42 = vld [vmem:[#allocation7 + $0x1e0] sm:$0xf] }
 0x1d5   :  { %5851 = vmatmul.msk.bf16.vlgmr.msra.gmra.mxu3 %vm523_vm0, %v8147_v0  ;;  %v6810_v59 = vld [vmem:[#allocation7 + $0x1f4] sm:$0xf0] }
 0x1d6   :  { %v8213_v55 = vadd.f32 %v1493_v26, %v9543_v53  ;;  %v6828_v53 = vld [vmem:[#allocation7 + $0x284] sm:$0xf0]  ;;  %2437 = vmatmul.bf16.vlgmr.msrb.gmra.mxu0 %v8133_v30 }
 0x1d7   :  { %2506 = vmatpush.bf16.msra.mxu0 %v7987_v57  ;;  %v1514_v57 = vpop.f32.mrf.mxu0 }
 0x1d8   :  { %2474 = vmatpush.bf16.msra.mxu1 %v7992_v39  ;;  %9544 = vst [vmem:[#allocation41_spill] sm:$0xff] %v8213_v55  ;;  %v1534_v6 = vadd.f32 %v1533_v15, %v1514_v57  ;;  %v6005_v39 = vld [vmem:[#allocation7 + $0x300] sm:$0xf] }
 0x1d9   :  { %v6006_v28 = vor.u32 %v6846_v61, %v6005_v39 }
 0x1da   :  { %v8220_v5 = vadd.f32 %v1534_v6, %v8012_v32 }
 0x1db   :  { %2507 = vmatpush.bf16.msra.mxu0 %v9542_v44  ;;  %v1495_v47 = vpop.f32.mrf.mxu3  ;;  %v5933_v44 = vld [vmem:[#allocation7 + $0x270] sm:$0xf] }
 0x1dc   :  { %2843 = vmatpush.bf16.msrb.mxu1 %v6030_v17  ;;  %v1496_v13 = vadd.f32 %v1495_v47, %v1476_v35  ;;  %9545 = vst [vmem:[#allocation35_spill] sm:$0xff] %v8220_v5  ;;  %v8225_v27 = vpop.f32.mrf.mxu1  ;;  %v2102_v35 = vpop.f32.mrf.mxu2  ;;  %v5934_v33 = vor.u32 %v6828_v53, %v5933_v44  ;;  %v6822_v17 = vld [vmem:[#allocation7 + $0x254] sm:$0xf0]  ;;  %v6861_v47 = vld [vmem:[#allocation7 + $0x394] sm:$0xf] }
 0x1dd   :  { %v6007_v44 = vld [vmem:[#allocation7 + $0x318] sm:$0xf0] }
 0x1de   :  { %v8229_v37 = vadd.f32 %v1496_v13, %v9546_v36  ;;  %v6031_v36 = vld [vmem:[#allocation7 + $0x348] sm:$0xf0] }
 0x1df   :  { %2508 = vmatpush.bf16.msra.mxu0 %v8007_v7  ;;  %v5981_v7 = vld [vmem:[#allocation7 + $0x2d0] sm:$0xf]  ;;  %v1516_v45 = vpop.f32.mrf.mxu0  ;;  %2404 = vmatmul.bf16.gmra.mxu1 %v8177_v9 }
 0x1e0   :  { %2844 = vmatpush.bf16.msrb.mxu1 %v6006_v28  ;;  %9547 = vst [vmem:[#allocation44_spill] sm:$0xff] %v8229_v37  ;;  %v5982_v23 = vor.u32 %v6840_v60, %v5981_v7  ;;  %v1536_v32 = vadd.f32 %v1535_v58, %v1516_v45  ;;  %v6079_v28 = vld [vmem:[#allocation7 + $0x3a8] sm:$0xf0]  ;;  %v6816_v7 = vld [vmem:[#allocation7 + $0x224] sm:$0xf0] }
 0x1e1   :  { %v6082_v13 = vor.u32 %v6861_v47, %v6079_v28  ;;  %v6849_v60 = vld [vmem:[#allocation7 + $0x334] sm:$0xf] }
 0x1e2   :  { %v8233_v10 = vadd.f32 %v1536_v32, %v8033_v40  ;;  %v6864_v40 = vld [vmem:[#allocation7 + $0x3a4] sm:$0xf0]  ;;  %v6034_v45 = vor.u32 %v6849_v60, %v6031_v36 }
 0x1e3   :  { %2509 = vmatpush.bf16.msra.mxu0 %v8021_v3  ;;  %v1497_v15 = vpop.f32.mrf.mxu3  ;;  %2906 = vmatpush.bf16.msrb.mxu2 %v6082_v13  ;;  %v6831_v13 = vld [vmem:[#allocation7 + $0x2a4] sm:$0xf]  ;;  %v6013_v60 = vld [vmem:[#allocation7 + $0x308] sm:$0xf] }
 0x1e4   :  { %2845 = vmatpush.bf16.msrb.mxu1 %v5982_v23  ;;  %v1498_v31 = vadd.f32 %v1497_v15, %v1478_v51  ;;  %9548 = vst [vmem:[#allocation43_spill] sm:$0xff] %v8233_v10  ;;  %v8235_v3 = vpop.f32.mrf.mxu1  ;;  %v6077_v51 = vld [vmem:[#allocation7 + $0x390] sm:$0xf]  ;;  %5854 = vmatmul.msk.bf16.gmra.mxu2 %vm523_vm0, %v8188_v19  ;;  %v6843_v15 = vld [vmem:[#allocation7 + $0x304] sm:$0xf] }
 0x1e5   :  { %v6078_v58 = vor.u32 %v6864_v40, %v6077_v51  ;;  %v6837_v40 = vld [vmem:[#allocation7 + $0x2d4] sm:$0xf]  ;;  %5852 = vmatmul.msk.bf16.gmra.mxu3 %vm523_vm0, %v8188_v19  ;;  %v6836_v10 = vld [vmem:[#allocation7 + $0x2c4] sm:$0xf0] }
 0x1e6   :  { %v8239_v26 = vadd.f32 %v1498_v31, %v8031_v49  ;;  %v5909_v49 = vld [vmem:[#allocation7 + $0x240] sm:$0xf]  ;;  %v5862_v31 = vor.u32 %v6810_v59, %v5861_v42  ;;  %2442 = vmatmul.bf16.gmra.mxu0 %v8177_v9  ;;  %v6855_v59 = vld [vmem:[#allocation7 + $0x364] sm:$0xf] }
 0x1e7   :  { %2510 = vmatpush.bf16.msra.mxu0 %v8028_v52  ;;  %v2104_v52 = vpop.f32.mrf.mxu2  ;;  %v2083_v34 = vpop.f32.mrf.mxu0  ;;  %2868 = vmatpush.bf16.msra.mxu3 %v6078_v58  ;;  %v5910_v6 = vor.u32 %v6822_v17, %v5909_v49  ;;  %v6037_v58 = vld [vmem:[#allocation7 + $0x338] sm:$0xf]  ;;  %v6853_v17 = vld [vmem:[#allocation7 + $0x34c] sm:$0xf0] }
 0x1e8   :  { %2846 = vmatpush.bf16.msrb.mxu1 %v5958_v11  ;;  %9549 = vst [vmem:[#allocation37_spill] sm:$0xff] %v8239_v26 }
 0x1eb   :  { %2511 = vmatpush.bf16.msra.mxu0 %v8038_v16  ;;  %v8245_v16 = vadd.f32 %v2102_v35, %v2083_v34  ;;  %v2064_v57 = vpop.f32.mrf.mxu3  ;;  %v5983_v34 = vld [vmem:[#allocation7 + $0x2e8] sm:$0xf0] }
 0x1ec   :  { %2847 = vmatpush.bf16.msrb.mxu1 %v5934_v33  ;;  %v8247_v39 = vadd.f32 %v2064_v57, %v2045_v18  ;;  %v8252_v61 = vpop.f32.mrf.mxu1  ;;  %v6010_v33 = vor.u32 %v6843_v15, %v6007_v44  ;;  %v6053_v57 = vld [vmem:[#allocation7 + $0x360] sm:$0xf]  ;;  %v6055_v15 = vld [vmem:[#allocation7 + $0x378] sm:$0xf0]  ;;  %v5935_v44 = vld [vmem:[#allocation7 + $0x288] sm:$0xf0] }
 0x1ef   :  { %2512 = vmatpush.bf16.msra.mxu0 %v8046_v25  ;;  %v5885_v25 = vld [vmem:[#allocation7 + $0x210] sm:$0xf]  ;;  %v2107_v23 = vpop.f32.mrf.mxu2  ;;  %v2085_v18 = vpop.f32.mrf.mxu0  ;;  %2475 = vmatmul.bf16.vlgmr.msra.gmra.mxu1 %v8133_v30 }
 0x1f0   :  { %2848 = vmatpush.bf16.msrb.mxu1 %v5910_v6  ;;  %v5886_v35 = vor.u32 %v6816_v7, %v5885_v25  ;;  %v8254_v32 = vadd.f32 %v2104_v52, %v2085_v18  ;;  %v5986_v52 = vor.u32 %v6837_v40, %v5983_v34  ;;  %v6858_v6 = vld [vmem:[#allocation7 + $0x374] sm:$0xf0]  ;;  %v5959_v7 = vld [vmem:[#allocation7 + $0x2b8] sm:$0xf0]  ;;  %v6841_v40 = vld [vmem:[#allocation7 + $0x2ec] sm:$0xf0] }
 0x1f1   :  { %v6054_v28 = vor.u32 %v6858_v6, %v6053_v57  ;;  %v6819_v57 = vld [vmem:[#allocation7 + $0x244] sm:$0xf]  ;;  %v5911_v6 = vld [vmem:[#allocation7 + $0x258] sm:$0xf0] }
 0x1f3   :  { %2881 = vmatpush.bf16.msrb.mxu0 %v6034_v45  ;;  %v2066_v11 = vpop.f32.mrf.mxu3  ;;  %2869 = vmatpush.bf16.msra.mxu3 %v6054_v28  ;;  %v6847_v45 = vld [vmem:[#allocation7 + $0x31c] sm:$0xf0]  ;;  %v5914_v28 = vor.u32 %v6819_v57, %v5911_v6 }
 0x1f4   :  { %2849 = vmatpush.bf16.msrb.mxu1 %v5886_v35  ;;  %v8257_v53 = vadd.f32 %v2066_v11, %v8225_v27  ;;  %v8259_v51 = vpop.f32.mrf.mxu1  ;;  %v6038_v27 = vor.u32 %v6853_v17, %v6037_v58  ;;  %v5962_v35 = vor.u32 %v6831_v13, %v5959_v7  ;;  %5857 = vmatmul.msk.bf16.vlgmr.msra.gmra.mxu2 %vm523_vm0, %v8147_v0  ;;  %v6825_v11 = vld [vmem:[#allocation7 + $0x274] sm:$0xf]  ;;  %v6835_v13 = vld [vmem:[#allocation7 + $0x2bc] sm:$0xf0] }
 0x1f5   :  { %v6014_v42 = vor.u32 %v6847_v45, %v6013_v60  ;;  %v5887_v45 = vld [vmem:[#allocation7 + $0x228] sm:$0xf0]  ;;  %5855 = vmatmul.msk.bf16.vlgmr.msrb.gmra.mxu3 %vm523_vm0, %v8147_v0 }
 0x1f6   :  { %2513 = vmatmul.bf16.vlgmr.msra.gmra.mxu0 %v8133_v30 }
 0x1f7   :  { %2882 = vmatpush.bf16.msrb.mxu0 %v6010_v33  ;;  %v2109_v49 = vpop.f32.mrf.mxu2  ;;  %v2088_v47 = vpop.f32.mrf.mxu0  ;;  %v5989_v33 = vld [vmem:[#allocation7 + $0x2d8] sm:$0xf] }
 0x1f8   :  { %2850 = vmatpush.bf16.msrb.mxu1 %v5862_v31  ;;  %v8264_v25 = vadd.f32 %v2107_v23, %v2088_v47  ;;  %v6058_v31 = vor.u32 %v6855_v59, %v6055_v15  ;;  %v5990_v58 = vor.u32 %v6841_v40, %v5989_v33  ;;  %v6829_v15 = vld [vmem:[#allocation7 + $0x28c] sm:$0xf0] }
 0x1fa   :  { %2907 = vmatpush.bf16.msrb.mxu2 %v6058_v31  ;;  %v6865_v31 = vld [vmem:[#allocation7 + $0x3ac] sm:$0xf0] }
 0x1fb   :  { %2883 = vmatpush.bf16.msrb.mxu0 %v5986_v52  ;;  %v2069_v36 = vpop.f32.mrf.mxu3 }
 0x1fc   :  { %2919 = vmatpush.bf16.msra.mxu1 %v6038_v27  ;;  %v8267_v18 = vadd.f32 %v2069_v36, %v8235_v3  ;;  %v8272_v23 = vpop.f32.mrf.mxu1  ;;  %v5938_v3 = vor.u32 %v6825_v11, %v5935_v44  ;;  %v5965_v27 = vld [vmem:[#allocation7 + $0x2a8] sm:$0xf]  ;;  %v6085_v11 = vld [vmem:[#allocation7 + $0x398] sm:$0xf] }
 0x1fd   :  { %v5966_v60 = vor.u32 %v6835_v13, %v5965_v27  ;;  %v6086_v33 = vor.u32 %v6865_v31, %v6085_v11  ;;  %v6823_v27 = vld [vmem:[#allocation7 + $0x25c] sm:$0xf0]  ;;  %v6862_v13 = vld [vmem:[#allocation7 + $0x39c] sm:$0xf] }
 0x1ff   :  { %2884 = vmatpush.bf16.msrb.mxu0 %v5962_v35  ;;  %v2178_v34 = vpop.f32.mrf.mxu2  ;;  %v2090_v52 = vpop.f32.mrf.mxu0  ;;  %v6813_v35 = vld [vmem:[#allocation7 + $0x214] sm:$0xf]  ;;  %2480 = vmatmul.bf16.gmra.mxu1 %v8177_v9 }
 0x200   :  { %2920 = vmatpush.bf16.msra.mxu1 %v6014_v42  ;;  %v8274_v17 = vadd.f32 %v2109_v49, %v2090_v52  ;;  %v5941_v49 = vld [vmem:[#allocation7 + $0x278] sm:$0xf]  ;;  %v5890_v59 = vor.u32 %v6813_v35, %v5887_v45  ;;  %v5917_v52 = vld [vmem:[#allocation7 + $0x248] sm:$0xf]  ;;  %2944 = vmatpush.bf16.msrb.mxu3 %v6086_v33 }
 0x201   :  { %v5893_v35 = vld [vmem:[#allocation7 + $0x218] sm:$0xf]  ;;  %v5869_v33 = vld [vmem:[#allocation7 + $0x1e8] sm:$0xf] }
 0x203   :  { %2885 = vmatpush.bf16.msrb.mxu0 %v5938_v3  ;;  %v2071_v47 = vpop.f32.mrf.mxu3  ;;  %v6807_v3 = vld [vmem:[#allocation7 + $0x1e4] sm:$0xf] }
 0x204   :  { %2921 = vmatpush.bf16.msra.mxu1 %v5990_v58  ;;  %v8277_v7 = vadd.f32 %v2071_v47, %v8252_v61  ;;  %v8279_v36 = vpop.f32.mrf.mxu1  ;;  %v5942_v61 = vor.u32 %v6829_v15, %v5941_v49  ;;  %v5863_v58 = vld [vmem:[#allocation7 + $0x1f8] sm:$0xf0]  ;;  %5858 = vmatmul.msk.bf16.gmra.mxu2 %vm523_vm0, %v8188_v19  ;;  %v6817_v49 = vld [vmem:[#allocation7 + $0x22c] sm:$0xf0]  ;;  %v6039_v15 = vld [vmem:[#allocation7 + $0x350] sm:$0xf0] }
 0x205   :  { %v5866_v6 = vor.u32 %v6807_v3, %v5863_v58  ;;  %v6811_v3 = vld [vmem:[#allocation7 + $0x1fc] sm:$0xf0]  ;;  %v6844_v58 = vld [vmem:[#allocation7 + $0x30c] sm:$0xf]  ;;  %5856 = vmatmul.msk.bf16.gmra.mxu3 %vm523_vm0, %v8188_v19 }
 0x206   :  { %2518 = vmatmul.bf16.gmra.mxu0 %v8177_v9 }
 0x207   :  { %2886 = vmatpush.bf16.msrb.mxu0 %v5914_v28  ;;  %v2180_v42 = vpop.f32.mrf.mxu2  ;;  %v2159_v44 = vpop.f32.mrf.mxu0  ;;  %v5918_v28 = vor.u32 %v6823_v27, %v5917_v52 }
 0x208   :  { %2922 = vmatpush.bf16.msra.mxu1 %v5966_v60  ;;  %v8284_v40 = vadd.f32 %v2178_v34, %v2159_v44  ;;  %v6087_v60 = vld [vmem:[#allocation7 + $0x3b0] sm:$0xf0] }
 0x209   :  { %v6090_v45 = vor.u32 %v6862_v13, %v6087_v60  ;;  %v6838_v60 = vld [vmem:[#allocation7 + $0x2dc] sm:$0xf] }
 0x20b   :  { %2887 = vmatpush.bf16.msrb.mxu0 %v5890_v59  ;;  %v2140_v57 = vpop.f32.mrf.mxu3  ;;  %v6850_v59 = vld [vmem:[#allocation7 + $0x33c] sm:$0xf]  ;;  %2982 = vmatpush.bf16.msra.mxu2 %v6090_v45  ;;  %v6045_v45 = vld [vmem:[#allocation7 + $0x340] sm:$0xf] }
 0x20c   :  { %2923 = vmatpush.bf16.msra.mxu1 %v5942_v61  ;;  %v8287_v47 = vadd.f32 %v2140_v57, %v8259_v51  ;;  %v8292_v34 = vpop.f32.mrf.mxu1  ;;  %v5894_v51 = vor.u32 %v6817_v49, %v5893_v35  ;;  %v6042_v31 = vor.u32 %v6850_v59, %v6039_v15  ;;  %v5870_v57 = vor.u32 %v6811_v3, %v5869_v33  ;;  %v5991_v35 = vld [vmem:[#allocation7 + $0x2f0] sm:$0xf0]  ;;  %v6854_v59 = vld [vmem:[#allocation7 + $0x354] sm:$0xf0]  ;;  %v6061_v15 = vld [vmem:[#allocation7 + $0x368] sm:$0xf] }
 0x20d   :  { %v5994_v49 = vor.u32 %v6838_v60, %v5991_v35  ;;  %v6832_v3 = vld [vmem:[#allocation7 + $0x2ac] sm:$0xf] }
 0x20f   :  { %2888 = vmatpush.bf16.msrb.mxu0 %v5866_v6  ;;  %v2183_v11 = vpop.f32.mrf.mxu2  ;;  %v2161_v61 = vpop.f32.mrf.mxu0  ;;  %v6015_v6 = vld [vmem:[#allocation7 + $0x320] sm:$0xf0]  ;;  %2851 = vmatmul.bf16.vlgmr.msrb.gmra.mxu1 %v8133_v30 }
 0x210   :  { %2924 = vmatpush.bf16.msra.mxu1 %v5918_v28  ;;  %v8294_v44 = vadd.f32 %v2180_v42, %v2161_v61  ;;  %v6018_v28 = vor.u32 %v6844_v58, %v6015_v6  ;;  %v5967_v58 = vld [vmem:[#allocation7 + $0x2c0] sm:$0xf0] }
 0x211   :  { %v5970_v6 = vor.u32 %v6832_v3, %v5967_v58 }
 0x213   :  { %2957 = vmatpush.bf16.msra.mxu0 %v6042_v31  ;;  %v2142_v52 = vpop.f32.mrf.mxu3 }
 0x214   :  { %2925 = vmatpush.bf16.msra.mxu1 %v5894_v51  ;;  %v8297_v27 = vadd.f32 %v2142_v52, %v8272_v23  ;;  %v8299_v13 = vpop.f32.mrf.mxu1  ;;  %v6859_v51 = vld [vmem:[#allocation7 + $0x37c] sm:$0xf0]  ;;  %v6046_v23 = vor.u32 %v6854_v59, %v6045_v45  ;;  %v6021_v52 = vld [vmem:[#allocation7 + $0x310] sm:$0xf]  ;;  %6101 = vmatmul.msk.bf16.vlgmr.msrb.gmra.mxu2 %vm523_vm0, %v8147_v0  ;;  %v6856_v45 = vld [vmem:[#allocation7 + $0x36c] sm:$0xf] }
 0x215   :  { %v6062_v61 = vor.u32 %v6859_v51, %v6061_v15  ;;  %v6826_v59 = vld [vmem:[#allocation7 + $0x27c] sm:$0xf]  ;;  %6099 = vmatmul.msk.bf16.vlgmr.msra.gmra.mxu3 %vm523_vm0, %v8147_v0 }
 0x216   :  { %2889 = vmatmul.bf16.vlgmr.msrb.gmra.mxu0 %v8133_v30 }
 0x217   :  { %2958 = vmatpush.bf16.msra.mxu0 %v6018_v28  ;;  %v2185_v42 = vpop.f32.mrf.mxu2  ;;  %v2164_v31 = vpop.f32.mrf.mxu0  ;;  %2945 = vmatpush.bf16.msrb.mxu3 %v6062_v61  ;;  %v6848_v28 = vld [vmem:[#allocation7 + $0x324] sm:$0xf0]  ;;  %v6842_v61 = vld [vmem:[#allocation7 + $0x2f4] sm:$0xf0] }
 0x218   :  { %2926 = vmatpush.bf16.msra.mxu1 %v5870_v57  ;;  %v8304_v33 = vadd.f32 %v2183_v11, %v2164_v31  ;;  %v6022_v35 = vor.u32 %v6848_v28, %v6021_v52  ;;  %v5997_v31 = vld [vmem:[#allocation7 + $0x2e0] sm:$0xf]  ;;  %v6820_v52 = vld [vmem:[#allocation7 + $0x24c] sm:$0xf]  ;;  %v5919_v28 = vld [vmem:[#allocation7 + $0x260] sm:$0xf0] }
 0x219   :  { %v5998_v3 = vor.u32 %v6842_v61, %v5997_v31  ;;  %v5922_v26 = vor.u32 %v6820_v52, %v5919_v28  ;;  %v6830_v61 = vld [vmem:[#allocation7 + $0x294] sm:$0xf0]  ;;  %v5871_v28 = vld [vmem:[#allocation7 + $0x200] sm:$0xf0] }
 0x21b   :  { %2959 = vmatpush.bf16.msra.mxu0 %v5994_v49  ;;  %v2145_v57 = vpop.f32.mrf.mxu3  ;;  %v6063_v49 = vld [vmem:[#allocation7 + $0x380] sm:$0xf0] }
 0x21c   :  { %2995 = vmatpush.bf16.msrb.mxu1 %v6046_v23  ;;  %v8307_v60 = vadd.f32 %v2145_v57, %v8279_v36  ;;  %v8312_v11 = vpop.f32.mrf.mxu1  ;;  %v6066_v51 = vor.u32 %v6856_v45, %v6063_v49  ;;  %v5943_v23 = vld [vmem:[#allocation7 + $0x290] sm:$0xf0] }
 0x21d   :  { %v5946_v36 = vor.u32 %v6826_v59, %v5943_v23  ;;  %v6814_v59 = vld [vmem:[#allocation7 + $0x21c] sm:$0xf] }
 0x21e   :  { %2983 = vmatpush.bf16.msra.mxu2 %v6066_v51  ;;  %v5895_v51 = vld [vmem:[#allocation7 + $0x230] sm:$0xf0] }
 0x21f   :  { %2960 = vmatpush.bf16.msra.mxu0 %v5970_v6  ;;  %v2254_v15 = vpop.f32.mrf.mxu2  ;;  %v2166_v58 = vpop.f32.mrf.mxu0  ;;  %v5973_v6 = vld [vmem:[#allocation7 + $0x2b0] sm:$0xf]  ;;  %v5898_v31 = vor.u32 %v6814_v59, %v5895_v51  ;;  %2856 = vmatmul.bf16.gmra.mxu1 %v8177_v9  ;;  %v6824_v59 = vld [vmem:[#allocation7 + $0x264] sm:$0xf0] }
 0x220   :  { %2996 = vmatpush.bf16.msrb.mxu1 %v6022_v35  ;;  %v8314_v57 = vadd.f32 %v2185_v42, %v2166_v58  ;;  %v5974_v45 = vor.u32 %v6836_v10, %v5973_v6  ;;  %v5949_v42 = vld [vmem:[#allocation7 + $0x280] sm:$0xf]  ;;  %v5925_v6 = vld [vmem:[#allocation7 + $0x250] sm:$0xf] }
 0x223   :  { %2961 = vmatpush.bf16.msra.mxu0 %v5946_v36  ;;  %v2147_v35 = vpop.f32.mrf.mxu3  ;;  %v6093_v36 = vld [vmem:[#allocation7 + $0x3a0] sm:$0xf] }
 0x224   :  { %2997 = vmatpush.bf16.msrb.mxu1 %v5998_v3  ;;  %v8317_v37 = vadd.f32 %v2147_v35, %v8292_v34  ;;  %v8319_v49 = vpop.f32.mrf.mxu1  ;;  %v6866_v3 = vld [vmem:[#allocation7 + $0x3b4] sm:$0xf0]  ;;  %v5950_v34 = vor.u32 %v6830_v61, %v5949_v42  ;;  %6102 = vmatmul.msk.bf16.gmra.mxu2 %vm523_vm0, %v8188_v19  ;;  %v5926_v42 = vor.u32 %v6824_v59, %v5925_v6  ;;  %v6095_v61 = vld [vmem:[#allocation7 + $0x3b8] sm:$0xf0]  ;;  %v5877_v6 = vld [vmem:[#allocation7 + $0x1f0] sm:$0xf] }
 0x225   :  { %v6094_v10 = vor.u32 %v6866_v3, %v6093_v36  ;;  %v5901_v36 = vld [vmem:[#allocation7 + $0x220] sm:$0xf]  ;;  %v6812_v59 = vld [vmem:[#allocation7 + $0x204] sm:$0xf0]  ;;  %6100 = vmatmul.msk.bf16.gmra.mxu3 %vm523_vm0, %v8188_v19 }
 0x226   :  { %v5878_v55 = vor.u32 %v6812_v59, %v5877_v6  ;;  %v5975_v59 = vld [vmem:[#allocation7 + $0x2c8] sm:$0xf0]  ;;  %2894 = vmatmul.bf16.gmra.mxu0 %v8177_v9 }
 0x227   :  { %2962 = vmatpush.bf16.msra.mxu0 %v5922_v26  ;;  %v2256_v23 = vpop.f32.mrf.mxu2  ;;  %v2235_v58 = vpop.f32.mrf.mxu0  ;;  %v6808_v26 = vld [vmem:[#allocation7 + $0x1ec] sm:$0xf]  ;;  %3020 = vmatpush.bf16.msra.mxu3 %v6094_v10  ;;  %v6851_v10 = vld [vmem:[#allocation7 + $0x344] sm:$0xf] }
 0x228   :  { %2998 = vmatpush.bf16.msrb.mxu1 %v5974_v45  ;;  %v8324_v52 = vadd.f32 %v2254_v15, %v2235_v58  ;;  %v5874_v45 = vor.u32 %v6808_v26, %v5871_v28  ;;  %v6818_v58 = vld [vmem:[#allocation7 + $0x234] sm:$0xf0]  ;;  %v6047_v26 = vld [vmem:[#allocation7 + $0x358] sm:$0xf0] }
 0x229   :  { %v6050_v28 = vor.u32 %v6851_v10, %v6047_v26 }
 0x22b   :  { %2963 = vmatpush.bf16.msra.mxu0 %v5898_v31  ;;  %v2216_v35 = vpop.f32.mrf.mxu3  ;;  %v6863_v31 = vld [vmem:[#allocation7 + $0x3a4] sm:$0xf] }
 0x22c   :  { %2999 = vmatpush.bf16.msrb.mxu1 %v5950_v34  ;;  %v8327_v51 = vadd.f32 %v2216_v35, %v8299_v13  ;;  %v8332_v15 = vpop.f32.mrf.mxu1  ;;  %v6098_v34 = vor.u32 %v6863_v31, %v6095_v61  ;;  %v5902_v13 = vor.u32 %v6818_v58, %v5901_v36  ;;  %v6281_v58 = vld [vmem:[#allocation4 + $0x510] sm:$0xf] }
 0x22e   :  { %3058 = vmatpush.bf16.msrb.mxu2 %v6098_v34  ;;  %v5999_v34 = vld [vmem:[#allocation7 + $0x2f8] sm:$0xf0] }
 0x22f   :  { %2964 = vmatpush.bf16.msra.mxu0 %v5874_v45  ;;  %v2259_v3 = vpop.f32.mrf.mxu2  ;;  %v2237_v35 = vpop.f32.mrf.mxu0  ;;  %v6845_v45 = vld [vmem:[#allocation7 + $0x314] sm:$0xf]  ;;  %2927 = vmatmul.bf16.vlgmr.msra.gmra.mxu1 %v8133_v30 }
 0x230   :  { %3000 = vmatpush.bf16.msrb.mxu1 %v5926_v42  ;;  %v8334_v5 = vadd.f32 %v2256_v23, %v2237_v35  ;;  %v6026_v31 = vor.u32 %v6845_v45, %v6023_v38  ;;  %v6839_v23 = vld [vmem:[#allocation7 + $0x2e4] sm:$0xf]  ;;  %v6257_v45 = vld [vmem:[#allocation4 + $0x4e0] sm:$0xf] }
 0x231   :  { %v6002_v26 = vor.u32 %v6839_v23, %v5999_v34 }
 0x233   :  { %3033 = vmatpush.bf16.msrb.mxu0 %v6050_v28  ;;  %v2218_v42 = vpop.f32.mrf.mxu3  ;;  %v6860_v28 = vld [vmem:[#allocation7 + $0x384] sm:$0xf0] }
 0x234   :  { %3001 = vmatpush.bf16.msrb.mxu1 %v5902_v13  ;;  %v8337_v22 = vadd.f32 %v2218_v42, %v8312_v11  ;;  %v2324_v61 = vpop.f32.mrf.mxu1  ;;  %v6912_v13 = vld [vmem:[#allocation4 + $0x524] sm:$0xf0]  ;;  %v6069_v11 = vld [vmem:[#allocation7 + $0x370] sm:$0xf]  ;;  %6105 = vmatmul.msk.bf16.vlgmr.msra.gmra.mxu2 %vm523_vm0, %v8147_v0 }
 0x235   :  { %v8340_v36 = vadd.f32 %v2324_v61, %v8247_v39  ;;  %v8345_v38 = vor.u32 %v6912_v13, %v6281_v58  ;;  %v6070_v39 = vor.u32 %v6860_v28, %v6069_v11  ;;  %v6906_v61 = vld [vmem:[#allocation4 + $0x4f4] sm:$0xf0]  ;;  %v6071_v13 = vld [vmem:[#allocation7 + $0x388] sm:$0xf0]  ;;  %v6827_v11 = vld [vmem:[#allocation7 + $0x284] sm:$0xf]  ;;  %6103 = vmatmul.msk.bf16.vlgmr.msrb.gmra.mxu3 %vm523_vm0, %v8147_v0 }
 0x236   :  { %2965 = vmatmul.bf16.vlgmr.msra.gmra.mxu0 %v8133_v30 }
 0x237   :  { %3034 = vmatpush.bf16.msrb.mxu0 %v6026_v31  ;;  %v2261_v10 = vpop.f32.mrf.mxu2  ;;  %v2240_v35 = vpop.f32.mrf.mxu0  ;;  %3021 = vmatpush.bf16.msra.mxu3 %v6070_v39  ;;  %v6233_v39 = vld [vmem:[#allocation4 + $0x4b0] sm:$0xf] }
 0x238   :  { %3002 = vmatpush.bf16.msrb.mxu1 %v5878_v55  ;;  %v8347_v6 = vadd.f32 %v2259_v3, %v2240_v35  ;;  %v6833_v55 = vld [vmem:[#allocation7 + $0x2b4] sm:$0xf]  ;;  %v8356_v3 = vor.u32 %v6906_v61, %v6257_v45  ;;  %v5951_v35 = vld [vmem:[#allocation7 + $0x298] sm:$0xf0] }
 0x239   :  { %v5978_v31 = vor.u32 %v6833_v55, %v5975_v59  ;;  %v6900_v55 = vld [vmem:[#allocation4 + $0x4c4] sm:$0xf0]  ;;  %v5954_v59 = vor.u32 %v6827_v11, %v5951_v35 }
 0x23b   :  { %3035 = vmatpush.bf16.msrb.mxu0 %v6002_v26  ;;  %v2221_v42 = vpop.f32.mrf.mxu3  ;;  %v6857_v26 = vld [vmem:[#allocation7 + $0x374] sm:$0xf] }
 0x23c   :  { %3564 = vmatpush.bf16.msra.mxu1 %v8345_v38  ;;  %v8351_v23 = vadd.f32 %v2221_v42, %v8319_v49  ;;  %v2326_v34 = vpop.f32.mrf.mxu1  ;;  %v6074_v49 = vor.u32 %v6857_v26, %v6071_v13  ;;  %v8362_v42 = vor.u32 %v6900_v55, %v6233_v39  ;;  %v6185_v39 = vld [vmem:[#allocation4 + $0x450] sm:$0xf] }
 0x23d   :  { %v8359_v58 = vadd.f32 %v2326_v34, %v8257_v53  ;;  %v6821_v53 = vld [vmem:[#allocation7 + $0x254] sm:$0xf]  ;;  %v6209_v34 = vld [vmem:[#allocation4 + $0x480] sm:$0xf] }
 0x23e   :  { %3059 = vmatpush.bf16.msrb.mxu2 %v6074_v49  ;;  %v8370_v13 = vor.u32 %v6894_v43, %v6209_v34  ;;  %v5903_v49 = vld [vmem:[#allocation7 + $0x238] sm:$0xf0]  ;;  %v6329_v43 = vld [vmem:[#allocation4 + $0x570] sm:$0xf]  ;;  %v5879_v34 = vld [vmem:[#allocation7 + $0x208] sm:$0xf0] }
 0x23f   :  { %3036 = vmatpush.bf16.msrb.mxu0 %v5978_v31  ;;  %v2381_v28 = vpop.f32.mrf.mxu2  ;;  %v2242_v45 = vpop.f32.mrf.mxu0  ;;  %v5927_v31 = vld [vmem:[#allocation7 + $0x268] sm:$0xf0]  ;;  %2932 = vmatmul.bf16.gmra.mxu1 %v8177_v9 }
 0x240   :  { %3565 = vmatpush.bf16.msra.mxu1 %v8356_v3  ;;  %v8364_v61 = vadd.f32 %v2261_v10, %v2242_v45  ;;  %v5930_v29 = vor.u32 %v6821_v53, %v5927_v31  ;;  %v6815_v10 = vld [vmem:[#allocation7 + $0x224] sm:$0xf]  ;;  %v6888_v45 = vld [vmem:[#allocation4 + $0x464] sm:$0xf0]  ;;  %v6809_v31 = vld [vmem:[#allocation7 + $0x1f4] sm:$0xf] }
 0x243   :  { %3037 = vmatpush.bf16.msrb.mxu0 %v5954_v59  ;;  %v2223_v54 = vpop.f32.mrf.mxu3  ;;  %v5906_v59 = vor.u32 %v6815_v10, %v5903_v49  ;;  %v5882_v49 = vor.u32 %v6809_v31, %v5879_v34  ;;  %v6909_v31 = vld [vmem:[#allocation4 + $0x514] sm:$0xf]  ;;  %v6283_v34 = vld [vmem:[#allocation4 + $0x528] sm:$0xf0] }
 0x244   :  { %3566 = vmatpush.bf16.msra.mxu1 %v8362_v42  ;;  %v8368_v26 = vadd.f32 %v2223_v54, %v8332_v15  ;;  %v2329_v11 = vpop.f32.mrf.mxu1  ;;  %v6924_v54 = vld [vmem:[#allocation4 + $0x584] sm:$0xf0]  ;;  %v8379_v15 = vor.u32 %v6888_v45, %v6185_v39  ;;  %6106 = vmatmul.msk.bf16.gmra.mxu2 %vm523_vm0, %v8188_v19 }
 0x245   :  { %v8373_v35 = vadd.f32 %v2329_v11, %v8267_v18  ;;  %v8381_v53 = vor.u32 %v6924_v54, %v6329_v43  ;;  %v6161_v11 = vld [vmem:[#allocation4 + $0x420] sm:$0xf]  ;;  %v6921_v43 = vld [vmem:[#allocation4 + $0x574] sm:$0xf]  ;;  %v6331_v54 = vld [vmem:[#allocation4 + $0x588] sm:$0xf0]  ;;  %6104 = vmatmul.msk.bf16.gmra.mxu3 %vm523_vm0, %v8188_v19 }
 0x246   :  { %2970 = vmatmul.bf16.gmra.mxu0 %v8177_v9 }
 0x247   :  { %3038 = vmatpush.bf16.msrb.mxu0 %v5930_v29  ;;  %v2383_v55 = vpop.f32.mrf.mxu2  ;;  %v2362_v18 = vpop.f32.mrf.mxu0  ;;  %3589 = vmatpush.bf16.msrb.mxu3 %v8381_v53 }
 0x248   :  { %3567 = vmatpush.bf16.msra.mxu1 %v8370_v13  ;;  %v2363_v29 = vadd.f32 %v2362_v18, %v8245_v16  ;;  %v8394_v16 = vor.u32 %v6882_v62, %v6161_v11  ;;  %v8404_v62 = vor.u32 %v6909_v31, %v6283_v34 }
 0x24a   :  { %v8389_v39 = vadd.f32 %v2381_v28, %v2363_v29  ;;  %v8400_v28 = vor.u32 %v6921_v43, %v6331_v54  ;;  %v6876_v29 = vld [vmem:[#allocation4 + $0x404] sm:$0xf0]  ;;  %v6903_v43 = vld [vmem:[#allocation4 + $0x4e4] sm:$0xf] }
 0x24b   :  { %3039 = vmatpush.bf16.msrb.mxu0 %v5906_v59  ;;  %v2343_v10 = vpop.f32.mrf.mxu3  ;;  %v8417_v31 = vor.u32 %v6903_v43, %v6259_v21  ;;  %v6305_v21 = vld [vmem:[#allocation4 + $0x540] sm:$0xf] }
 0x24c   :  { %3568 = vmatpush.bf16.msra.mxu1 %v8379_v15  ;;  %v8387_v24 = vadd.f32 %v2343_v10, %v8340_v36  ;;  %v2331_v59 = vpop.f32.mrf.mxu1  ;;  %v6137_v36 = vld [vmem:[#allocation4 + $0x3f0] sm:$0xf]  ;;  %3627 = vmatpush.bf16.msra.mxu2 %v8400_v28 }
 0x24d   :  { %v8397_v45 = vadd.f32 %v2331_v59, %v8277_v7  ;;  %v8402_v10 = vor.u32 %v6876_v29, %v6137_v36  ;;  %v6870_v59 = vld [vmem:[#allocation4 + $0x3d4] sm:$0xf0] }
 0x24f   :  { %3040 = vmatpush.bf16.msrb.mxu0 %v5882_v49  ;;  %v2386_v18 = vpop.f32.mrf.mxu2  ;;  %v2364_v11 = vpop.f32.mrf.mxu0  ;;  %v6113_v49 = vld [vmem:[#allocation4 + $0x3c0] sm:$0xf]  ;;  %3003 = vmatmul.bf16.vlgmr.msrb.gmra.mxu1 %v8133_v30 }
 0x250   :  { %3569 = vmatpush.bf16.msra.mxu1 %v8394_v16  ;;  %v2365_v7 = vadd.f32 %v2364_v11, %v8254_v32  ;;  %v8410_v56 = vor.u32 %v6870_v59, %v6113_v49  ;;  %v6897_v11 = vld [vmem:[#allocation4 + $0x4b4] sm:$0xf]  ;;  %v6289_v49 = vld [vmem:[#allocation4 + $0x518] sm:$0xf] }
 0x251   :  { %v8424_v20 = vor.u32 %v6897_v11, %v6235_v48  ;;  %v6891_v48 = vld [vmem:[#allocation4 + $0x484] sm:$0xf]  ;;  %v6265_v11 = vld [vmem:[#allocation4 + $0x4e8] sm:$0xf] }
 0x252   :  { %v8415_v29 = vadd.f32 %v2383_v55, %v2365_v7  ;;  %v6918_v55 = vld [vmem:[#allocation4 + $0x554] sm:$0xf0] }
 0x253   :  { %3602 = vmatpush.bf16.msra.mxu0 %v8404_v62  ;;  %v2345_v54 = vpop.f32.mrf.mxu3  ;;  %v8431_v43 = vor.u32 %v6918_v55, %v6305_v21 }
 0x254   :  { %3570 = vmatpush.bf16.msra.mxu1 %v8402_v10  ;;  %v8413_v36 = vadd.f32 %v2345_v54, %v8359_v58  ;;  %v2400_v34 = vpop.f32.mrf.mxu1  ;;  %v6913_v58 = vld [vmem:[#allocation4 + $0x52c] sm:$0xf0]  ;;  %6109 = vmatmul.msk.bf16.vlgmr.msrb.gmra.mxu2 %vm523_vm0, %v8147_v0 }
 0x255   :  { %v8420_v32 = vadd.f32 %v2400_v34, %v8287_v47  ;;  %v8429_v47 = vor.u32 %v6913_v58, %v6289_v49  ;;  %v6211_v34 = vld [vmem:[#allocation4 + $0x498] sm:$0xf0]  ;;  %3590 = vmatpush.bf16.msrb.mxu3 %v8431_v43 }
 0x256   :  { %v8437_v8 = vor.u32 %v6891_v48, %v6211_v34  ;;  %v6187_v48 = vld [vmem:[#allocation4 + $0x468] sm:$0xf0]  ;;  %v6241_v34 = vld [vmem:[#allocation4 + $0x4b8] sm:$0xf]  ;;  %6107 = vmatmul.msk.bf16.vlgmr.msra.gmra.mxu3 %vm523_vm0, %v8147_v0  ;;  %3041 = vmatmul.bf16.vlgmr.msrb.gmra.mxu0 %v8133_v30  ;;  %v6877_v30 = vld [vmem:[#allocation4 + $0x40c] sm:$0xf0] }
 0x257   :  { %3603 = vmatpush.bf16.msra.mxu0 %v8417_v31  ;;  %v2388_v59 = vpop.f32.mrf.mxu2  ;;  %v2367_v7 = vpop.f32.mrf.mxu0 }
 0x258   :  { %3571 = vmatpush.bf16.msra.mxu1 %v8410_v56  ;;  %v2368_v54 = vadd.f32 %v2367_v7, %v8264_v25  ;;  %v8447_v25 = vor.u32 %v6907_v46, %v6265_v11  ;;  %v6915_v7 = vld [vmem:[#allocation4 + $0x544] sm:$0xf]  ;;  %v8458_v46 = vor.u32 %v6901_v1, %v6241_v34 }
 0x25a   :  { %v8442_v58 = vadd.f32 %v2386_v18, %v2368_v54  ;;  %9551 = vst [vmem:[#allocation46_spill] sm:$0xff] %v8447_v25 }
 0x25b   :  { %3604 = vmatpush.bf16.msra.mxu0 %v8424_v20  ;;  %v2348_v2 = vpop.f32.mrf.mxu3  ;;  %9553 = vst [vmem:[#allocation47_spill] sm:$0xff] %v8458_v46 }
 0x25c   :  { %3640 = vmatpush.bf16.msrb.mxu1 %v8429_v47  ;;  %v8440_v49 = vadd.f32 %v2348_v2, %v8373_v35  ;;  %v2402_v21 = vpop.f32.mrf.mxu1  ;;  %v6307_v2 = vld [vmem:[#allocation4 + $0x558] sm:$0xf0]  ;;  %v6885_v35 = vld [vmem:[#allocation4 + $0x454] sm:$0xf] }
 0x25d   :  { %v8450_v55 = vadd.f32 %v2402_v21, %v8297_v27  ;;  %v8454_v54 = vor.u32 %v6915_v7, %v6307_v2  ;;  %v8456_v12 = vor.u32 %v6885_v35, %v6187_v48  ;;  %v6879_v21 = vld [vmem:[#allocation4 + $0x424] sm:$0xf]  ;;  %v6217_v7 = vld [vmem:[#allocation4 + $0x488] sm:$0xf] }
 0x25e   :  { %9550 = vst [vmem:[#allocation42_spill] sm:$0xff] %v8440_v49  ;;  %v8464_v49 = vor.u32 %v6879_v21, %v6163_v14  ;;  %v6193_v14 = vld [vmem:[#allocation4 + $0x458] sm:$0xf] }
 0x25f   :  { %3605 = vmatpush.bf16.msra.mxu0 %v8437_v8  ;;  %v2457_v18 = vpop.f32.mrf.mxu2  ;;  %9552 = vst [vmem:[#allocation48_spill] sm:$0xff] %v8456_v12  ;;  %v2369_v11 = vpop.f32.mrf.mxu0  ;;  %3628 = vmatpush.bf16.msra.mxu2 %v8454_v54 }
 0x260   :  { %3641 = vmatpush.bf16.msrb.mxu1 %v8447_v25  ;;  %v2370_v27 = vadd.f32 %v2369_v11, %v8274_v17  ;;  %v6895_v25 = vld [vmem:[#allocation4 + $0x49c] sm:$0xf0]  ;;  %v6873_v11 = vld [vmem:[#allocation4 + $0x3f4] sm:$0xf] }
 0x261   :  { %v8471_v48 = vor.u32 %v6895_v25, %v6217_v7  ;;  %3008 = vmatmul.bf16.gmra.mxu1 %v8177_v9  ;;  %v6925_v25 = vld [vmem:[#allocation4 + $0x58c] sm:$0xf0] }
 0x262   :  { %v8469_v1 = vadd.f32 %v2388_v59, %v2370_v27  ;;  %v6337_v59 = vld [vmem:[#allocation4 + $0x578] sm:$0xf] }
 0x263   :  { %3606 = vmatpush.bf16.msra.mxu0 %v8456_v12  ;;  %v2350_v2 = vpop.f32.mrf.mxu3  ;;  %9556 = vst [vmem:[#allocation52_spill] sm:$0xff] %v8471_v48  ;;  %v8485_v7 = vor.u32 %v6925_v25, %v6337_v59 }
 0x264   :  { %3642 = vmatpush.bf16.msrb.mxu1 %v8458_v46  ;;  %v8467_v35 = vadd.f32 %v2350_v2, %v8397_v45  ;;  %9555 = vst [vmem:[#allocation51_spill] sm:$0xff] %v8469_v1  ;;  %v2405_v34 = vpop.f32.mrf.mxu1  ;;  %v6139_v46 = vld [vmem:[#allocation4 + $0x408] sm:$0xf0]  ;;  %v6889_v45 = vld [vmem:[#allocation4 + $0x46c] sm:$0xf0]  ;;  %6110 = vmatmul.msk.bf16.gmra.mxu2 %vm523_vm0, %v8188_v19 }
 0x265   :  { %v8474_v17 = vadd.f32 %v2405_v34, %v8307_v60  ;;  %v8478_v12 = vor.u32 %v6873_v11, %v6139_v46  ;;  %v8483_v60 = vor.u32 %v6889_v45, %v6193_v14  ;;  %9559 = vst [vmem:[#allocation56_spill] sm:$0xff] %v8485_v7  ;;  %v6867_v46 = vld [vmem:[#allocation4 + $0x3c4] sm:$0xf]  ;;  %v6115_v34 = vld [vmem:[#allocation4 + $0x3d8] sm:$0xf0]  ;;  %3665 = vmatpush.bf16.msra.mxu3 %v8485_v7 }
 0x266   :  { %9554 = vst [vmem:[#allocation50_spill] sm:$0xff] %v8467_v35  ;;  %v6169_v11 = vld [vmem:[#allocation4 + $0x428] sm:$0xf]  ;;  %v8491_v0 = vor.u32 %v6867_v46, %v6115_v34  ;;  %v6910_v46 = vld [vmem:[#allocation4 + $0x51c] sm:$0xf]  ;;  %6108 = vmatmul.msk.bf16.gmra.mxu3 %vm523_vm0, %v8188_v19  ;;  %3046 = vmatmul.bf16.gmra.mxu0 %v8177_v9 }
 0x267   :  { %3607 = vmatpush.bf16.msra.mxu0 %v8464_v49  ;;  %v2459_v21 = vpop.f32.mrf.mxu2  ;;  %9557 = vst [vmem:[#allocation53_spill] sm:$0xff] %v8478_v12  ;;  %v2438_v27 = vpop.f32.mrf.mxu0  ;;  %v6291_v34 = vld [vmem:[#allocation4 + $0x530] sm:$0xf0]  ;;  %v6892_v19 = vld [vmem:[#allocation4 + $0x48c] sm:$0xf] }
 0x268   :  { %3643 = vmatpush.bf16.msrb.mxu1 %v8471_v48  ;;  %9558 = vst [vmem:[#allocation55_spill] sm:$0xff] %v8483_v60  ;;  %v2439_v2 = vadd.f32 %v2438_v27, %v8284_v40  ;;  %v6883_v48 = vld [vmem:[#allocation4 + $0x43c] sm:$0xf0]  ;;  %v6922_v27 = vld [vmem:[#allocation4 + $0x57c] sm:$0xf] }
 0x269   :  { %9560 = vst [vmem:[#allocation54_spill] sm:$0xff] %v8491_v0  ;;  %v8501_v40 = vor.u32 %v6883_v48, %v6169_v11  ;;  %v8512_v48 = vor.u32 %v6910_v46, %v6291_v34  ;;  %v9566_v11 = vld [vmem:[#allocation20_spill] sm:$0xff]  ;;  %v6267_v34 = vld [vmem:[#allocation4 + $0x500] sm:$0xf0]  ;;  %v6249_v9 = vld [vmem:[#allocation4 + $0x4c0] sm:$0xf] }
 0x26a   :  { %v8496_v45 = vadd.f32 %v2457_v18, %v2439_v2 }
 0x26b   :  { %3608 = vmatpush.bf16.msra.mxu0 %v8478_v12  ;;  %v2419_v35 = vpop.f32.mrf.mxu3  ;;  %9563 = vst [vmem:[#allocation59_spill] sm:$0xff] %v8501_v40  ;;  %v9572_v12 = vld [vmem:[#allocation19_spill] sm:$0xff] }
 0x26c   :  { %3644 = vmatpush.bf16.msrb.mxu1 %v8483_v60  ;;  %v8494_v14 = vadd.f32 %v2419_v35, %v8420_v32  ;;  %9562 = vst [vmem:[#allocation57_spill] sm:$0xff] %v8496_v45  ;;  %v2407_v59 = vpop.f32.mrf.mxu1  ;;  %v6339_v32 = vld [vmem:[#allocation4 + $0x590] sm:$0xf0]  ;;  %v6145_v35 = vld [vmem:[#allocation4 + $0x3f8] sm:$0xf]  ;;  %v9419_v1 = vrot.slane %v9572_v12, 1 }
 0x26d   :  { %v8504_v25 = vadd.f32 %v2407_v59, %v8317_v37  ;;  %v8508_v2 = vor.u32 %v6922_v27, %v6339_v32  ;;  %9565 = vst [vmem:[#allocation61_spill] sm:$0xff] %v8512_v48  ;;  %v3246_v59 = vrot.slane %v9566_v11, 1  ;;  %v9567_v45 = vld [vmem:[#allocation25_spill] sm:$0xff]  ;;  %v6121_v27 = vld [vmem:[#allocation4 + $0x3c8] sm:$0xf] }
 0x26e   :  { %9561 = vst [vmem:[#allocation58_spill] sm:$0xff] %v8494_v14  ;;  %v8510_v14 = vor.u32 %v6877_v30, %v6145_v35  ;;  %v6871_v32 = vld [vmem:[#allocation4 + $0x3dc] sm:$0xf0]  ;;  %v6904_v35 = vld [vmem:[#allocation4 + $0x4ec] sm:$0xf] }
 0x26f   :  { %3609 = vmatpush.bf16.msra.mxu0 %v8491_v0  ;;  %v2462_v18 = vpop.f32.mrf.mxu2  ;;  %v2440_v37 = vpop.f32.mrf.mxu0  ;;  %3703 = vmatpush.bf16.msrb.mxu2 %v8508_v2  ;;  %v8520_v46 = vor.u32 %v6871_v32, %v6121_v27  ;;  %v8527_v0 = vor.u32 %v6904_v35, %v6267_v34 }
 0x270   :  { %3645 = vmatpush.bf16.msrb.mxu1 %v8501_v40  ;;  %9564 = vst [vmem:[#allocation60_spill] sm:$0xff] %v8510_v14  ;;  %v2441_v40 = vadd.f32 %v2440_v37, %v8294_v44  ;;  %v9570_v44 = vrot.slane %v9567_v45, 1 }
 0x271   :  { %9568 = vst [vmem:[#allocation20_spill] sm:$0xff] %v8520_v46 }
 0x272   :  { %v8525_v11 = vadd.f32 %v2459_v21, %v2441_v40  ;;  %v8532_v37 = vsel %vm3245_vm2, %v3246_v59, %v9570_v44  ;;  %v6243_v21 = vld [vmem:[#allocation4 + $0x4d0] sm:$0xf0]  ;;  %v6297_v40 = vld [vmem:[#allocation4 + $0x520] sm:$0xf] }
 0x273   :  { %3678 = vmatpush.bf16.msrb.mxu0 %v8512_v48  ;;  %v2421_v30 = vpop.f32.mrf.mxu3  ;;  %3572 = vmatmul.bf16.vlgmr.msra.gmra.mxu1 %v8532_v37  ;;  %v6919_v59 = vld [vmem:[#allocation4 + $0x55c] sm:$0xf0] }
 0x274   :  { %3646 = vmatpush.bf16.msrb.mxu1 %v8510_v14  ;;  %v8523_v60 = vadd.f32 %v2421_v30, %v8450_v55  ;;  %v2476_v7 = vpop.f32.mrf.mxu1  ;;  %v9571_v14 = vld [vmem:[#allocation16_spill] sm:$0xff]  ;;  %v6898_v55 = vld [vmem:[#allocation4 + $0x4bc] sm:$0xf]  ;;  %v6914_v30 = vld [vmem:[#allocation4 + $0x534] sm:$0xf0] }
 0x275   :  { %v3249_v48 = vrot.slane %v9571_v14, 1  ;;  %v8537_v27 = vadd.f32 %v2476_v7, %v8327_v51  ;;  %v8541_v35 = vor.u32 %v6898_v55, %v6243_v21  ;;  %v6313_v14 = vld [vmem:[#allocation4 + $0x548] sm:$0xf]  ;;  %v8546_v51 = vor.u32 %v6914_v30, %v6297_v40  ;;  %v6219_v21 = vld [vmem:[#allocation4 + $0x4a0] sm:$0xf0] }
 0x276   :  { %9569 = vst [vmem:[#allocation25_spill] sm:$0xff] %v8523_v60  ;;  %v8553_v44 = vor.u32 %v6919_v59, %v6313_v14  ;;  %v6273_v60 = vld [vmem:[#allocation4 + $0x4f0] sm:$0xf]  ;;  %v8559_v40 = vor.u32 %v6892_v19, %v6219_v21  ;;  %v6908_v30 = vld [vmem:[#allocation4 + $0x504] sm:$0xf0]  ;;  %3610 = vmatmul.bf16.vlgmr.msra.gmra.mxu0 %v8532_v37 }
 0x277   :  { %3679 = vmatpush.bf16.msrb.mxu0 %v8527_v0  ;;  %v2464_v32 = vpop.f32.mrf.mxu2  ;;  %9573 = vst [vmem:[#allocation16_spill] sm:$0xff] %v8541_v35  ;;  %v2443_v7 = vpop.f32.mrf.mxu0  ;;  %v8551_v34 = vsel %vm3245_vm2, %v3249_v48, %v9419_v1  ;;  %v6315_v1 = vld [vmem:[#allocation4 + $0x560] sm:$0xf0] }
 0x278   :  { %3647 = vmatpush.bf16.msrb.mxu1 %v8520_v46  ;;  %9574 = vst [vmem:[#allocation19_spill] sm:$0xff] %v8546_v51  ;;  %v2444_v55 = vadd.f32 %v2443_v7, %v8304_v33  ;;  %3666 = vmatpush.bf16.msra.mxu3 %v8553_v44  ;;  %v8569_v33 = vor.u32 %v6908_v30, %v6273_v60  ;;  %v6916_v7 = vld [vmem:[#allocation4 + $0x54c] sm:$0xf] }
 0x279   :  { %9575 = vst [vmem:[#allocation62_spill] sm:$0xff] %v8559_v40  ;;  %6353 = vmatmul.msk.bf16.vlgmr.msra.gmra.mxu2 %vm523_vm0, %v8551_v34  ;;  %6351 = vmatmul.msk.bf16.vlgmr.msrb.gmra.mxu3 %vm523_vm0, %v8551_v34 }
 0x27a   :  { %v8564_v14 = vadd.f32 %v2462_v18, %v2444_v55  ;;  %9578 = vst [vmem:[#allocation65_spill] sm:$0xff] %v8569_v33  ;;  %v6195_v18 = vld [vmem:[#allocation4 + $0x470] sm:$0xf0] }
 0x27b   :  { %3680 = vmatpush.bf16.msrb.mxu0 %v8541_v35  ;;  %v2424_v46 = vpop.f32.mrf.mxu3 }
 0x27c   :  { %3716 = vmatpush.bf16.msra.mxu1 %v8546_v51  ;;  %v8562_v48 = vadd.f32 %v2424_v46, %v8474_v17  ;;  %9577 = vst [vmem:[#allocation64_spill] sm:$0xff] %v8564_v14  ;;  %v2478_v59 = vpop.f32.mrf.mxu1  ;;  %v6886_v51 = vld [vmem:[#allocation4 + $0x45c] sm:$0xf]  ;;  %v8576_v17 = vor.u32 %v6916_v7, %v6315_v1  ;;  %v6902_v46 = vld [vmem:[#allocation4 + $0x4d4] sm:$0xf0] }
 0x27d   :  { %v8572_v19 = vadd.f32 %v2478_v59, %v8337_v22  ;;  %v8578_v21 = vor.u32 %v6886_v51, %v6195_v18  ;;  %v8580_v60 = vor.u32 %v6902_v46, %v6249_v9  ;;  %v6880_v1 = vld [vmem:[#allocation4 + $0x42c] sm:$0xf]  ;;  %v6171_v7 = vld [vmem:[#allocation4 + $0x440] sm:$0xf0]  ;;  %v6896_v51 = vld [vmem:[#allocation4 + $0x4a4] sm:$0xf0] }
 0x27e   :  { %9576 = vst [vmem:[#allocation63_spill] sm:$0xff] %v8562_v48  ;;  %3704 = vmatpush.bf16.msrb.mxu2 %v8576_v17  ;;  %v9581_v48 = vld [vmem:[#allocation45_spill] sm:$0xff] }
 0x27f   :  { %3681 = vmatpush.bf16.msrb.mxu0 %v8559_v40  ;;  %v2533_v55 = vpop.f32.mrf.mxu2  ;;  %9579 = vst [vmem:[#allocation66_spill] sm:$0xff] %v8578_v21  ;;  %v2445_v30 = vpop.f32.mrf.mxu0  ;;  %v3252_v22 = vrot.slane %v9581_v48, 1  ;;  %v8587_v40 = vor.u32 %v6880_v1, %v6171_v7  ;;  %v6890_v1 = vld [vmem:[#allocation4 + $0x474] sm:$0xf0]  ;;  %v9586_v7 = vrot.slane %v9572_v12, 1 }
 0x280   :  { %3717 = vmatpush.bf16.msra.mxu1 %v8569_v33  ;;  %9580 = vst [vmem:[#allocation67_spill] sm:$0xff] %v8580_v60  ;;  %v2446_v59 = vadd.f32 %v2445_v30, %v8314_v57  ;;  %v6225_v33 = vld [vmem:[#allocation4 + $0x490] sm:$0xf]  ;;  %v9584_v57 = vrot.slane %v9567_v45, 1  ;;  %v6345_v45 = vld [vmem:[#allocation4 + $0x580] sm:$0xf] }
 0x281   :  { %v8594_v46 = vor.u32 %v6896_v51, %v6225_v33  ;;  %v6884_v12 = vld [vmem:[#allocation4 + $0x444] sm:$0xf0] }
 0x282   :  { %v8592_v9 = vadd.f32 %v2464_v32, %v2446_v59  ;;  %v8599_v30 = vsel %vm3245_vm2, %v9584_v57, %v3252_v22  ;;  %v6147_v32 = vld [vmem:[#allocation4 + $0x410] sm:$0xf0] }
 0x283   :  { %3682 = vmatpush.bf16.msrb.mxu0 %v8578_v21  ;;  %v2426_v14 = vpop.f32.mrf.mxu3  ;;  %9583 = vst [vmem:[#allocation68_spill] sm:$0xff] %v8594_v46  ;;  %3577 = vmatmul.bf16.gmra.mxu1 %v8599_v30 }
 0x284   :  { %3718 = vmatpush.bf16.msra.mxu1 %v8580_v60  ;;  %v8590_v18 = vadd.f32 %v2426_v14, %v8504_v25  ;;  %v2481_v48 = vpop.f32.mrf.mxu1  ;;  %v9585_v60 = vld [vmem:[#allocation49_spill] sm:$0xff]  ;;  %v6874_v25 = vld [vmem:[#allocation4 + $0x3fc] sm:$0xf]  ;;  %v6201_v14 = vld [vmem:[#allocation4 + $0x460] sm:$0xf] }
 0x285   :  { %v3254_v21 = vrot.slane %v9585_v60, 1  ;;  %v8603_v35 = vadd.f32 %v2481_v48, %v8351_v23  ;;  %v8607_v59 = vor.u32 %v6874_v25, %v6147_v32  ;;  %v6926_v60 = vld [vmem:[#allocation4 + $0x594] sm:$0xf0]  ;;  %v8612_v23 = vor.u32 %v6890_v1, %v6201_v14  ;;  %v6868_v25 = vld [vmem:[#allocation4 + $0x3cc] sm:$0xf] }
 0x286   :  { %9582 = vst [vmem:[#allocation45_spill] sm:$0xff] %v8590_v18  ;;  %v8619_v48 = vor.u32 %v6926_v60, %v6345_v45  ;;  %v6123_v32 = vld [vmem:[#allocation4 + $0x3e0] sm:$0xf0]  ;;  %v6177_v18 = vld [vmem:[#allocation4 + $0x430] sm:$0xf]  ;;  %3615 = vmatmul.bf16.gmra.mxu0 %v8599_v30 }
 0x287   :  { %3683 = vmatpush.bf16.msrb.mxu0 %v8587_v40  ;;  %v2535_v33 = vpop.f32.mrf.mxu2  ;;  %v2514_v22 = vpop.f32.mrf.mxu0  ;;  %v8617_v51 = vsel %vm3245_vm2, %v9586_v7, %v3254_v21  ;;  %v8625_v14 = vor.u32 %v6868_v25, %v6123_v32  ;;  %v6923_v25 = vld [vmem:[#allocation4 + $0x584] sm:$0xf]  ;;  %v6347_v32 = vld [vmem:[#allocation4 + $0x598] sm:$0xf0] }
 0x288   :  { %3719 = vmatpush.bf16.msra.mxu1 %v8594_v46  ;;  %v2515_v57 = vadd.f32 %v2514_v22, %v8324_v52  ;;  %3741 = vmatpush.bf16.msrb.mxu3 %v8619_v48  ;;  %v8635_v52 = vor.u32 %v6884_v12, %v6177_v18  ;;  %v6153_v22 = vld [vmem:[#allocation4 + $0x400] sm:$0xf]  ;;  %v8646_v12 = vor.u32 %v6923_v25, %v6347_v32  ;;  %v6899_v32 = vld [vmem:[#allocation4 + $0x4c4] sm:$0xf] }
 0x289   :  { %9587 = vst [vmem:[#allocation49_spill] sm:$0xff] %v8625_v14  ;;  %6354 = vmatmul.msk.bf16.gmra.mxu2 %vm523_vm0, %v8617_v51  ;;  %6352 = vmatmul.msk.bf16.gmra.mxu3 %vm523_vm0, %v8617_v51 }
 0x28a   :  { %v8630_v1 = vadd.f32 %v2533_v55, %v2515_v57  ;;  %9590 = vst [vmem:[#allocation71_spill] sm:$0xff] %v8635_v52  ;;  %v6299_v57 = vld [vmem:[#allocation4 + $0x538] sm:$0xf0]  ;;  %3779 = vmatpush.bf16.msra.mxu2 %v8646_v12 }
 0x28b   :  { %3684 = vmatpush.bf16.msrb.mxu0 %v8607_v59  ;;  %v2495_v46 = vpop.f32.mrf.mxu3 }
 0x28c   :  { %3720 = vmatpush.bf16.msra.mxu1 %v8612_v23  ;;  %v8628_v21 = vadd.f32 %v2495_v46, %v8537_v27  ;;  %9589 = vst [vmem:[#allocation70_spill] sm:$0xff] %v8630_v1  ;;  %v2483_v45 = vpop.f32.mrf.mxu1  ;;  %v6878_v27 = vld [vmem:[#allocation4 + $0x414] sm:$0xf0]  ;;  %v6911_v46 = vld [vmem:[#allocation4 + $0x524] sm:$0xf] }
 0x28d   :  { %v8638_v60 = vadd.f32 %v2483_v45, %v8368_v26  ;;  %v8642_v7 = vor.u32 %v6878_v27, %v6153_v22  ;;  %v6129_v45 = vld [vmem:[#allocation4 + $0x3d0] sm:$0xf]  ;;  %v6905_v1 = vld [vmem:[#allocation4 + $0x4f4] sm:$0xf]  ;;  %v6275_v27 = vld [vmem:[#allocation4 + $0x508] sm:$0xf0] }
 0x28e   :  { %9588 = vst [vmem:[#allocation69_spill] sm:$0xff] %v8628_v21  ;;  %v8644_v21 = vor.u32 %v6911_v46, %v6299_v57  ;;  %v8659_v25 = vor.u32 %v6905_v1, %v6275_v27 }
 0x28f   :  { %3685 = vmatpush.bf16.msrb.mxu0 %v8625_v14  ;;  %v2538_v55 = vpop.f32.mrf.mxu2  ;;  %9591 = vst [vmem:[#allocation72_spill] sm:$0xff] %v8642_v7  ;;  %v2516_v18 = vpop.f32.mrf.mxu0 }
 0x290   :  { %3721 = vmatpush.bf16.msra.mxu1 %v8635_v52  ;;  %9592 = vst [vmem:[#allocation73_spill] sm:$0xff] %v8644_v21  ;;  %v2517_v26 = vadd.f32 %v2516_v18, %v8334_v5  ;;  %v6872_v52 = vld [vmem:[#allocation4 + $0x3e4] sm:$0xf0]  ;;  %v6251_v18 = vld [vmem:[#allocation4 + $0x4d8] sm:$0xf0] }
 0x291   :  { %v8652_v22 = vor.u32 %v6872_v52, %v6129_v45  ;;  %v6227_v45 = vld [vmem:[#allocation4 + $0x4a8] sm:$0xf0] }
 0x292   :  { %v8657_v57 = vadd.f32 %v2535_v33, %v2517_v26  ;;  %v6920_v33 = vld [vmem:[#allocation4 + $0x564] sm:$0xf0]  ;;  %v6893_v26 = vld [vmem:[#allocation4 + $0x494] sm:$0xf] }
 0x293   :  { %3754 = vmatpush.bf16.msra.mxu0 %v8644_v21  ;;  %v2497_v14 = vpop.f32.mrf.mxu3  ;;  %v8665_v21 = vor.u32 %v6899_v32, %v6251_v18  ;;  %3648 = vmatmul.bf16.vlgmr.msrb.gmra.mxu1 %v8532_v37  ;;  %v8676_v32 = vor.u32 %v6893_v26, %v6227_v45  ;;  %v6917_v26 = vld [vmem:[#allocation4 + $0x554] sm:$0xf] }
 0x294   :  { %3722 = vmatpush.bf16.msra.mxu1 %v8642_v7  ;;  %v8655_v46 = vadd.f32 %v2497_v14, %v8572_v19  ;;  %v8661_v5 = vpop.f32.mrf.mxu1  ;;  %v6321_v19 = vld [vmem:[#allocation4 + $0x550] sm:$0xf] }
 0x295   :  { %v8670_v1 = vor.u32 %v6920_v33, %v6321_v19  ;;  %v6203_v19 = vld [vmem:[#allocation4 + $0x478] sm:$0xf0] }
 0x296   :  { %9593 = vst [vmem:[#allocation74_spill] sm:$0xff] %v8655_v46  ;;  %3686 = vmatmul.bf16.vlgmr.msrb.gmra.mxu0 %v8532_v37 }
 0x297   :  { %3755 = vmatpush.bf16.msra.mxu0 %v8659_v25  ;;  %v2540_v7 = vpop.f32.mrf.mxu2  ;;  %v2519_v14 = vpop.f32.mrf.mxu0  ;;  %3742 = vmatpush.bf16.msrb.mxu3 %v8670_v1 }
 0x298   :  { %3723 = vmatpush.bf16.msra.mxu1 %v8652_v22  ;;  %v2520_v52 = vadd.f32 %v2519_v14, %v8347_v6  ;;  %v6887_v6 = vld [vmem:[#allocation4 + $0x464] sm:$0xf] }
 0x299   :  { %6357 = vmatmul.msk.bf16.vlgmr.msrb.gmra.mxu2 %vm523_vm0, %v8551_v34  ;;  %v8688_v14 = vor.u32 %v6887_v6, %v6203_v19  ;;  %6355 = vmatmul.msk.bf16.vlgmr.msra.gmra.mxu3 %vm523_vm0, %v8551_v34 }
 0x29a   :  { %v8681_v46 = vadd.f32 %v2538_v55, %v2520_v52 }
 0x29b   :  { %3756 = vmatpush.bf16.msra.mxu0 %v8665_v21  ;;  %v2500_v27 = vpop.f32.mrf.mxu3  ;;  %3835 = vmatpush.bf16.msra.mxu3 %v8381_v53 }
 0x29c   :  { %3810 = vmatpush.bf16.msrb.mxu1 %v8345_v38  ;;  %v8679_v18 = vadd.f32 %v2500_v27, %v8603_v35  ;;  %9595 = vst [vmem:[#allocation76_spill] sm:$0xff] %v8681_v46  ;;  %v2854_v38 = vpop.f32.mrf.mxu1  ;;  %v6323_v35 = vld [vmem:[#allocation4 + $0x568] sm:$0xf0]  ;;  %v6881_v27 = vld [vmem:[#allocation4 + $0x434] sm:$0xf] }
 0x29d   :  { %v8690_v55 = vor.u32 %v6917_v26, %v6323_v35 }
 0x29e   :  { %9594 = vst [vmem:[#allocation75_spill] sm:$0xff] %v8679_v18 }
 0x29f   :  { %3757 = vmatpush.bf16.msra.mxu0 %v8676_v32  ;;  %v2909_v33 = vpop.f32.mrf.mxu2  ;;  %v2521_v45 = vpop.f32.mrf.mxu0  ;;  %3780 = vmatpush.bf16.msra.mxu2 %v8690_v55 }
 0x2a0   :  { %3811 = vmatpush.bf16.msrb.mxu1 %v8356_v3  ;;  %v2522_v52 = vadd.f32 %v2521_v45, %v8364_v61  ;;  %v6179_v3 = vld [vmem:[#allocation4 + $0x448] sm:$0xf0]  ;;  %v6155_v61 = vld [vmem:[#allocation4 + $0x418] sm:$0xf0]  ;;  %3836 = vmatpush.bf16.msra.mxu3 %v8431_v43 }
 0x2a1   :  { %v8696_v46 = vor.u32 %v6881_v27, %v6179_v3 }
 0x2a2   :  { %v8701_v19 = vadd.f32 %v2540_v7, %v2522_v52  ;;  %v6131_v7 = vld [vmem:[#allocation4 + $0x3e8] sm:$0xf0] }
 0x2a3   :  { %3758 = vmatpush.bf16.msra.mxu0 %v8688_v14  ;;  %v2502_v18 = vpop.f32.mrf.mxu3  ;;  %3873 = vmatpush.bf16.msrb.mxu2 %v8400_v28 }
 0x2a4   :  { %3812 = vmatpush.bf16.msrb.mxu1 %v8362_v42  ;;  %v8699_v6 = vadd.f32 %v2502_v18, %v8638_v60  ;;  %v2857_v26 = vpop.f32.mrf.mxu1  ;;  %v6875_v42 = vld [vmem:[#allocation4 + $0x404] sm:$0xf] }
 0x2a5   :  { %v8706_v45 = vor.u32 %v6875_v42, %v6155_v61  ;;  %3653 = vmatmul.bf16.gmra.mxu1 %v8599_v30 }
 0x2a6   :  { %3691 = vmatmul.bf16.gmra.mxu0 %v8599_v30 }
 0x2a7   :  { %3759 = vmatpush.bf16.msra.mxu0 %v8696_v46  ;;  %v2911_v35 = vpop.f32.mrf.mxu2  ;;  %v2890_v60 = vpop.f32.mrf.mxu0  ;;  %3874 = vmatpush.bf16.msrb.mxu2 %v8454_v54 }
 0x2a8   :  { %3813 = vmatpush.bf16.msrb.mxu1 %v8370_v13  ;;  %v2910_v28 = vadd.f32 %v2909_v33, %v2890_v60  ;;  %v6869_v13 = vld [vmem:[#allocation4 + $0x3d4] sm:$0xf] }
 0x2a9   :  { %v8715_v52 = vor.u32 %v6869_v13, %v6131_v7  ;;  %6358 = vmatmul.msk.bf16.gmra.mxu2 %vm523_vm0, %v8617_v51  ;;  %6356 = vmatmul.msk.bf16.gmra.mxu3 %vm523_vm0, %v8617_v51  ;;  %v9601_v7 = vld [vmem:[#allocation47_spill] sm:$0xff] }
 0x2aa   :  { %v3072_v3 = vadd.f32 %v2910_v28, %v8389_v39 }
 0x2ab   :  { %3760 = vmatpush.bf16.msra.mxu0 %v8706_v45  ;;  %v2871_v18 = vpop.f32.mrf.mxu3 }
 0x2ac   :  { %3814 = vmatpush.bf16.msrb.mxu1 %v8379_v15  ;;  %v2872_v27 = vadd.f32 %v2871_v18, %v8661_v5  ;;  %v2859_v15 = vpop.f32.mrf.mxu1  ;;  %v8726_v54 = vadd.f32 %v3072_v3, %v8050_v4  ;;  %v9602_v3 = vld [vmem:[#allocation51_spill] sm:$0xff] }
 0x2ae   :  { %v3071_v53 = vadd.f32 %v2872_v27, %v8387_v24 }
 0x2af   :  { %3761 = vmatpush.bf16.msra.mxu0 %v8715_v52  ;;  %v2914_v5 = vpop.f32.mrf.mxu2  ;;  %v2892_v33 = vpop.f32.mrf.mxu0 }
 0x2b0   :  { %3815 = vmatpush.bf16.msrb.mxu1 %v8394_v16  ;;  %v8731_v39 = vadd.f32 %v3071_v53, %v8057_v63  ;;  %v2912_v42 = vadd.f32 %v2911_v35, %v2892_v33  ;;  %v9603_v33 = vld [vmem:[#allocation52_spill] sm:$0xff] }
 0x2b2   :  { %v3078_v24 = vadd.f32 %v2912_v42, %v8415_v29  ;;  %v9604_v42 = vld [vmem:[#allocation50_spill] sm:$0xff] }
 0x2b3   :  { %3848 = vmatpush.bf16.msrb.mxu0 %v8404_v62  ;;  %v2873_v16 = vpop.f32.mrf.mxu3 }
 0x2b4   :  { %3816 = vmatpush.bf16.msrb.mxu1 %v8402_v10  ;;  %v2874_v43 = vadd.f32 %v2873_v16, %v2854_v38  ;;  %v2928_v4 = vpop.f32.mrf.mxu1  ;;  %v8739_v62 = vadd.f32 %v3078_v24, %v8065_v50  ;;  %v9597_v38 = vld [vmem:[#allocation42_spill] sm:$0xff] }
 0x2b5   :  { %3724 = vmatmul.bf16.vlgmr.msra.gmra.mxu1 %v8532_v37 }
 0x2b6   :  { %v3077_v61 = vadd.f32 %v2874_v43, %v8413_v36  ;;  %v9605_v43 = vld [vmem:[#allocation26_spill] sm:$0xff]  ;;  %3762 = vmatmul.bf16.vlgmr.msra.gmra.mxu0 %v8532_v37  ;;  %v9619_v37 = vld [vmem:[#allocation17_spill] sm:$0xff] }
 0x2b7   :  { %3849 = vmatpush.bf16.msrb.mxu0 %v8417_v31  ;;  %v2916_v63 = vpop.f32.mrf.mxu2  ;;  %v2895_v29 = vpop.f32.mrf.mxu0 }
 0x2b8   :  { %3817 = vmatpush.bf16.msrb.mxu1 %v8410_v56  ;;  %v8743_v10 = vadd.f32 %v3077_v61, %v8068_v41  ;;  %v2915_v56 = vadd.f32 %v2914_v5, %v2895_v29  ;;  %v9606_v29 = vld [vmem:[#allocation53_spill] sm:$0xff] }
 0x2b9   :  { %6361 = vmatmul.msk.bf16.vlgmr.msra.gmra.mxu2 %vm523_vm0, %v8551_v34  ;;  %6359 = vmatmul.msk.bf16.vlgmr.msrb.gmra.mxu3 %vm523_vm0, %v8551_v34  ;;  %v9613_v34 = vld [vmem:[#allocation61_spill] sm:$0xff] }
 0x2ba   :  { %v3084_v36 = vadd.f32 %v2915_v56, %v8442_v58  ;;  %3949 = vmatpush.bf16.msra.mxu2 %v8508_v2  ;;  %v9607_v56 = vld [vmem:[#allocation24_spill] sm:$0xff] }
 0x2bb   :  { %3850 = vmatpush.bf16.msrb.mxu0 %v8424_v20  ;;  %v2876_v31 = vpop.f32.mrf.mxu3  ;;  %v9596_v20 = vld [vmem:[#allocation46_spill] sm:$0xff] }
 0x2bc   :  { %3886 = vmatpush.bf16.msra.mxu1 %v8429_v47  ;;  %v2877_v50 = vadd.f32 %v2876_v31, %v2857_v26  ;;  %v2930_v41 = vpop.f32.mrf.mxu1  ;;  %v9598_v47 = vld [vmem:[#allocation21_spill] sm:$0xff]  ;;  %v9600_v26 = vld [vmem:[#allocation22_spill] sm:$0xff] }
 0x2bd   :  { %v8758_v60 = vadd.f32 %v3084_v36, %v9598_v47  ;;  %v9610_v36 = vld [vmem:[#allocation54_spill] sm:$0xff] }
 0x2be   :  { %v3083_v35 = vadd.f32 %v2877_v50, %v9597_v38  ;;  %3950 = vmatpush.bf16.msra.mxu2 %v8576_v17  ;;  %v9611_v38 = vld [vmem:[#allocation57_spill] sm:$0xff] }
 0x2bf   :  { %3851 = vmatpush.bf16.msrb.mxu0 %v8437_v8  ;;  %v2985_v28 = vpop.f32.mrf.mxu2  ;;  %v9599_v8 = vld [vmem:[#allocation48_spill] sm:$0xff]  ;;  %v2897_v13 = vpop.f32.mrf.mxu0 }
 0x2c0   :  { %3887 = vmatpush.bf16.msra.mxu1 %v9596_v20  ;;  %v8762_v58 = vadd.f32 %v3083_v35, %v9600_v26  ;;  %v2917_v18 = vadd.f32 %v2916_v63, %v2897_v13  ;;  %v9609_v63 = vld [vmem:[#allocation55_spill] sm:$0xff]  ;;  %v9614_v26 = vld [vmem:[#allocation58_spill] sm:$0xff] }
 0x2c2   :  { %v3090_v53 = vadd.f32 %v2917_v18, %v9602_v3  ;;  %v9617_v18 = vld [vmem:[#allocation23_spill] sm:$0xff] }
 0x2c3   :  { %3852 = vmatpush.bf16.msrb.mxu0 %v9599_v8  ;;  %v2878_v27 = vpop.f32.mrf.mxu3  ;;  %v9612_v8 = vld [vmem:[#allocation59_spill] sm:$0xff] }
 0x2c4   :  { %3888 = vmatpush.bf16.msra.mxu1 %v9601_v7  ;;  %v2879_v2 = vadd.f32 %v2878_v27, %v2859_v15  ;;  %v2933_v5 = vpop.f32.mrf.mxu1  ;;  %v8771_v24 = vadd.f32 %v3090_v53, %v9605_v43  ;;  %v9608_v15 = vld [vmem:[#allocation56_spill] sm:$0xff]  ;;  %v9615_v7 = vld [vmem:[#allocation27_spill] sm:$0xff]  ;;  %v9620_v53 = vld [vmem:[#allocation14_spill] sm:$0xff] }
 0x2c5   :  { %3729 = vmatmul.bf16.gmra.mxu1 %v8599_v30  ;;  %3911 = vmatpush.bf16.msrb.mxu3 %v9608_v15 }
 0x2c6   :  { %v3089_v16 = vadd.f32 %v2879_v2, %v9604_v42  ;;  %v3793_v2 = vrot.slane %v9619_v37, 1  ;;  %v9621_v42 = vld [vmem:[#allocation60_spill] sm:$0xff]  ;;  %3767 = vmatmul.bf16.gmra.mxu0 %v8599_v30 }
 0x2c7   :  { %3853 = vmatpush.bf16.msrb.mxu0 %v8464_v49  ;;  %v2987_v61 = vpop.f32.mrf.mxu2  ;;  %v2966_v49 = vpop.f32.mrf.mxu0  ;;  %v9641_v30 = vld [vmem:[#allocation32_spill] sm:$0xff] }
 0x2c8   :  { %3889 = vmatpush.bf16.msra.mxu1 %v9603_v33  ;;  %v8775_v17 = vadd.f32 %v3089_v16, %v9607_v56  ;;  %v2986_v31 = vadd.f32 %v2985_v28, %v2966_v49  ;;  %v3792_v33 = vrot.slane %v9620_v53, 1  ;;  %v9622_v49 = vld [vmem:[#allocation18_spill] sm:$0xff]  ;;  %v9633_v53 = vld [vmem:[#allocation64_spill] sm:$0xff] }
 0x2c9   :  { %6362 = vmatmul.msk.bf16.gmra.mxu2 %vm523_vm0, %v8617_v51  ;;  %3912 = vmatpush.bf16.msrb.mxu3 %v8553_v44  ;;  %v3796_v44 = vrot.slane %v9622_v49, 1 }
 0x2ca   :  { %v3074_v35 = vadd.f32 %v2986_v31, %v9611_v38  ;;  %v9623_v31 = vld [vmem:[#allocation15_spill] sm:$0xff]  ;;  %v9626_v38 = vld [vmem:[#allocation25_spill] sm:$0xff]  ;;  %6360 = vmatmul.msk.bf16.gmra.mxu3 %vm523_vm0, %v8617_v51 }
 0x2cb   :  { %3854 = vmatpush.bf16.msrb.mxu0 %v9606_v29  ;;  %v2947_v50 = vpop.f32.mrf.mxu3 }
 0x2cc   :  { %3890 = vmatpush.bf16.msra.mxu1 %v9609_v63  ;;  %v2948_v20 = vadd.f32 %v2947_v50, %v2928_v4  ;;  %v2935_v47 = vpop.f32.mrf.mxu1  ;;  %v8791_v28 = vadd.f32 %v3074_v35, %v9615_v7  ;;  %v8804_v63 = vsel %vm3245_vm2, %v3792_v33, %v3793_v2  ;;  %v3795_v50 = vrot.slane %v9623_v31, 1  ;;  %v9632_v7 = vld [vmem:[#allocation62_spill] sm:$0xff] }
 0x2ce   :  { %v3073_v13 = vadd.f32 %v2948_v20, %v9614_v26  ;;  %9616 = vst [vmem:[#allocation46_spill] sm:$0xff] %v8791_v28  ;;  %v9625_v20 = vld [vmem:[#allocation16_spill] sm:$0xff]  ;;  %v8820_v26 = vsel %vm3245_vm2, %v3795_v50, %v3796_v44  ;;  %v3798_v50 = vrot.slane %v9641_v30, 1 }
 0x2cf   :  { %3855 = vmatpush.bf16.msrb.mxu0 %v9610_v36  ;;  %v2990_v4 = vpop.f32.mrf.mxu2  ;;  %v2968_v3 = vpop.f32.mrf.mxu0  ;;  %v9624_v36 = vld [vmem:[#allocation20_spill] sm:$0xff] }
 0x2d0   :  { %3891 = vmatpush.bf16.msra.mxu1 %v9612_v8  ;;  %v8795_v27 = vadd.f32 %v3073_v13, %v9617_v18  ;;  %v2988_v16 = vadd.f32 %v2987_v61, %v2968_v3  ;;  %v9629_v8 = vld [vmem:[#allocation29_spill] sm:$0xff]  ;;  %v9631_v13 = vld [vmem:[#allocation19_spill] sm:$0xff] }
 0x2d2   :  { %9618 = vst [vmem:[#allocation42_spill] sm:$0xff] %v8795_v27  ;;  %v3080_v56 = vadd.f32 %v2988_v16, %v8525_v11  ;;  %v9635_v16 = vld [vmem:[#allocation66_spill] sm:$0xff] }
 0x2d3   :  { %3924 = vmatpush.bf16.msra.mxu0 %v9613_v34  ;;  %v2949_v43 = vpop.f32.mrf.mxu3 }
 0x2d4   :  { %3892 = vmatpush.bf16.msra.mxu1 %v9621_v42  ;;  %v2950_v29 = vadd.f32 %v2949_v43, %v2930_v41  ;;  %v3004_v15 = vpop.f32.mrf.mxu1  ;;  %v9634_v42 = vld [vmem:[#allocation65_spill] sm:$0xff]  ;;  %v9636_v43 = vld [vmem:[#allocation63_spill] sm:$0xff] }
 0x2d5   :  { %3818 = vmatmul.bf16.vlgmr.msrb.gmra.mxu1 %v8804_v63 }
 0x2d6   :  { %v3079_v35 = vadd.f32 %v2950_v29, %v9626_v38  ;;  %3856 = vmatmul.bf16.vlgmr.msrb.gmra.mxu0 %v8804_v63 }
 0x2d7   :  { %3925 = vmatpush.bf16.msra.mxu0 %v8527_v0  ;;  %v9627_v0 = vld [vmem:[#allocation28_spill] sm:$0xff]  ;;  %v2992_v41 = vpop.f32.mrf.mxu2  ;;  %v2971_v34 = vpop.f32.mrf.mxu0 }
 0x2d8   :  { %3893 = vmatpush.bf16.msra.mxu1 %v9624_v36  ;;  %v8811_v61 = vadd.f32 %v3080_v56, %v9627_v0  ;;  %v8814_v11 = vadd.f32 %v3079_v35, %v9629_v8  ;;  %v2991_v18 = vadd.f32 %v2990_v4, %v2971_v34  ;;  %v9637_v56 = vld [vmem:[#allocation31_spill] sm:$0xff]  ;;  %v9639_v4 = vld [vmem:[#allocation30_spill] sm:$0xff]  ;;  %v9643_v34 = vld [vmem:[#allocation33_spill] sm:$0xff] }
 0x2d9   :  { %6365 = vmatmul.msk.bf16.vlgmr.msrb.gmra.mxu2 %vm523_vm0, %v8820_v26 }
 0x2da   :  { %9628 = vst [vmem:[#allocation21_spill] sm:$0xff] %v8811_v61  ;;  %v3086_v33 = vadd.f32 %v2991_v18, %v9633_v53  ;;  %4025 = vmatpush.bf16.msrb.mxu2 %v8646_v12  ;;  %v8844_v12 = vsel %vm3245_vm2, %v3793_v2, %v3798_v50  ;;  %v9644_v18 = vld [vmem:[#allocation68_spill] sm:$0xff]  ;;  %v9648_v53 = vld [vmem:[#allocation38_spill] sm:$0xff]  ;;  %6363 = vmatmul.msk.bf16.vlgmr.msra.gmra.mxu3 %vm523_vm0, %v8820_v26 }
 0x2db   :  { %3926 = vmatpush.bf16.msra.mxu0 %v9625_v20  ;;  %9630 = vst [vmem:[#allocation48_spill] sm:$0xff] %v8814_v11  ;;  %v2952_v37 = vpop.f32.mrf.mxu3  ;;  %v9642_v20 = vld [vmem:[#allocation67_spill] sm:$0xff]  ;;  %3987 = vmatpush.bf16.msra.mxu3 %v8619_v48  ;;  %v9654_v48 = vld [vmem:[#allocation69_spill] sm:$0xff]  ;;  %v9657_v50 = vld [vmem:[#allocation40_spill] sm:$0xff] }
 0x2dc   :  { %3962 = vmatpush.bf16.msrb.mxu1 %v9631_v13  ;;  %v2953_v3 = vadd.f32 %v2952_v37, %v2933_v5  ;;  %v3006_v51 = vpop.f32.mrf.mxu1  ;;  %v8832_v49 = vadd.f32 %v3086_v33, %v9637_v56  ;;  %v3800_v13 = vrot.slane %v9643_v34, 1  ;;  %v9645_v37 = vld [vmem:[#allocation45_spill] sm:$0xff] }
 0x2dd   :  { %v9650_v33 = vld [vmem:[#allocation49_spill] sm:$0xff] }
 0x2de   :  { %v3085_v29 = vadd.f32 %v2953_v3, %v9636_v43  ;;  %9638 = vst [vmem:[#allocation22_spill] sm:$0xff] %v8832_v49  ;;  %4026 = vmatpush.bf16.msrb.mxu2 %v8690_v55  ;;  %v9651_v43 = vld [vmem:[#allocation70_spill] sm:$0xff] }
 0x2df   :  { %3927 = vmatpush.bf16.msra.mxu0 %v9632_v7  ;;  %v3061_v5 = vpop.f32.mrf.mxu2  ;;  %v2973_v36 = vpop.f32.mrf.mxu0  ;;  %3988 = vmatpush.bf16.msra.mxu3 %v8670_v1  ;;  %v9660_v1 = vld [vmem:[#allocation74_spill] sm:$0xff] }
 0x2e0   :  { %3963 = vmatpush.bf16.msrb.mxu1 %v9634_v42  ;;  %v8836_v31 = vadd.f32 %v3085_v29, %v9639_v4  ;;  %v2993_v38 = vadd.f32 %v2992_v41, %v2973_v36  ;;  %v9653_v4 = vld [vmem:[#allocation73_spill] sm:$0xff] }
 0x2e2   :  { %9640 = vst [vmem:[#allocation47_spill] sm:$0xff] %v8836_v31  ;;  %v3092_v8 = vadd.f32 %v2993_v38, %v8592_v9  ;;  %v8860_v9 = vsel %vm3245_vm2, %v3796_v44, %v3800_v13  ;;  %v9652_v44 = vld [vmem:[#allocation71_spill] sm:$0xff]  ;;  %v9659_v38 = vld [vmem:[#allocation72_spill] sm:$0xff] }
 0x2e3   :  { %3928 = vmatpush.bf16.msra.mxu0 %v9635_v16  ;;  %v2954_v35 = vpop.f32.mrf.mxu3 }
 0x2e4   :  { %3964 = vmatpush.bf16.msrb.mxu1 %v9642_v20  ;;  %v2955_v0 = vadd.f32 %v2954_v35, %v2935_v47  ;;  %v3009_v7 = vpop.f32.mrf.mxu1 }
 0x2e5   :  { %3823 = vmatmul.bf16.gmra.mxu1 %v8844_v12 }
 0x2e6   :  { %v3091_v3 = vadd.f32 %v2955_v0, %v9645_v37  ;;  %v9661_v37 = vld [vmem:[#allocation36_spill] sm:$0xff]  ;;  %3861 = vmatmul.bf16.gmra.mxu0 %v8844_v12 }
 0x2e7   :  { %3929 = vmatpush.bf16.msra.mxu0 %v8587_v40  ;;  %v9646_v40 = vld [vmem:[#allocation34_spill] sm:$0xff]  ;;  %v3063_v55 = vpop.f32.mrf.mxu2  ;;  %v3042_v2 = vpop.f32.mrf.mxu0 }
 0x2e8   :  { %3965 = vmatpush.bf16.msrb.mxu1 %v9644_v18  ;;  %v8851_v41 = vadd.f32 %v3092_v8, %v9646_v40  ;;  %v8854_v47 = vadd.f32 %v3091_v3, %v9648_v53  ;;  %v9663_v53 = vld [vmem:[#allocation41_spill] sm:$0xff] }
 0x2e9   :  { %6366 = vmatmul.msk.bf16.gmra.mxu2 %vm523_vm0, %v8860_v9 }
 0x2ea   :  { %9647 = vst [vmem:[#allocation51_spill] sm:$0xff] %v8851_v41  ;;  %6364 = vmatmul.msk.bf16.gmra.mxu3 %vm523_vm0, %v8860_v9 }
 0x2eb   :  { %3930 = vmatpush.bf16.msra.mxu0 %v8607_v59  ;;  %9649 = vst [vmem:[#allocation52_spill] sm:$0xff] %v8854_v47  ;;  %v3062_v59 = vadd.f32 %v3061_v5, %v3042_v2  ;;  %v3023_v42 = vpop.f32.mrf.mxu3 }
 0x2ec   :  { %3966 = vmatpush.bf16.msrb.mxu1 %v8612_v23  ;;  %v3024_v16 = vadd.f32 %v3023_v42, %v3004_v15  ;;  %v3011_v56 = vpop.f32.mrf.mxu1  ;;  %v9655_v23 = vld [vmem:[#allocation39_spill] sm:$0xff] }
 0x2ed   :  { %v3076_v29 = vadd.f32 %v3062_v59, %v9651_v43 }
 0x2ee   :  { %v3075_v30 = vadd.f32 %v3024_v16, %v9654_v48  ;;  %v9667_v16 = vld [vmem:[#allocation35_spill] sm:$0xff] }
 0x2ef   :  { %3931 = vmatpush.bf16.msra.mxu0 %v9650_v33  ;;  %v8873_v5 = vadd.f32 %v3076_v29, %v9655_v23  ;;  %v3066_v15 = vpop.f32.mrf.mxu2  ;;  %v3044_v20 = vpop.f32.mrf.mxu0  ;;  %v9666_v33 = vld [vmem:[#allocation75_spill] sm:$0xff] }
 0x2f0   :  { %3967 = vmatpush.bf16.msrb.mxu1 %v9652_v44  ;;  %v8877_v36 = vadd.f32 %v3075_v30, %v9657_v50  ;;  %v3064_v35 = vadd.f32 %v3063_v55, %v3044_v20  ;;  %v6972_v50 = vld [vmem:[#allocation7 + $0x524] sm:$0xf0] }
 0x2f1   :  { %9656 = vst [vmem:[#allocation50_spill] sm:$0xff] %v8873_v5 }
 0x2f2   :  { %9658 = vst [vmem:[#allocation26_spill] sm:$0xff] %v8877_v36  ;;  %v3082_v34 = vadd.f32 %v3064_v35, %v8657_v57  ;;  %v9671_v35 = vld [vmem:[#allocation43_spill] sm:$0xff] }
 0x2f3   :  { %4000 = vmatpush.bf16.msrb.mxu0 %v9653_v4  ;;  %v3025_v0 = vpop.f32.mrf.mxu3 }
 0x2f4   :  { %3968 = vmatpush.bf16.msrb.mxu1 %v9659_v38  ;;  %v3026_v8 = vadd.f32 %v3025_v0, %v3006_v51  ;;  %v3573_v13 = vpop.f32.mrf.mxu1  ;;  %v8886_v3 = vadd.f32 %v3082_v34, %v9661_v37  ;;  %v9665_v51 = vld [vmem:[#allocation76_spill] sm:$0xff]  ;;  %v6966_v37 = vld [vmem:[#allocation7 + $0x4f4] sm:$0xf0] }
 0x2f5   :  { %3894 = vmatmul.bf16.vlgmr.msra.gmra.mxu1 %v8804_v63 }
 0x2f6   :  { %v3081_v18 = vadd.f32 %v3026_v8, %v9660_v1  ;;  %9662 = vst [vmem:[#allocation53_spill] sm:$0xff] %v8886_v3  ;;  %v6521_v1 = vld [vmem:[#allocation7 + $0x4e0] sm:$0xf]  ;;  %3932 = vmatmul.bf16.vlgmr.msra.gmra.mxu0 %v8804_v63 }
 0x2f7   :  { %4001 = vmatpush.bf16.msrb.mxu0 %v8659_v25  ;;  %v3068_v40 = vpop.f32.mrf.mxu2  ;;  %v3047_v57 = vpop.f32.mrf.mxu0 }
 0x2f8   :  { %3969 = vmatpush.bf16.msrb.mxu1 %v8652_v22  ;;  %v8889_v2 = vadd.f32 %v3081_v18, %v9663_v53  ;;  %v3067_v22 = vadd.f32 %v3066_v15, %v3047_v57  ;;  %v6545_v15 = vld [vmem:[#allocation7 + $0x510] sm:$0xf] }
 0x2f9   :  { %6369 = vmatmul.msk.bf16.vlgmr.msra.gmra.mxu2 %vm523_vm0, %v8820_v26  ;;  %v6546_v20 = vor.u32 %v6972_v50, %v6545_v15  ;;  %v6523_v15 = vld [vmem:[#allocation7 + $0x4f8] sm:$0xf0] }
 0x2fa   :  { %9664 = vst [vmem:[#allocation24_spill] sm:$0xff] %v8889_v2  ;;  %v3088_v55 = vadd.f32 %v3067_v22, %v9665_v51  ;;  %6367 = vmatmul.msk.bf16.vlgmr.msrb.gmra.mxu3 %vm523_vm0, %v8820_v26  ;;  %v6497_v22 = vld [vmem:[#allocation7 + $0x4b0] sm:$0xf]  ;;  %v6465_v2 = vld [vmem:[#allocation7 + $0x460] sm:$0xf] }
 0x2fb   :  { %4002 = vmatpush.bf16.msrb.mxu0 %v8665_v21  ;;  %v3028_v25 = vpop.f32.mrf.mxu3 }
 0x2fc   :  { %v3029_v21 = vadd.f32 %v3028_v25, %v3009_v7  ;;  %v3575_v59 = vpop.f32.mrf.mxu1  ;;  %v8902_v43 = vadd.f32 %v3088_v55, %v9667_v16  ;;  %4338 = vmatpush.bf16.msra.mxu1 %v6546_v20  ;;  %v6960_v25 = vld [vmem:[#allocation7 + $0x4c4] sm:$0xf0]  ;;  %v6981_v55 = vld [vmem:[#allocation7 + $0x574] sm:$0xf]  ;;  %v6547_v16 = vld [vmem:[#allocation7 + $0x528] sm:$0xf0] }
 0x2fd   :  { %v6498_v51 = vor.u32 %v6960_v25, %v6497_v22  ;;  %v6942_v25 = vld [vmem:[#allocation7 + $0x434] sm:$0xf0] }
 0x2fe   :  { %v3087_v42 = vadd.f32 %v3029_v21, %v9666_v33  ;;  %9668 = vst [vmem:[#allocation56_spill] sm:$0xff] %v8902_v43  ;;  %v6969_v33 = vld [vmem:[#allocation7 + $0x514] sm:$0xf] }
 0x2ff   :  { %4003 = vmatpush.bf16.msrb.mxu0 %v8676_v32  ;;  %v3630_v29 = vpop.f32.mrf.mxu2  ;;  %v9669_v32 = vld [vmem:[#allocation44_spill] sm:$0xff]  ;;  %v3049_v7 = vpop.f32.mrf.mxu0  ;;  %v6965_v43 = vld [vmem:[#allocation7 + $0x4f4] sm:$0xf] }
 0x300   :  { %v8905_v44 = vadd.f32 %v3087_v42, %v9669_v32  ;;  %v3069_v4 = vadd.f32 %v3068_v40, %v3049_v7  ;;  %v6522_v40 = vor.u32 %v6966_v37, %v6521_v1  ;;  %v6550_v32 = vor.u32 %v6969_v33, %v6547_v16  ;;  %v6954_v7 = vld [vmem:[#allocation7 + $0x494] sm:$0xf0]  ;;  %v6957_v1 = vld [vmem:[#allocation7 + $0x4b4] sm:$0xf]  ;;  %v6475_v33 = vld [vmem:[#allocation7 + $0x498] sm:$0xf0] }
 0x302   :  { %9670 = vst [vmem:[#allocation55_spill] sm:$0xff] %v8905_v44  ;;  %v3094_v23 = vadd.f32 %v3069_v4, %v8701_v19  ;;  %v6593_v19 = vld [vmem:[#allocation7 + $0x570] sm:$0xf]  ;;  %4339 = vmatpush.bf16.msra.mxu1 %v6522_v40  ;;  %v6978_v40 = vld [vmem:[#allocation7 + $0x554] sm:$0xf0] }
 0x303   :  { %4004 = vmatpush.bf16.msrb.mxu0 %v8688_v14  ;;  %v3030_v48 = vpop.f32.mrf.mxu3 }
 0x304   :  { %v3031_v30 = vadd.f32 %v3030_v48, %v3011_v56  ;;  %v8909_v14 = vpop.f32.mrf.mxu1  ;;  %v8914_v0 = vadd.f32 %v3094_v23, %v9671_v35  ;;  %v6984_v56 = vld [vmem:[#allocation7 + $0x584] sm:$0xf0]  ;;  %v6963_v23 = vld [vmem:[#allocation7 + $0x4e4] sm:$0xf]  ;;  %v6449_v35 = vld [vmem:[#allocation7 + $0x450] sm:$0xf] }
 0x305   :  { %3899 = vmatmul.bf16.gmra.mxu1 %v8844_v12  ;;  %v6526_v20 = vor.u32 %v6963_v23, %v6523_v15  ;;  %v6571_v23 = vld [vmem:[#allocation7 + $0x558] sm:$0xf0]  ;;  %v6945_v15 = vld [vmem:[#allocation7 + $0x454] sm:$0xf] }
 0x306   :  { %v3093_v38 = vadd.f32 %v3031_v30, %v8699_v6  ;;  %9672 = vst [vmem:[#allocation54_spill] sm:$0xff] %v8914_v0  ;;  %4340 = vmatpush.bf16.msra.mxu1 %v6498_v51  ;;  %3937 = vmatmul.bf16.gmra.mxu0 %v8844_v12 }
 0x307   :  { %4005 = vmatpush.bf16.msrb.mxu0 %v8696_v46  ;;  %v3632_v8 = vpop.f32.mrf.mxu2  ;;  %v9673_v46 = vld [vmem:[#allocation37_spill] sm:$0xff]  ;;  %v3611_v18 = vpop.f32.mrf.mxu0 }
 0x308   :  { %v8917_v34 = vadd.f32 %v3093_v38, %v9673_v46  ;;  %v8923_v6 = vadd.f32 %v3630_v29, %v3611_v18  ;;  %v6948_v46 = vld [vmem:[#allocation7 + $0x464] sm:$0xf0]  ;;  %v6499_v18 = vld [vmem:[#allocation7 + $0x4c8] sm:$0xf0] }
 0x309   :  { %6370 = vmatmul.msk.bf16.gmra.mxu2 %vm523_vm0, %v8860_v9  ;;  %v6502_v37 = vor.u32 %v6957_v1, %v6499_v18 }
 0x30a   :  { %9674 = vst [vmem:[#allocation57_spill] sm:$0xff] %v8917_v34  ;;  %6368 = vmatmul.msk.bf16.gmra.mxu3 %vm523_vm0, %v8860_v9  ;;  %v6561_v34 = vld [vmem:[#allocation7 + $0x520] sm:$0xf] }
 0x30b   :  { %4006 = vmatpush.bf16.msrb.mxu0 %v8706_v45  ;;  %v6594_v45 = vor.u32 %v6984_v56, %v6593_v19  ;;  %v3592_v53 = vpop.f32.mrf.mxu3  ;;  %v6450_v56 = vor.u32 %v6948_v46, %v6449_v35  ;;  %v6377_v46 = vld [vmem:[#allocation7 + $0x3c0] sm:$0xf] }
 0x30c   :  { %v8925_v57 = vadd.f32 %v3592_v53, %v3573_v13  ;;  %v8930_v21 = vpop.f32.mrf.mxu1  ;;  %v6473_v13 = vld [vmem:[#allocation7 + $0x480] sm:$0xf] }
 0x30d   :  { %4363 = vmatpush.bf16.msrb.mxu3 %v6594_v45  ;;  %v6474_v48 = vor.u32 %v6954_v7, %v6473_v13  ;;  %v6401_v13 = vld [vmem:[#allocation7 + $0x3f0] sm:$0xf]  ;;  %v6936_v7 = vld [vmem:[#allocation7 + $0x404] sm:$0xf0] }
 0x30f   :  { %4007 = vmatpush.bf16.msrb.mxu0 %v8715_v52  ;;  %v6595_v52 = vld [vmem:[#allocation7 + $0x588] sm:$0xf0]  ;;  %v3635_v29 = vpop.f32.mrf.mxu2  ;;  %v3613_v4 = vpop.f32.mrf.mxu0  ;;  %4341 = vmatpush.bf16.msra.mxu1 %v6474_v48  ;;  %v6975_v48 = vld [vmem:[#allocation7 + $0x544] sm:$0xf] }
 0x310   :  { %v6598_v42 = vor.u32 %v6981_v55, %v6595_v52  ;;  %v8932_v30 = vadd.f32 %v3632_v8, %v3613_v4  ;;  %v6569_v8 = vld [vmem:[#allocation7 + $0x540] sm:$0xf]  ;;  %v6951_v52 = vld [vmem:[#allocation7 + $0x484] sm:$0xf] }
 0x311   :  { %v6570_v22 = vor.u32 %v6978_v40, %v6569_v8  ;;  %v6478_v16 = vor.u32 %v6951_v52, %v6475_v33  ;;  %v6939_v8 = vld [vmem:[#allocation7 + $0x424] sm:$0xf]  ;;  %v6427_v40 = vld [vmem:[#allocation7 + $0x438] sm:$0xf0] }
 0x312   :  { %4401 = vmatpush.bf16.msra.mxu2 %v6598_v42 }
 0x313   :  { %4376 = vmatpush.bf16.msra.mxu0 %v6550_v32  ;;  %v3594_v50 = vpop.f32.mrf.mxu3  ;;  %4342 = vmatpush.bf16.msra.mxu1 %v6450_v56  ;;  %v6930_v56 = vld [vmem:[#allocation7 + $0x3d4] sm:$0xf0] }
 0x314   :  { %v8934_v38 = vadd.f32 %v3594_v50, %v3575_v59  ;;  %v8936_v19 = vpop.f32.mrf.mxu1  ;;  %v6425_v59 = vld [vmem:[#allocation7 + $0x420] sm:$0xf]  ;;  %4364 = vmatpush.bf16.msrb.mxu3 %v6570_v22  ;;  %v6574_v50 = vor.u32 %v6975_v48, %v6571_v23  ;;  %v6378_v18 = vor.u32 %v6930_v56, %v6377_v46  ;;  %v6379_v46 = vld [vmem:[#allocation7 + $0x3d8] sm:$0xf0] }
 0x315   :  { %3970 = vmatmul.bf16.vlgmr.msrb.gmra.mxu1 %v8804_v63  ;;  %v6426_v55 = vor.u32 %v6942_v25, %v6425_v59  ;;  %v6553_v25 = vld [vmem:[#allocation7 + $0x518] sm:$0xf] }
 0x316   :  { %4402 = vmatpush.bf16.msra.mxu2 %v6574_v50  ;;  %4008 = vmatmul.bf16.vlgmr.msrb.gmra.mxu0 %v8804_v63 }
 0x317   :  { %4377 = vmatpush.bf16.msra.mxu0 %v6526_v20  ;;  %v3637_v45 = vpop.f32.mrf.mxu2  ;;  %v3616_v53 = vpop.f32.mrf.mxu0  ;;  %4343 = vmatpush.bf16.msra.mxu1 %v6426_v55  ;;  %v6451_v20 = vld [vmem:[#allocation7 + $0x468] sm:$0xf0]  ;;  %v6973_v55 = vld [vmem:[#allocation7 + $0x52c] sm:$0xf0] }
 0x318   :  { %v8941_v51 = vadd.f32 %v3635_v29, %v3616_v53  ;;  %v6402_v29 = vor.u32 %v6936_v7, %v6401_v13  ;;  %v6430_v53 = vor.u32 %v6939_v8, %v6427_v40  ;;  %v6554_v33 = vor.u32 %v6973_v55, %v6553_v25  ;;  %v6601_v7 = vld [vmem:[#allocation7 + $0x578] sm:$0xf]  ;;  %v6961_v40 = vld [vmem:[#allocation7 + $0x4cc] sm:$0xf0]  ;;  %v6603_v25 = vld [vmem:[#allocation7 + $0x590] sm:$0xf0] }
 0x319   :  { %6373 = vmatmul.msk.bf16.vlgmr.msrb.gmra.mxu2 %vm523_vm0, %v8820_v26  ;;  %v6505_v8 = vld [vmem:[#allocation7 + $0x4b8] sm:$0xf]  ;;  %v6970_v55 = vld [vmem:[#allocation7 + $0x51c] sm:$0xf] }
 0x31a   :  { %6371 = vmatmul.msk.bf16.vlgmr.msra.gmra.mxu3 %vm523_vm0, %v8820_v26 }
 0x31b   :  { %4378 = vmatpush.bf16.msra.mxu0 %v6502_v37  ;;  %v3597_v42 = vpop.f32.mrf.mxu3  ;;  %4344 = vmatpush.bf16.msra.mxu1 %v6402_v29  ;;  %v6529_v29 = vld [vmem:[#allocation7 + $0x4e8] sm:$0xf] }
 0x31c   :  { %v8944_v32 = vadd.f32 %v3597_v42, %v8909_v14  ;;  %v8949_v4 = vpop.f32.mrf.mxu1  ;;  %v6454_v14 = vor.u32 %v6945_v15, %v6451_v20  ;;  %v6933_v42 = vld [vmem:[#allocation7 + $0x3f4] sm:$0xf]  ;;  %v6967_v15 = vld [vmem:[#allocation7 + $0x4fc] sm:$0xf0] }
 0x31d   :  { %v6530_v20 = vor.u32 %v6967_v15, %v6529_v29  ;;  %v6531_v15 = vld [vmem:[#allocation7 + $0x500] sm:$0xf0] }
 0x31f   :  { %4379 = vmatpush.bf16.msra.mxu0 %v6478_v16  ;;  %v3706_v35 = vpop.f32.mrf.mxu2  ;;  %v3618_v1 = vpop.f32.mrf.mxu0  ;;  %4345 = vmatpush.bf16.msra.mxu1 %v6378_v18  ;;  %v6403_v16 = vld [vmem:[#allocation7 + $0x408] sm:$0xf0] }
 0x320   :  { %v8951_v37 = vadd.f32 %v3637_v45, %v3618_v1  ;;  %v6406_v45 = vor.u32 %v6933_v42, %v6403_v16  ;;  %v6555_v42 = vld [vmem:[#allocation7 + $0x530] sm:$0xf0] }
 0x323   :  { %4380 = vmatpush.bf16.msra.mxu0 %v6454_v14  ;;  %v3599_v59 = vpop.f32.mrf.mxu3  ;;  %4414 = vmatpush.bf16.msrb.mxu1 %v6554_v33  ;;  %v6927_v14 = vld [vmem:[#allocation7 + $0x3c4] sm:$0xf] }
 0x324   :  { %v8954_v22 = vadd.f32 %v3599_v59, %v8930_v21  ;;  %v8956_v52 = vpop.f32.mrf.mxu1  ;;  %v6985_v21 = vld [vmem:[#allocation7 + $0x58c] sm:$0xf0]  ;;  %v6382_v1 = vor.u32 %v6927_v14, %v6379_v46 }
 0x325   :  { %3975 = vmatmul.bf16.gmra.mxu1 %v8844_v12  ;;  %v6602_v23 = vor.u32 %v6985_v21, %v6601_v7  ;;  %v6955_v7 = vld [vmem:[#allocation7 + $0x49c] sm:$0xf0] }
 0x326   :  { %4013 = vmatmul.bf16.gmra.mxu0 %v8844_v12 }
 0x327   :  { %4381 = vmatpush.bf16.msra.mxu0 %v6430_v53  ;;  %v3708_v13 = vpop.f32.mrf.mxu2  ;;  %v3687_v48 = vpop.f32.mrf.mxu0  ;;  %4439 = vmatpush.bf16.msra.mxu3 %v6602_v23  ;;  %v6982_v53 = vld [vmem:[#allocation7 + $0x57c] sm:$0xf]  ;;  %v6964_v23 = vld [vmem:[#allocation7 + $0x4ec] sm:$0xf] }
 0x328   :  { %v8961_v50 = vadd.f32 %v3706_v35, %v3687_v48  ;;  %4415 = vmatpush.bf16.msrb.mxu1 %v6530_v20  ;;  %v6506_v35 = vor.u32 %v6961_v40, %v6505_v8  ;;  %v6606_v33 = vor.u32 %v6982_v53, %v6603_v25  ;;  %v6534_v14 = vor.u32 %v6964_v23, %v6531_v15  ;;  %v6958_v53 = vld [vmem:[#allocation7 + $0x4bc] sm:$0xf]  ;;  %v6483_v23 = vld [vmem:[#allocation7 + $0x4a0] sm:$0xf0] }
 0x329   :  { %6374 = vmatmul.msk.bf16.gmra.mxu2 %vm523_vm0, %v8860_v9 }
 0x32a   :  { %4477 = vmatpush.bf16.msrb.mxu2 %v6606_v33  ;;  %6372 = vmatmul.msk.bf16.gmra.mxu3 %vm523_vm0, %v8860_v9  ;;  %v6979_v33 = vld [vmem:[#allocation7 + $0x55c] sm:$0xf0] }
 0x32b   :  { %4382 = vmatpush.bf16.msra.mxu0 %v6406_v45  ;;  %v3668_v56 = vpop.f32.mrf.mxu3  ;;  %v6481_v45 = vld [vmem:[#allocation7 + $0x488] sm:$0xf] }
 0x32c   :  { %v8964_v18 = vadd.f32 %v3668_v56, %v8936_v19  ;;  %v8969_v59 = vpop.f32.mrf.mxu1  ;;  %v6558_v19 = vor.u32 %v6970_v55, %v6555_v42  ;;  %4416 = vmatpush.bf16.msrb.mxu1 %v6506_v35  ;;  %v6482_v29 = vor.u32 %v6955_v7, %v6481_v45  ;;  %v6457_v56 = vld [vmem:[#allocation7 + $0x458] sm:$0xf]  ;;  %v6507_v35 = vld [vmem:[#allocation7 + $0x4d0] sm:$0xf0]  ;;  %v6943_v45 = vld [vmem:[#allocation7 + $0x43c] sm:$0xf0] }
 0x32d   :  { %v6510_v55 = vor.u32 %v6958_v53, %v6507_v35  ;;  %v6976_v53 = vld [vmem:[#allocation7 + $0x54c] sm:$0xf]  ;;  %v6579_v35 = vld [vmem:[#allocation7 + $0x560] sm:$0xf0] }
 0x32f   :  { %4383 = vmatpush.bf16.msra.mxu0 %v6382_v1  ;;  %v3711_v16 = vpop.f32.mrf.mxu2  ;;  %v3689_v21 = vpop.f32.mrf.mxu0  ;;  %v6949_v1 = vld [vmem:[#allocation7 + $0x46c] sm:$0xf0] }
 0x330   :  { %v8971_v48 = vadd.f32 %v3708_v13, %v3689_v21  ;;  %4417 = vmatpush.bf16.msrb.mxu1 %v6482_v29  ;;  %v6458_v40 = vor.u32 %v6949_v1, %v6457_v56  ;;  %v6577_v13 = vld [vmem:[#allocation7 + $0x548] sm:$0xf]  ;;  %v6952_v29 = vld [vmem:[#allocation7 + $0x48c] sm:$0xf]  ;;  %v6409_v56 = vld [vmem:[#allocation7 + $0x3f8] sm:$0xf] }
 0x331   :  { %v6937_v1 = vld [vmem:[#allocation7 + $0x40c] sm:$0xf0] }
 0x333   :  { %4452 = vmatpush.bf16.msrb.mxu0 %v6558_v19  ;;  %v3670_v20 = vpop.f32.mrf.mxu3  ;;  %v6578_v19 = vor.u32 %v6979_v33, %v6577_v13  ;;  %v6582_v33 = vor.u32 %v6976_v53, %v6579_v35  ;;  %v6974_v53 = vld [vmem:[#allocation7 + $0x534] sm:$0xf0] }
 0x334   :  { %v8974_v46 = vadd.f32 %v3670_v20, %v8949_v4  ;;  %v8976_v8 = vpop.f32.mrf.mxu1  ;;  %v6433_v4 = vld [vmem:[#allocation7 + $0x428] sm:$0xf]  ;;  %4418 = vmatpush.bf16.msrb.mxu1 %v6458_v40  ;;  %v6486_v20 = vor.u32 %v6952_v29, %v6483_v23 }
 0x335   :  { %4346 = vmatmul.bf16.vlgmr.msra.gmra.mxu1 %v8804_v63  ;;  %v6434_v21 = vor.u32 %v6943_v45, %v6433_v4  ;;  %4440 = vmatpush.bf16.msra.mxu3 %v6578_v19  ;;  %v6459_v4 = vld [vmem:[#allocation7 + $0x470] sm:$0xf0]  ;;  %v6931_v19 = vld [vmem:[#allocation7 + $0x3dc] sm:$0xf0] }
 0x336   :  { %4478 = vmatpush.bf16.msrb.mxu2 %v6582_v33  ;;  %v6411_v33 = vld [vmem:[#allocation7 + $0x410] sm:$0xf0]  ;;  %4384 = vmatmul.bf16.vlgmr.msra.gmra.mxu0 %v8804_v63 }
 0x337   :  { %4453 = vmatpush.bf16.msrb.mxu0 %v6534_v14  ;;  %v3713_v25 = vpop.f32.mrf.mxu2  ;;  %v3692_v42 = vpop.f32.mrf.mxu0 }
 0x338   :  { %v8981_v7 = vadd.f32 %v3711_v16, %v3692_v42  ;;  %4419 = vmatpush.bf16.msrb.mxu1 %v6434_v21  ;;  %v6410_v16 = vor.u32 %v6937_v1, %v6409_v56  ;;  %v6385_v42 = vld [vmem:[#allocation7 + $0x3c8] sm:$0xf]  ;;  %v6435_v21 = vld [vmem:[#allocation7 + $0x440] sm:$0xf0] }
 0x339   :  { %6617 = vmatmul.msk.bf16.vlgmr.msra.gmra.mxu2 %vm523_vm0, %v8820_v26  ;;  %v6386_v29 = vor.u32 %v6931_v19, %v6385_v42  ;;  %v6537_v42 = vld [vmem:[#allocation7 + $0x4f0] sm:$0xf] }
 0x33a   :  { %6615 = vmatmul.msk.bf16.vlgmr.msrb.gmra.mxu3 %vm523_vm0, %v8820_v26 }
 0x33b   :  { %4454 = vmatpush.bf16.msrb.mxu0 %v6510_v55  ;;  %v3673_v15 = vpop.f32.mrf.mxu3  ;;  %v6946_v55 = vld [vmem:[#allocation7 + $0x45c] sm:$0xf] }
 0x33c   :  { %v8984_v14 = vadd.f32 %v3673_v15, %v8956_v52  ;;  %v8989_v40 = vpop.f32.mrf.mxu1  ;;  %v6462_v52 = vor.u32 %v6946_v55, %v6459_v4  ;;  %4420 = vmatpush.bf16.msrb.mxu1 %v6410_v16  ;;  %v6940_v15 = vld [vmem:[#allocation7 + $0x42c] sm:$0xf]  ;;  %v6562_v55 = vor.u32 %v6974_v53, %v6561_v34  ;;  %v6934_v16 = vld [vmem:[#allocation7 + $0x3fc] sm:$0xf] }
 0x33d   :  { %v6438_v56 = vor.u32 %v6940_v15, %v6435_v21  ;;  %v6968_v15 = vld [vmem:[#allocation7 + $0x504] sm:$0xf0] }
 0x33e   :  { %v6538_v34 = vor.u32 %v6968_v15, %v6537_v42  ;;  %v6971_v42 = vld [vmem:[#allocation7 + $0x524] sm:$0xf]  ;;  %v6563_v15 = vld [vmem:[#allocation7 + $0x538] sm:$0xf0] }
 0x33f   :  { %4455 = vmatpush.bf16.msrb.mxu0 %v6486_v20  ;;  %v3782_v13 = vpop.f32.mrf.mxu2  ;;  %v3694_v45 = vpop.f32.mrf.mxu0 }
 0x340   :  { %v8991_v23 = vadd.f32 %v3713_v25, %v3694_v45  ;;  %4421 = vmatpush.bf16.msrb.mxu1 %v6386_v29  ;;  %v6414_v25 = vor.u32 %v6934_v16, %v6411_v33  ;;  %v6928_v29 = vld [vmem:[#allocation7 + $0x3cc] sm:$0xf]  ;;  %v6513_v16 = vld [vmem:[#allocation7 + $0x4c0] sm:$0xf]  ;;  %v6962_v33 = vld [vmem:[#allocation7 + $0x4d4] sm:$0xf0] }
 0x343   :  { %4456 = vmatpush.bf16.msrb.mxu0 %v6462_v52  ;;  %v3675_v20 = vpop.f32.mrf.mxu3  ;;  %v6609_v52 = vld [vmem:[#allocation7 + $0x580] sm:$0xf] }
 0x344   :  { %v8994_v1 = vadd.f32 %v3675_v20, %v8969_v59  ;;  %v8996_v35 = vpop.f32.mrf.mxu1  ;;  %4490 = vmatpush.bf16.msra.mxu1 %v6562_v55  ;;  %v6986_v59 = vld [vmem:[#allocation7 + $0x594] sm:$0xf0]  ;;  %v6387_v20 = vld [vmem:[#allocation7 + $0x3e0] sm:$0xf0] }
 0x345   :  { %4351 = vmatmul.bf16.gmra.mxu1 %v8844_v12  ;;  %v6610_v45 = vor.u32 %v6986_v59, %v6609_v52  ;;  %v6390_v53 = vor.u32 %v6928_v29, %v6387_v20  ;;  %v6611_v59 = vld [vmem:[#allocation7 + $0x598] sm:$0xf0]  ;;  %v6489_v29 = vld [vmem:[#allocation7 + $0x490] sm:$0xf]  ;;  %v6956_v20 = vld [vmem:[#allocation7 + $0x4a4] sm:$0xf0] }
 0x346   :  { %v6490_v0 = vor.u32 %v6956_v20, %v6489_v29  ;;  %4389 = vmatmul.bf16.gmra.mxu0 %v8844_v12 }
 0x347   :  { %4457 = vmatpush.bf16.msrb.mxu0 %v6438_v56  ;;  %v3784_v4 = vpop.f32.mrf.mxu2  ;;  %v3763_v19 = vpop.f32.mrf.mxu0  ;;  %4515 = vmatpush.bf16.msrb.mxu3 %v6610_v45 }
 0x348   :  { %v9001_v21 = vadd.f32 %v3782_v13, %v3763_v19  ;;  %4491 = vmatpush.bf16.msra.mxu1 %v6538_v34  ;;  %v6514_v13 = vor.u32 %v6962_v33, %v6513_v16  ;;  %v6539_v34 = vld [vmem:[#allocation7 + $0x508] sm:$0xf0] }
 0x349   :  { %6618 = vmatmul.msk.bf16.gmra.mxu2 %vm523_vm0, %v8860_v9 }
 0x34a   :  { %6616 = vmatmul.msk.bf16.gmra.mxu3 %vm523_vm0, %v8860_v9 }
 0x34b   :  { %4458 = vmatpush.bf16.msrb.mxu0 %v6414_v25  ;;  %v3744_v56 = vpop.f32.mrf.mxu3  ;;  %v6983_v25 = vld [vmem:[#allocation7 + $0x584] sm:$0xf] }
 0x34c   :  { %v9004_v55 = vadd.f32 %v3744_v56, %v8976_v8  ;;  %v9009_v52 = vpop.f32.mrf.mxu1  ;;  %v6614_v45 = vor.u32 %v6983_v25, %v6611_v59  ;;  %v6566_v8 = vor.u32 %v6971_v42, %v6563_v15  ;;  %4492 = vmatpush.bf16.msra.mxu1 %v6514_v13  ;;  %v6950_v25 = vld [vmem:[#allocation7 + $0x474] sm:$0xf0]  ;;  %v6959_v13 = vld [vmem:[#allocation7 + $0x4c4] sm:$0xf] }
 0x34d   :  { %v6466_v42 = vor.u32 %v6950_v25, %v6465_v2 }
 0x34e   :  { %4553 = vmatpush.bf16.msra.mxu2 %v6614_v45  ;;  %v6515_v45 = vld [vmem:[#allocation7 + $0x4d8] sm:$0xf0] }
 0x34f   :  { %4459 = vmatpush.bf16.msrb.mxu0 %v6390_v53  ;;  %v3787_v19 = vpop.f32.mrf.mxu2  ;;  %v3765_v56 = vpop.f32.mrf.mxu0  ;;  %v6542_v53 = vor.u32 %v6965_v43, %v6539_v34  ;;  %v6585_v43 = vld [vmem:[#allocation7 + $0x550] sm:$0xf] }
 0x350   :  { %v9011_v44 = vadd.f32 %v3784_v4, %v3765_v56  ;;  %4493 = vmatpush.bf16.msra.mxu1 %v6490_v0  ;;  %v6518_v4 = vor.u32 %v6959_v13, %v6515_v45  ;;  %v6944_v56 = vld [vmem:[#allocation7 + $0x444] sm:$0xf0]  ;;  %v6953_v0 = vld [vmem:[#allocation7 + $0x494] sm:$0xf]  ;;  %v6938_v45 = vld [vmem:[#allocation7 + $0x414] sm:$0xf0] }
 0x353   :  { %4528 = vmatpush.bf16.msra.mxu0 %v6566_v8  ;;  %v3746_v16 = vpop.f32.mrf.mxu3  ;;  %v6980_v8 = vld [vmem:[#allocation7 + $0x564] sm:$0xf0] }
 0x354   :  { %v9014_v33 = vadd.f32 %v3746_v16, %v8989_v40  ;;  %v9016_v59 = vpop.f32.mrf.mxu1  ;;  %v6441_v40 = vld [vmem:[#allocation7 + $0x430] sm:$0xf]  ;;  %4494 = vmatpush.bf16.msra.mxu1 %v6466_v42  ;;  %v6586_v20 = vor.u32 %v6980_v8, %v6585_v43  ;;  %v6491_v16 = vld [vmem:[#allocation7 + $0x4a8] sm:$0xf0]  ;;  %v6417_v42 = vld [vmem:[#allocation7 + $0x400] sm:$0xf] }
 0x355   :  { %4422 = vmatmul.bf16.vlgmr.msrb.gmra.mxu1 %v8804_v63  ;;  %v6442_v2 = vor.u32 %v6944_v56, %v6441_v40  ;;  %v6494_v25 = vor.u32 %v6953_v0, %v6491_v16  ;;  %v6587_v8 = vld [vmem:[#allocation7 + $0x568] sm:$0xf0]  ;;  %v6947_v40 = vld [vmem:[#allocation7 + $0x464] sm:$0xf]  ;;  %v6393_v0 = vld [vmem:[#allocation7 + $0x3d0] sm:$0xf] }
 0x356   :  { %4516 = vmatpush.bf16.msrb.mxu3 %v6586_v20  ;;  %v6932_v16 = vld [vmem:[#allocation7 + $0x3e4] sm:$0xf0]  ;;  %4460 = vmatmul.bf16.vlgmr.msrb.gmra.mxu0 %v8804_v63 }
 0x357   :  { %4529 = vmatpush.bf16.msra.mxu0 %v6542_v53  ;;  %v3789_v15 = vpop.f32.mrf.mxu2  ;;  %v3768_v29 = vpop.f32.mrf.mxu0  ;;  %v6394_v3 = vor.u32 %v6932_v16, %v6393_v0 }
 0x358   :  { %v9021_v34 = vadd.f32 %v3787_v19, %v3768_v29  ;;  %4495 = vmatpush.bf16.msra.mxu1 %v6442_v2  ;;  %v6418_v19 = vor.u32 %v6938_v45, %v6417_v42  ;;  %v6941_v2 = vld [vmem:[#allocation7 + $0x434] sm:$0xf]  ;;  %v6443_v42 = vld [vmem:[#allocation7 + $0x448] sm:$0xf0] }
 0x359   :  { %6621 = vmatmul.msk.bf16.vlgmr.msrb.gmra.mxu2 %vm523_vm0, %v8820_v26  ;;  %v6446_v45 = vor.u32 %v6941_v2, %v6443_v42 }
 0x35a   :  { %6619 = vmatmul.msk.bf16.vlgmr.msra.gmra.mxu3 %vm523_vm0, %v8820_v26 }
 0x35b   :  { %4530 = vmatpush.bf16.msra.mxu0 %v6518_v4  ;;  %v3749_v53 = vpop.f32.mrf.mxu3  ;;  %v6977_v4 = vld [vmem:[#allocation7 + $0x554] sm:$0xf] }
 0x35c   :  { %v9024_v13 = vadd.f32 %v3749_v53, %v8996_v35  ;;  %v9029_v43 = vpop.f32.mrf.mxu1  ;;  %v6590_v20 = vor.u32 %v6977_v4, %v6587_v8  ;;  %v6467_v35 = vld [vmem:[#allocation7 + $0x478] sm:$0xf0]  ;;  %4496 = vmatpush.bf16.msra.mxu1 %v6418_v19  ;;  %v6935_v4 = vld [vmem:[#allocation7 + $0x404] sm:$0xf] }
 0x35d   :  { %v6470_v56 = vor.u32 %v6947_v40, %v6467_v35  ;;  %v6419_v8 = vld [vmem:[#allocation7 + $0x418] sm:$0xf0] }
 0x35e   :  { %4554 = vmatpush.bf16.msra.mxu2 %v6590_v20  ;;  %v6422_v19 = vor.u32 %v6935_v4, %v6419_v8  ;;  %v6929_v20 = vld [vmem:[#allocation7 + $0x3d4] sm:$0xf] }
 0x35f   :  { %4531 = vmatpush.bf16.msra.mxu0 %v6494_v25  ;;  %v9031_v29 = vpop.f32.mrf.mxu2  ;;  %v3770_v53 = vpop.f32.mrf.mxu0 }
 0x360   :  { %v9033_v36 = vadd.f32 %v3789_v15, %v3770_v53  ;;  %4497 = vmatpush.bf16.msra.mxu1 %v6394_v3 }
 0x363   :  { %4532 = vmatpush.bf16.msra.mxu0 %v6470_v56  ;;  %v3751_v25 = vpop.f32.mrf.mxu3 }
 0x364   :  { %v9036_v5 = vadd.f32 %v3751_v25, %v9009_v52  ;;  %v9038_v47 = vpop.f32.mrf.mxu1  ;;  %v6395_v52 = vld [vmem:[#allocation7 + $0x3e8] sm:$0xf0] }
 0x365   :  { %4427 = vmatmul.bf16.gmra.mxu1 %v8844_v12  ;;  %v6398_v56 = vor.u32 %v6929_v20, %v6395_v52 }
 0x366   :  { %4465 = vmatmul.bf16.gmra.mxu0 %v8844_v12 }
 0x367   :  { %4533 = vmatpush.bf16.msra.mxu0 %v6446_v45  ;;  %v9040_v40 = vpop.f32.mrf.mxu2  ;;  %v9045_v15 = vpop.f32.mrf.mxu0 }
 0x369   :  { %6622 = vmatmul.msk.bf16.gmra.mxu2 %vm523_vm0, %v8860_v9 }
 0x36a   :  { %6620 = vmatmul.msk.bf16.gmra.mxu3 %vm523_vm0, %v8860_v9 }
 0x36b   :  { %4534 = vmatpush.bf16.msra.mxu0 %v6422_v19  ;;  %v9047_v35 = vpop.f32.mrf.mxu3 }
 0x36c   :  { %v9052_v3 = vpop.f32.mrf.mxu1 }
 0x36f   :  { %4535 = vmatpush.bf16.msra.mxu0 %v6398_v56  ;;  %v9054_v0 = vpop.f32.mrf.mxu2  ;;  %v9056_v16 = vpop.f32.mrf.mxu0 }
 0x373   :  { %v9058_v53 = vpop.f32.mrf.mxu3 }
 0x374   :  { %v3895_v2 = vpop.f32.mrf.mxu1 }
 0x375   :  { %4498 = vmatmul.bf16.vlgmr.msra.gmra.mxu1 %v8804_v63  ;;  %v3896_v61 = vadd.f32 %v3895_v2, %v8964_v18 }
 0x376   :  { %4536 = vmatmul.bf16.vlgmr.msra.gmra.mxu0 %v8804_v63 }
 0x377   :  { %v9060_v42 = vpop.f32.mrf.mxu2  ;;  %v9065_v25 = vpop.f32.mrf.mxu0 }
 0x379   :  { %6625 = vmatmul.msk.bf16.vlgmr.msra.gmra.mxu2 %vm523_vm0, %v8820_v26 }
 0x37a   :  { %6623 = vmatmul.msk.bf16.vlgmr.msrb.gmra.mxu3 %vm523_vm0, %v8820_v26 }
 0x37b   :  { %v9067_v45 = vpop.f32.mrf.mxu3 }
 0x37c   :  { %v3897_v4 = vpop.f32.mrf.mxu1 }
 0x37d   :  { %v3898_v8 = vadd.f32 %v3897_v4, %v8974_v46 }
 0x37f   :  { %v3952_v19 = vpop.f32.mrf.mxu2  ;;  %v3864_v20 = vpop.f32.mrf.mxu0 }
 0x380   :  { %v9074_v52 = vadd.f32 %v3864_v20, %v8951_v37 }
 0x383   :  { %v9076_v56 = vpop.f32.mrf.mxu3 }
 0x384   :  { %v3900_v41 = vpop.f32.mrf.mxu1 }
 0x385   :  { %v3901_v31 = vadd.f32 %v3900_v41, %v8984_v14  ;;  %4503 = vmatmul.bf16.gmra.mxu1 %v8844_v12 }
 0x386   :  { %4541 = vmatmul.bf16.gmra.mxu0 %v8844_v12 }
 0x387   :  { %v3954_v49 = vpop.f32.mrf.mxu2  ;;  %v3933_v11 = vpop.f32.mrf.mxu0 }
 0x388   :  { %v3934_v46 = vadd.f32 %v3933_v11, %v8961_v50 }
 0x389   :  { %6626 = vmatmul.msk.bf16.gmra.mxu2 %vm523_vm0, %v8860_v9 }
 0x38a   :  { %v9086_v37 = vadd.f32 %v3952_v19, %v3934_v46  ;;  %6624 = vmatmul.msk.bf16.gmra.mxu3 %vm523_vm0, %v8860_v9 }
 0x38b   :  { %v3914_v4 = vpop.f32.mrf.mxu3 }
 0x38c   :  { %v9084_v27 = vadd.f32 %v3914_v4, %v3896_v61  ;;  %v3902_v41 = vpop.f32.mrf.mxu1 }
 0x38d   :  { %v3903_v26 = vadd.f32 %v3902_v41, %v8994_v1 }
 0x38f   :  { %v3957_v14 = vpop.f32.mrf.mxu2  ;;  %v3935_v20 = vpop.f32.mrf.mxu0 }
 0x390   :  { %v3936_v28 = vadd.f32 %v3935_v20, %v8971_v48 }
 0x392   :  { %v9095_v11 = vadd.f32 %v3954_v49, %v3936_v28 }
 0x393   :  { %v3916_v18 = vpop.f32.mrf.mxu3 }
 0x394   :  { %v9093_v2 = vadd.f32 %v3916_v18, %v3898_v8  ;;  %v3971_v61 = vpop.f32.mrf.mxu1 }
 0x395   :  { %v3972_v50 = vadd.f32 %v3971_v61, %v9004_v55 }
 0x397   :  { %v3959_v19 = vpop.f32.mrf.mxu2  ;;  %v3938_v63 = vpop.f32.mrf.mxu0 }
 0x398   :  { %v3939_v46 = vadd.f32 %v3938_v63, %v8981_v7 }
 0x39a   :  { %v9103_v41 = vadd.f32 %v3957_v14, %v3939_v46 }
 0x39b   :  { %v3919_v1 = vpop.f32.mrf.mxu3 }
 0x39c   :  { %v9101_v4 = vadd.f32 %v3919_v1, %v3901_v31  ;;  %v3973_v48 = vpop.f32.mrf.mxu1 }
 0x39d   :  { %v3974_v28 = vadd.f32 %v3973_v48, %v9014_v33 }
 0x39f   :  { %v4028_v49 = vpop.f32.mrf.mxu2  ;;  %v3940_v8 = vpop.f32.mrf.mxu0 }
 0x3a0   :  { %v3941_v55 = vadd.f32 %v3940_v8, %v8991_v23 }
 0x3a2   :  { %v9110_v9 = vadd.f32 %v3959_v19, %v3941_v55 }
 0x3a3   :  { %v3921_v20 = vpop.f32.mrf.mxu3 }
 0x3a4   :  { %v9108_v18 = vadd.f32 %v3921_v20, %v3903_v26  ;;  %v3976_v7 = vpop.f32.mrf.mxu1 }
 0x3a5   :  { %v3977_v31 = vadd.f32 %v3976_v7, %v9024_v13 }
 0x3a7   :  { %v4030_v61 = vpop.f32.mrf.mxu2  ;;  %v4009_v14 = vpop.f32.mrf.mxu0 }
 0x3a8   :  { %v4010_v63 = vadd.f32 %v4009_v14, %v9001_v21  ;;  %v4677_v14 = vld [vmem:[#allocation9 + $0x78] sm:$0xff] }
 0x3a9   :  { %4710 = vmatpush.msrb.mxu1 %v4677_v14  ;;  %v4671_v14 = vld [vmem:[#allocation9 + $0x48] sm:$0xff] }
 0x3aa   :  { %v9116_v33 = vadd.f32 %v4028_v49, %v4010_v63 }
 0x3ab   :  { %v3990_v12 = vpop.f32.mrf.mxu3 }
 0x3ac   :  { %v9114_v46 = vadd.f32 %v3990_v12, %v3972_v50  ;;  %v3978_v1 = vpop.f32.mrf.mxu1  ;;  %v4676_v12 = vld [vmem:[#allocation9 + $0x70] sm:$0xff] }
 0x3ad   :  { %v3979_v23 = vadd.f32 %v3978_v1, %v9036_v5  ;;  %4711 = vmatpush.msrb.mxu1 %v4676_v12  ;;  %v4670_v12 = vld [vmem:[#allocation9 + $0x40] sm:$0xff] }
 0x3af   :  { %v4033_v48 = vpop.f32.mrf.mxu2  ;;  %v4011_v26 = vpop.f32.mrf.mxu0 }
 0x3b0   :  { %v4012_v19 = vadd.f32 %v4011_v26, %v9011_v44  ;;  %v4675_v44 = vld [vmem:[#allocation9 + $0x68] sm:$0xff] }
 0x3b1   :  { %4712 = vmatpush.msrb.mxu1 %v4675_v44 }
 0x3b2   :  { %v9122_v13 = vadd.f32 %v4030_v61, %v4012_v19  ;;  %v4674_v61 = vld [vmem:[#allocation9 + $0x60] sm:$0xff] }
 0x3b3   :  { %v3992_v8 = vpop.f32.mrf.mxu3  ;;  %4713 = vmatpush.msrb.mxu1 %v4674_v61 }
 0x3b4   :  { %v9120_v55 = vadd.f32 %v3992_v8, %v3974_v28  ;;  %v4347_v20 = vpop.f32.mrf.mxu1  ;;  %v4673_v8 = vld [vmem:[#allocation9 + $0x58] sm:$0xff] }
 0x3b5   :  { %4714 = vmatpush.msrb.mxu1 %v4673_v8 }
 0x3b7   :  { %v4035_v7 = vpop.f32.mrf.mxu2  ;;  %v4014_v21 = vpop.f32.mrf.mxu0 }
 0x3b8   :  { %v4015_v50 = vadd.f32 %v4014_v21, %v9021_v34 }
 0x3ba   :  { %v9127_v5 = vadd.f32 %v4033_v48, %v4015_v50  ;;  %v4672_v48 = vld [vmem:[#allocation9 + $0x50] sm:$0xff]  ;;  %v3858_v50 = vadd.f32 %v9045_v15, %v8923_v6 }
 0x3bb   :  { %v3995_v49 = vpop.f32.mrf.mxu3  ;;  %4715 = vmatpush.msrb.mxu1 %v4672_v48  ;;  %v4668_v15 = vld [vmem:[#allocation9 + $0x30] sm:$0xff]  ;;  %v3860_v48 = vadd.f32 %v9056_v16, %v8932_v30  ;;  %v4665_v30 = vld [vmem:[#allocation9 + $0x18] sm:$0xff] }
 0x3bc   :  { %v9125_v63 = vadd.f32 %v3995_v49, %v3977_v31  ;;  %v4349_v1 = vpop.f32.mrf.mxu1 }
 0x3bd   :  { %4716 = vmatpush.msrb.mxu1 %v4671_v14 }
 0x3bf   :  { %v4404_v28 = vpop.f32.mrf.mxu2  ;;  %v4016_v26 = vpop.f32.mrf.mxu0  ;;  %4717 = vmatpush.msrb.mxu1 %v4670_v12 }
 0x3c0   :  { %v4017_v19 = vadd.f32 %v4016_v26, %v9033_v36  ;;  %v3820_v36 = vadd.f32 %v9016_v59, %v8925_v57  ;;  %v4667_v57 = vld [vmem:[#allocation9 + $0x28] sm:$0xff] }
 0x3c2   :  { %v9132_v31 = vadd.f32 %v4035_v7, %v4017_v19  ;;  %v4669_v7 = vld [vmem:[#allocation9 + $0x38] sm:$0xff]  ;;  %v3839_v8 = vadd.f32 %v9047_v35, %v3820_v36  ;;  %v3822_v35 = vadd.f32 %v9029_v43, %v8934_v38  ;;  %v4663_v38 = vld [vmem:[#allocation9 + $0x8] sm:$0xff] }
 0x3c3   :  { %v3997_v34 = vpop.f32.mrf.mxu3  ;;  %4718 = vmatpush.msrb.mxu1 %v4669_v7  ;;  %v4664_v7 = vld [vmem:[#allocation9 + $0x10] sm:$0xff] }
 0x3c4   :  { %v9130_v21 = vadd.f32 %v3997_v34, %v3979_v23  ;;  %v4352_v61 = vpop.f32.mrf.mxu1  ;;  %v3877_v23 = vadd.f32 %v9031_v29, %v3858_v50 }
 0x3c5   :  { %4719 = vmatpush.msrb.mxu1 %v4668_v15 }
 0x3c7   :  { %v4406_v49 = vpop.f32.mrf.mxu2  ;;  %v4385_v44 = vpop.f32.mrf.mxu0  ;;  %4720 = vmatpush.msrb.mxu1 %v4667_v57  ;;  %v4691_v57 = vld [vmem:[#allocation9 + $0xe8] sm:$0xff] }
 0x3c8   :  { %v4405_v26 = vadd.f32 %v4404_v28, %v4385_v44  ;;  %v4666_v28 = vld [vmem:[#allocation9 + $0x20] sm:$0xff] }
 0x3c9   :  { %4721 = vmatpush.msrb.mxu1 %v4666_v28  ;;  %v4708_v28 = vld [vmem:[#allocation9 + $0x170] sm:$0xff] }
 0x3ca   :  { %v4567_v6 = vadd.f32 %v4405_v26, %v3877_v23 }
 0x3cb   :  { %v4366_v19 = vpop.f32.mrf.mxu3  ;;  %4722 = vmatpush.msrb.mxu1 %v4665_v30  ;;  %v3827_v30 = vadd.f32 %v9052_v3, %v8954_v22 }
 0x3cc   :  { %v4367_v34 = vadd.f32 %v4366_v19, %v4347_v20  ;;  %v9143_v12 = vadd.f32 %v4567_v6, %v8726_v54  ;;  %v3879_v20 = vadd.f32 %v9040_v40, %v3860_v48  ;;  %v4354_v36 = vpop.f32.mrf.mxu1  ;;  %v3841_v54 = vadd.f32 %v9058_v53, %v3822_v35  ;;  %v4692_v6 = vld [vmem:[#allocation9 + $0xf0] sm:$0xff] }
 0x3cd   :  { %4723 = vmatpush.msrb.mxu1 %v4664_v7 }
 0x3ce   :  { %v4566_v14 = vadd.f32 %v4367_v34, %v3839_v8  ;;  %v4662_v34 = vld [vmem:[#allocation9] sm:$0xff] }
 0x3cf   :  { %v4409_v59 = vpop.f32.mrf.mxu2  ;;  %v4387_v50 = vpop.f32.mrf.mxu0  ;;  %4724 = vmatpush.msrb.mxu1 %v4663_v38  ;;  %v4704_v38 = vld [vmem:[#allocation9 + $0x150] sm:$0xff] }
 0x3d0   :  { %v9146_v29 = vadd.f32 %v4566_v14, %v8731_v39  ;;  %v4407_v44 = vadd.f32 %v4406_v49, %v4387_v50  ;;  %v3863_v39 = vadd.f32 %v9065_v25, %v8941_v51  ;;  %v4693_v49 = vld [vmem:[#allocation9 + $0xf8] sm:$0xff] }
 0x3d1   :  { %4739 = vmatpush.msra.mxu3 %v4693_v49  ;;  %4725 = vmatpush.msrb.mxu1 %v4662_v34  ;;  %v4702_v34 = vld [vmem:[#allocation9 + $0x140] sm:$0xff] }
 0x3d2   :  { %v4573_v26 = vadd.f32 %v4407_v44, %v3879_v20  ;;  %v3882_v51 = vadd.f32 %v9054_v0, %v3863_v39  ;;  %v4707_v0 = vld [vmem:[#allocation9 + $0x168] sm:$0xff]  ;;  %v4706_v20 = vld [vmem:[#allocation9 + $0x160] sm:$0xff] }
 0x3d3   :  { %v4368_v16 = vpop.f32.mrf.mxu3  ;;  %4740 = vmatpush.msra.mxu3 %v4692_v6 }
 0x3d4   :  { %v4369_v23 = vadd.f32 %v4368_v16, %v4349_v1  ;;  %v9155_v8 = vadd.f32 %v4573_v26, %v8739_v62  ;;  %v3825_v1 = vadd.f32 %v9038_v47, %v8944_v32  ;;  %v4709_v62 = vld [vmem:[#allocation9 + $0x178] sm:$0xff]  ;;  %v4423_v50 = vpop.f32.mrf.mxu1  ;;  %v4690_v32 = vld [vmem:[#allocation9 + $0xe0] sm:$0xff] }
 0x3d5   :  { %4768 = vmatpush.msrb.mxu0 %v4709_v62  ;;  %6989 = vmatpush.msra.mxu1 %v4709_v62 }
 0x3d6   :  { %v4572_v19 = vadd.f32 %v4369_v23, %v3841_v54  ;;  %v3844_v48 = vadd.f32 %v9067_v45, %v3825_v1  ;;  %4741 = vmatpush.msra.mxu3 %v4691_v57  ;;  %v4688_v54 = vld [vmem:[#allocation9 + $0xd0] sm:$0xff]  ;;  %v4705_v23 = vld [vmem:[#allocation9 + $0x158] sm:$0xff]  ;;  %v4682_v57 = vld [vmem:[#allocation9 + $0xa0] sm:$0xff] }
 0x3d7   :  { %v4411_v43 = vpop.f32.mrf.mxu2  ;;  %v4390_v53 = vpop.f32.mrf.mxu0  ;;  %4769 = vmatpush.msrb.mxu0 %v4708_v28  ;;  %6990 = vmatpush.msra.mxu1 %v4708_v28  ;;  %v4699_v28 = vld [vmem:[#allocation9 + $0x128] sm:$0xff] }
 0x3d8   :  { %v9158_v40 = vadd.f32 %v4572_v19, %v8743_v10  ;;  %v4410_v25 = vadd.f32 %v4409_v59, %v4390_v53  ;;  %4742 = vmatpush.msra.mxu3 %v4690_v32  ;;  %v4687_v19 = vld [vmem:[#allocation9 + $0xc8] sm:$0xff]  ;;  %v9676_v32 = vld [vmem:[#allocation42_spill] sm:$0xff] }
 0x3d9   :  { %4770 = vmatpush.msrb.mxu0 %v4707_v0  ;;  %6991 = vmatpush.msra.mxu1 %v4707_v0 }
 0x3da   :  { %v4579_v14 = vadd.f32 %v4410_v25, %v3882_v51  ;;  %v4684_v51 = vld [vmem:[#allocation9 + $0xb0] sm:$0xff] }
 0x3db   :  { %v4371_v15 = vpop.f32.mrf.mxu3  ;;  %4771 = vmatpush.msrb.mxu0 %v4706_v20  ;;  %6992 = vmatpush.msra.mxu1 %v4706_v20 }
 0x3dc   :  { %v4372_v10 = vadd.f32 %v4371_v15, %v4352_v61  ;;  %v9165_v47 = vadd.f32 %v4579_v14, %v8758_v60  ;;  %v4689_v61 = vld [vmem:[#allocation9 + $0xd8] sm:$0xff]  ;;  %v3884_v60 = vadd.f32 %v9060_v42, %v9074_v52  ;;  %v4686_v42 = vld [vmem:[#allocation9 + $0xc0] sm:$0xff]  ;;  %v4703_v52 = vld [vmem:[#allocation9 + $0x148] sm:$0xff] }
 0x3dd   :  { %4743 = vmatpush.msra.mxu3 %v4689_v61  ;;  %4772 = vmatpush.msrb.mxu0 %v4705_v23  ;;  %v4683_v15 = vld [vmem:[#allocation9 + $0xa8] sm:$0xff]  ;;  %v4698_v61 = vld [vmem:[#allocation9 + $0x120] sm:$0xff] }
 0x3de   :  { %v4578_v35 = vadd.f32 %v4372_v10, %v3844_v48  ;;  %6993 = vmatpush.msra.mxu1 %v4705_v23  ;;  %v4700_v48 = vld [vmem:[#allocation9 + $0x130] sm:$0xff]  ;;  %v9675_v10 = vld [vmem:[#allocation46_spill] sm:$0xff] }
 0x3df   :  { %v4480_v59 = vpop.f32.mrf.mxu2  ;;  %v4392_v44 = vpop.f32.mrf.mxu0  ;;  %4744 = vmatpush.msra.mxu3 %v4688_v54  ;;  %4773 = vmatpush.msrb.mxu0 %v4704_v38 }
 0x3e0   :  { %v9168_v45 = vadd.f32 %v4578_v35, %v8762_v58  ;;  %v4412_v16 = vadd.f32 %v4411_v43, %v4392_v44  ;;  %v3846_v58 = vadd.f32 %v9076_v56, %v3827_v30  ;;  %6994 = vmatpush.msra.mxu1 %v4704_v38  ;;  %v4425_v43 = vpop.f32.mrf.mxu1 }
 0x3e1   :  { %4745 = vmatpush.msra.mxu3 %v4687_v19  ;;  %4774 = vmatpush.msrb.mxu0 %v4703_v52  ;;  %v9677_v19 = vld [vmem:[#allocation21_spill] sm:$0xff] }
 0x3e2   :  { %v4585_v39 = vadd.f32 %v4412_v16, %v3884_v60  ;;  %6995 = vmatpush.msra.mxu1 %v4703_v52  ;;  %v4680_v60 = vld [vmem:[#allocation9 + $0x90] sm:$0xff]  ;;  %v4697_v16 = vld [vmem:[#allocation9 + $0x118] sm:$0xff]  ;;  %v4617_v52 = vmul.f32 %v9158_v40, %v9158_v40 }
 0x3e3   :  { %v4373_v26 = vpop.f32.mrf.mxu3  ;;  %4746 = vmatpush.msra.mxu3 %v4686_v42  ;;  %4775 = vmatpush.msrb.mxu0 %v4702_v34  ;;  %v4695_v42 = vld [vmem:[#allocation9 + $0x108] sm:$0xff] }
 0x3e4   :  { %v4374_v7 = vadd.f32 %v4373_v26, %v4354_v36  ;;  %v9176_v3 = vadd.f32 %v4585_v39, %v8771_v24  ;;  %v4685_v36 = vld [vmem:[#allocation9 + $0xb8] sm:$0xff]  ;;  %6996 = vmatpush.msra.mxu1 %v4702_v34 }
 0x3e5   :  { %4747 = vmatpush.msra.mxu3 %v4685_v36  ;;  %v4701_v24 = vld [vmem:[#allocation9 + $0x138] sm:$0xff]  ;;  %v4694_v36 = vld [vmem:[#allocation9 + $0x100] sm:$0xff] }
 0x3e6   :  { %v4584_v22 = vadd.f32 %v4374_v7, %v3846_v58  ;;  %4776 = vmatpush.msrb.mxu0 %v4701_v24  ;;  %6997 = vmatpush.msra.mxu1 %v4701_v24  ;;  %v4679_v58 = vld [vmem:[#allocation9 + $0x88] sm:$0xff]  ;;  %v4696_v7 = vld [vmem:[#allocation9 + $0x110] sm:$0xff] }
 0x3e7   :  { %v4482_v49 = vpop.f32.mrf.mxu2  ;;  %v4461_v53 = vpop.f32.mrf.mxu0  ;;  %4748 = vmatpush.msra.mxu3 %v4684_v51 }
 0x3e8   :  { %v9179_v56 = vadd.f32 %v4584_v22, %v8775_v17  ;;  %v4481_v1 = vadd.f32 %v4480_v59, %v4461_v53  ;;  %4777 = vmatpush.msrb.mxu0 %v4700_v48  ;;  %6998 = vmatpush.msra.mxu1 %v4700_v48  ;;  %v4681_v59 = vld [vmem:[#allocation9 + $0x98] sm:$0xff]  ;;  %v4428_v20 = vpop.f32.mrf.mxu1  ;;  %v4678_v22 = vld [vmem:[#allocation9 + $0x80] sm:$0xff] }
 0x3e9   :  { %4749 = vmatpush.msra.mxu3 %v4683_v15  ;;  %v9679_v15 = vld [vmem:[#allocation22_spill] sm:$0xff] }
 0x3ea   :  { %v4569_v62 = vadd.f32 %v4481_v1, %v9086_v37  ;;  %4778 = vmatpush.msrb.mxu0 %v4699_v28  ;;  %6999 = vmatpush.msra.mxu1 %v4699_v28 }
 0x3eb   :  { %v4442_v25 = vpop.f32.mrf.mxu3  ;;  %4750 = vmatpush.msra.mxu3 %v4682_v57 }
 0x3ec   :  { %v4443_v6 = vadd.f32 %v4442_v25, %v4423_v50  ;;  %v4593_v14 = vadd.f32 %v4569_v62, %v9675_v10  ;;  %v4614_v50 = vmul.f32 %v9146_v29, %v9146_v29  ;;  %4779 = vmatpush.msrb.mxu0 %v4698_v61  ;;  %7000 = vmatpush.msra.mxu1 %v4698_v61  ;;  %v9680_v10 = vld [vmem:[#allocation47_spill] sm:$0xff] }
 0x3ed   :  { %4751 = vmatpush.msra.mxu3 %v4681_v59 }
 0x3ee   :  { %v4568_v17 = vadd.f32 %v4443_v6, %v9084_v27  ;;  %v4626_v0 = vmul.f32 %v4593_v14, %v4593_v14  ;;  %4780 = vmatpush.msrb.mxu0 %v4697_v16  ;;  %7001 = vmatpush.msra.mxu1 %v4697_v16 }
 0x3ef   :  { %v4485_v35 = vpop.f32.mrf.mxu2  ;;  %v4463_v27 = vpop.f32.mrf.mxu0  ;;  %4752 = vmatpush.msra.mxu3 %v4680_v60 }
 0x3f0   :  { %v9187_v37 = vadd.f32 %v4568_v17, %v9676_v32  ;;  %v4638_v44 = vadd.f32 %v4626_v0, %v4614_v50  ;;  %v4483_v30 = vadd.f32 %v4482_v49, %v4463_v27  ;;  %4781 = vmatpush.msrb.mxu0 %v4696_v7  ;;  %7002 = vmatpush.msra.mxu1 %v4696_v7  ;;  %v4430_v51 = vpop.f32.mrf.mxu1  ;;  %v9681_v27 = vld [vmem:[#allocation51_spill] sm:$0xff] }
 0x3f1   :  { %4753 = vmatpush.msra.mxu3 %v4679_v58  ;;  %v4620_v17 = vmul.f32 %v9168_v45, %v9168_v45  ;;  %v4623_v45 = vmul.f32 %v9179_v56, %v9179_v56 }
 0x3f2   :  { %v4650_v29 = vmul.f32 0.001953125, %v4638_v44  ;;  %v4575_v26 = vadd.f32 %v4483_v30, %v9095_v11  ;;  %4782 = vmatpush.msrb.mxu0 %v4695_v42  ;;  %7003 = vmatpush.msra.mxu1 %v4695_v42  ;;  %v9682_v30 = vld [vmem:[#allocation52_spill] sm:$0xff]  ;;  %v4616_v56 = vmul.f32 %v9187_v37, %v9187_v37  ;;  %v9684_v42 = vld [vmem:[#allocation26_spill] sm:$0xff]  ;;  %v9685_v37 = vld [vmem:[#allocation53_spill] sm:$0xff] }
 0x3f3   :  { %v4444_v54 = vpop.f32.mrf.mxu3  ;;  %4754 = vmatpush.msra.mxu3 %v4678_v22 }
 0x3f4   :  { %v4445_v23 = vadd.f32 %v4444_v54, %v4425_v43  ;;  %v4599_v38 = vadd.f32 %v4575_v26, %v9677_v19  ;;  %4726 = vmatmul.f32.vlgmr.msrb.gmra.mxu1 %v4650_v29  ;;  %v9678_v43 = vld [vmem:[#allocation48_spill] sm:$0xff]  ;;  %4783 = vmatpush.msrb.mxu0 %v4694_v36  ;;  %v9683_v19 = vld [vmem:[#allocation50_spill] sm:$0xff] }
 0x3f5   :  { %7004 = vmatpush.msra.mxu1 %v4694_v36  ;;  %v4615_v36 = vmul.f32 %v9143_v12, %v9143_v12  ;;  %v9686_v12 = vld [vmem:[#allocation24_spill] sm:$0xff] }
 0x3f6   :  { %v4574_v39 = vadd.f32 %v4445_v23, %v9093_v2  ;;  %v4629_v11 = vmul.f32 %v4599_v38, %v4599_v38 }
 0x3f7   :  { %v4466_v34 = vpop.f32.mrf.mxu0  ;;  %v4487_v53 = vpop.f32.mrf.mxu2 }
 0x3f8   :  { %v9195_v49 = vadd.f32 %v4574_v39, %v9678_v43  ;;  %v4486_v2 = vadd.f32 %v4485_v35, %v4466_v34  ;;  %v4641_v1 = vadd.f32 %v4629_v11, %v4617_v52 }
 0x3fa   :  { %v4581_v6 = vadd.f32 %v4486_v2, %v9103_v41  ;;  %v4653_v62 = vmul.f32 0.001953125, %v4641_v1 }
 0x3fb   :  { %v4447_v24 = vpop.f32.mrf.mxu3 }
 0x3fc   :  { %v4448_v25 = vadd.f32 %v4447_v24, %v4428_v20  ;;  %v4605_v48 = vadd.f32 %v4581_v6, %v9679_v15  ;;  %4729 = vmatmul.f32.gmra.mxu1 %v4653_v62  ;;  %v4619_v15 = vmul.f32 %v9195_v49, %v9195_v49 }
 0x3fe   :  { %v4580_v40 = vadd.f32 %v4448_v25, %v9101_v4  ;;  %v4632_v57 = vmul.f32 %v4605_v48, %v4605_v48  ;;  %v4499_v4 = vpop.f32.mrf.mxu1 }
 0x3ff   :  { %v4468_v28 = vpop.f32.mrf.mxu0  ;;  %v4556_v0 = vpop.f32.mrf.mxu2 }
 0x400   :  { %v9203_v14 = vadd.f32 %v4580_v40, %v9680_v10  ;;  %v4488_v35 = vadd.f32 %v4487_v53, %v4468_v28  ;;  %v4644_v50 = vadd.f32 %v4632_v57, %v4620_v17  ;;  %v4618_v28 = vmul.f32 %v9155_v8, %v9155_v8 }
 0x402   :  { %v4587_v59 = vadd.f32 %v4488_v35, %v9110_v9  ;;  %v4656_v61 = vmul.f32 0.001953125, %v4644_v50 }
 0x403   :  { %v4449_v32 = vpop.f32.mrf.mxu3 }
 0x404   :  { %v4450_v41 = vadd.f32 %v4449_v32, %v4430_v51  ;;  %v4611_v44 = vadd.f32 %v4587_v59, %v9681_v27  ;;  %4732 = vmatmul.f32.gmra.mxu1 %v4656_v61  ;;  %v9687_v61 = vld [vmem:[#allocation56_spill] sm:$0xff]  ;;  %v4622_v27 = vmul.f32 %v9203_v14, %v9203_v14 }
 0x406   :  { %v4586_v20 = vadd.f32 %v4450_v41, %v9108_v18  ;;  %v4635_v16 = vmul.f32 %v4611_v44, %v4611_v44  ;;  %v4501_v22 = vpop.f32.mrf.mxu1  ;;  %v9688_v44 = vld [vmem:[#allocation55_spill] sm:$0xff] }
 0x407   :  { %v4537_v54 = vpop.f32.mrf.mxu0  ;;  %v4558_v39 = vpop.f32.mrf.mxu2 }
 0x408   :  { %v9211_v60 = vadd.f32 %v4586_v20, %v9682_v30  ;;  %v4557_v29 = vadd.f32 %v4556_v0, %v4537_v54  ;;  %v4647_v23 = vadd.f32 %v4635_v16, %v4623_v45 }
 0x40a   :  { %v4571_v9 = vadd.f32 %v4557_v29, %v9116_v33  ;;  %v4659_v7 = vmul.f32 0.001953125, %v4647_v23 }
 0x40b   :  { %v4518_v26 = vpop.f32.mrf.mxu3 }
 0x40c   :  { %v4519_v58 = vadd.f32 %v4518_v26, %v4499_v4  ;;  %v4595_v38 = vadd.f32 %v4571_v9, %v9683_v19  ;;  %4735 = vmatmul.f32.gmra.mxu1 %v4659_v7 }
 0x40e   :  { %v4570_v18 = vadd.f32 %v4519_v58, %v9114_v46  ;;  %v4628_v43 = vmul.f32 %v4595_v38, %v4595_v38  ;;  %v4504_v10 = vpop.f32.mrf.mxu1 }
 0x40f   :  { %v4539_v11 = vpop.f32.mrf.mxu0  ;;  %v4561_v40 = vpop.f32.mrf.mxu2 }
 0x410   :  { %v4594_v52 = vadd.f32 %v4570_v18, %v9684_v42  ;;  %v4640_v33 = vadd.f32 %v4628_v43, %v4616_v56  ;;  %v4559_v53 = vadd.f32 %v4558_v39, %v4539_v11  ;;  %v9689_v18 = vld [vmem:[#allocation54_spill] sm:$0xff] }
 0x412   :  { %v4627_v34 = vmul.f32 %v4594_v52, %v4594_v52  ;;  %v4652_v46 = vmul.f32 0.001953125, %v4640_v33  ;;  %v4577_v24 = vadd.f32 %v4559_v53, %v9122_v13  ;;  %v4624_v52 = vmul.f32 %v9176_v3, %v9176_v3  ;;  %v4822_v3 = vld [vmem:[%s9358_s4 + $0x68] sm:$0xff]  ;;  %v4821_v33 = vld [vmem:[%s9358_s4 + $0x60] sm:$0xff]  ;;  %v4820_v53 = vld [vmem:[%s9358_s4 + $0x58] sm:$0xff] }
 0x413   :  { %v4520_v2 = vpop.f32.mrf.mxu3 }
 0x414   :  { %v4639_v1 = vadd.f32 %v4627_v34, %v4615_v36  ;;  %v4521_v51 = vadd.f32 %v4520_v2, %v4501_v22  ;;  %v4601_v62 = vadd.f32 %v4577_v24, %v9685_v37  ;;  %4784 = vmatmul.f32.vlgmr.msrb.gmra.mxu0 %v4652_v46  ;;  %v4625_v22 = vmul.f32 %v9211_v60, %v9211_v60  ;;  %v4823_v60 = vld [vmem:[%s9358_s4 + $0x70] sm:$0xff]  ;;  %v4817_v46 = vld [vmem:[%s9358_s4 + $0x40] sm:$0xff]  ;;  %v4812_v37 = vld [vmem:[%s9358_s4 + $0x18] sm:$0xff] }
 0x415   :  { %v4819_v2 = vld [vmem:[%s9358_s4 + $0x50] sm:$0xff] }
 0x416   :  { %v4651_v25 = vmul.f32 0.001953125, %v4639_v1  ;;  %v4576_v6 = vadd.f32 %v4521_v51, %v9120_v55  ;;  %v4631_v17 = vmul.f32 %v4601_v62, %v4601_v62  ;;  %v4818_v1 = vld [vmem:[%s9358_s4 + $0x48] sm:$0xff]  ;;  %v4816_v51 = vld [vmem:[%s9358_s4 + $0x38] sm:$0xff]  ;;  %v4815_v24 = vld [vmem:[%s9358_s4 + $0x30] sm:$0xff] }
 0x417   :  { %v4542_v57 = vpop.f32.mrf.mxu0  ;;  %v4563_v30 = vpop.f32.mrf.mxu2  ;;  %v4811_v62 = vld [vmem:[%s9358_s4 + $0x10] sm:$0xff] }
 0x418   :  { %v4600_v48 = vadd.f32 %v4576_v6, %v9686_v12  ;;  %4755 = vmatmul.f32.vlgmr.msra.gmra.mxu3 %v4651_v25  ;;  %v4562_v35 = vadd.f32 %v4561_v40, %v4542_v57  ;;  %v4643_v50 = vadd.f32 %v4631_v17, %v4619_v15  ;;  %v4814_v25 = vld [vmem:[%s9358_s4 + $0x28] sm:$0xff]  ;;  %v4813_v6 = vld [vmem:[%s9358_s4 + $0x20] sm:$0xff] }
 0x419   :  { %v4810_v40 = vld [vmem:[%s9358_s4 + $0x8] sm:$0xff]  ;;  %v4809_v15 = vld [vmem:[%s9358_s4] sm:$0xff] }
 0x41a   :  { %v4630_v13 = vmul.f32 %v4600_v48, %v4600_v48  ;;  %v4583_v0 = vadd.f32 %v4562_v35, %v9127_v5  ;;  %v4655_v59 = vmul.f32 0.001953125, %v4643_v50  ;;  %v4621_v5 = vmul.f32 %v9165_v47, %v9165_v47  ;;  %v9690_v47 = vld [vmem:[#allocation57_spill] sm:$0xff] }
 0x41b   :  { %v4523_v55 = vpop.f32.mrf.mxu3 }
 0x41c   :  { %v4524_v32 = vadd.f32 %v4523_v55, %v4504_v10  ;;  %v4642_v41 = vadd.f32 %v4630_v13, %v4618_v28  ;;  %v4607_v4 = vadd.f32 %v4583_v0, %v9687_v61  ;;  %4787 = vmatmul.f32.gmra.mxu0 %v4655_v59 }
 0x41e   :  { %v4582_v49 = vadd.f32 %v4524_v32, %v9125_v63  ;;  %v4654_v20 = vmul.f32 0.001953125, %v4642_v41  ;;  %v4634_v45 = vmul.f32 %v4607_v4, %v4607_v4  ;;  %v4506_v63 = vpop.f32.mrf.mxu1 }
 0x41f   :  { %v4544_v16 = vpop.f32.mrf.mxu0 }
 0x420   :  { %v4606_v8 = vadd.f32 %v4582_v49, %v9688_v44  ;;  %4758 = vmatmul.f32.gmra.mxu3 %v4654_v20  ;;  %v4564_v29 = vadd.f32 %v4563_v30, %v4544_v16  ;;  %v4646_v23 = vadd.f32 %v4634_v45, %v4622_v27 }
 0x422   :  { %v4633_v54 = vmul.f32 %v4606_v8, %v4606_v8  ;;  %v4589_v9 = vadd.f32 %v4564_v29, %v9132_v31  ;;  %v4658_v39 = vmul.f32 0.001953125, %v4646_v23 }
 0x423   :  { %v4525_v26 = vpop.f32.mrf.mxu3 }
 0x424   :  { %v4526_v58 = vadd.f32 %v4525_v26, %v4506_v63  ;;  %v4645_v7 = vadd.f32 %v4633_v54, %v4621_v5  ;;  %v4613_v19 = vadd.f32 %v4589_v9, %v9689_v18  ;;  %4790 = vmatmul.f32.gmra.mxu0 %v4658_v39 }
 0x426   :  { %v4588_v14 = vadd.f32 %v4526_v58, %v9130_v21  ;;  %v4657_v38 = vmul.f32 0.001953125, %v4645_v7  ;;  %v4637_v42 = vmul.f32 %v4613_v19, %v4613_v19  ;;  %v4824_v21 = vld [vmem:[%s9358_s4 + $0x78] sm:$0xff]  ;;  %s7134_s4 = smov [#allocation10]  }
 0x427   :  { %4825 = vmatpush.msrb.mxu2 %v4824_v21  ;;  %s5063_s2 = sshll.u32 %s7134_s4, 4  ;;  %s5064_s2 = int_to_ptr.vmem [resolvable:$true] %s5063_s2 }
 0x428   :  { %v4612_v56 = vadd.f32 %v4588_v14, %v9690_v47  ;;  %4761 = vmatmul.f32.gmra.mxu3 %v4657_v38  ;;  %v4649_v31 = vadd.f32 %v4637_v42, %v4625_v22 }
 0x429   :  { %4826 = vmatpush.msrb.mxu2 %v4823_v60 }
 0x42a   :  { %v4636_v43 = vmul.f32 %v4612_v56, %v4612_v56  ;;  %v4661_v11 = vmul.f32 0.001953125, %v4649_v31 }
 0x42b   :  { %4827 = vmatpush.msrb.mxu2 %v4822_v3 }
 0x42c   :  { %v4648_v36 = vadd.f32 %v4636_v43, %v4624_v52  ;;  %4793 = vmatmul.f32.vlgmr.msra.gmra.mxu1 %v4661_v11 }
 0x42d   :  { %4828 = vmatpush.msrb.mxu2 %v4821_v33 }
 0x42e   :  { %v4660_v34 = vmul.f32 0.001953125, %v4648_v36 }
 0x42f   :  { %4829 = vmatpush.msrb.mxu2 %v4820_v53 }
 0x430   :  { %4764 = vmatmul.f32.gmra.mxu3 %v4660_v34 }
 0x431   :  { %4830 = vmatpush.msrb.mxu2 %v4819_v2 }
 0x433   :  { %4831 = vmatpush.msrb.mxu2 %v4818_v1 }
 0x435   :  { %4832 = vmatpush.msrb.mxu2 %v4817_v46 }
 0x437   :  { %4833 = vmatpush.msrb.mxu2 %v4816_v51 }
 0x439   :  { %4834 = vmatpush.msrb.mxu2 %v4815_v24 }
 0x43b   :  { %4835 = vmatpush.msrb.mxu2 %v4814_v25 }
 0x43d   :  { %4836 = vmatpush.msrb.mxu2 %v4813_v6 }
 0x43f   :  { %4837 = vmatpush.msrb.mxu2 %v4812_v37 }
 0x441   :  { %4838 = vmatpush.msrb.mxu2 %v4811_v62 }
 0x443   :  { %4839 = vmatpush.msrb.mxu2 %v4810_v40 }
 0x445   :  { %4840 = vmatpush.msrb.mxu2 %v4809_v15 }
 0x471   :  { %v4727_v12 = vpop.f32.mrf.mxu1 }
 0x479   :  { %v4730_v48 = vpop.f32.mrf.mxu1 }
 0x481   :  { %v4733_v35 = vpop.f32.mrf.mxu1 }
 0x489   :  { %v4736_v20 = vpop.f32.mrf.mxu1 }
 0x491   :  { %v4785_v17 = vpop.f32.mrf.mxu0 }
 0x499   :  { %v4788_v50 = vpop.f32.mrf.mxu0 }
 0x49b   :  { %v4756_v10 = vpop.f32.mrf.mxu3 }
 0x49c   :  { %v4757_v57 = vadd.f32 %v4756_v10, %v4727_v12 }
 0x49e   :  { %v4786_v28 = vadd.f32 %v4785_v17, %v4757_v57 }
 0x4a0   :  { %v4797_v13 = vmax.f32 %v4786_v28, 2.220446e-16 }
 0x4a1   :  { %v4791_v27 = vpop.f32.mrf.mxu0 }
 0x4a2   :  { %7017 = vlog2.f32 %v4797_v13 }
 0x4a3   :  { %v4759_v55 = vpop.f32.mrf.mxu3 }
 0x4a4   :  { %v4760_v32 = vadd.f32 %v4759_v55, %v4730_v48 }
 0x4a6   :  { %v4789_v0 = vadd.f32 %v4788_v50, %v4760_v32 }
 0x4a8   :  { %v7018_v41 = vpop.eup %7017  ;;  %v4798_v59 = vmax.f32 %v4789_v0, 2.220446e-16 }
 0x4a9   :  { %v4802_v49 = vmul.f32 0.6931472, %v7018_v41  ;;  %v4794_v54 = vpop.f32.mrf.mxu1 }
 0x4aa   :  { %7019 = vlog2.f32 %v4798_v59 }
 0x4ab   :  { %v4762_v61 = vpop.f32.mrf.mxu3  ;;  %4841 = vmatmul.f32.vlgmr.msrb.gmra.mxu2 %v4802_v49 }
 0x4ac   :  { %v4763_v4 = vadd.f32 %v4762_v61, %v4733_v35 }
 0x4ae   :  { %v4792_v44 = vadd.f32 %v4791_v27, %v4763_v4 }
 0x4b0   :  { %v7020_v8 = vpop.eup %7019  ;;  %v4799_v45 = vmax.f32 %v4792_v44, 2.220446e-16 }
 0x4b1   :  { %v4804_v30 = vmul.f32 0.6931472, %v7020_v8 }
 0x4b2   :  { %7021 = vlog2.f32 %v4799_v45 }
 0x4b3   :  { %v4765_v16 = vpop.f32.mrf.mxu3  ;;  %4844 = vmatmul.f32.gmra.mxu2 %v4804_v30 }
 0x4b4   :  { %v4766_v5 = vadd.f32 %v4765_v16, %v4736_v20 }
 0x4b6   :  { %v4795_v29 = vadd.f32 %v4794_v54, %v4766_v5 }
 0x4b8   :  { %v7022_v23 = vpop.eup %7021  ;;  %v4800_v63 = vmax.f32 %v4795_v29, 2.220446e-16 }
 0x4b9   :  { %v4806_v26 = vmul.f32 0.6931472, %v7022_v23 }
 0x4ba   :  { %7023 = vlog2.f32 %v4800_v63 }
 0x4bb   :  { %4847 = vmatmul.f32.gmra.mxu2 %v4806_v26 }
 0x4c0   :  { %v7024_v58 = vpop.eup %7023 }
 0x4c1   :  { %v4808_v9 = vmul.f32 0.6931472, %v7024_v58 }
 0x4c3   :  { %4850 = vmatmul.f32.gmra.mxu2 %v4808_v9 }
 0x52e   :  { %v4842_v7 = vpop.f32.mrf.mxu2 }
 0x52f   :  { %4854 = vst [vmem:[#allocation2] sm:$0xff] %v4842_v7 }
 0x536   :  { %v7013_v39 = vld [vmem:[#allocation2 + $0x4] ss:$0 sm:$0xff]  ;;  %v9293_v14 = vpop.f32.mrf.mxu2 }
 0x537   :  { %4864 = vst [vmem:[#allocation2] sm:$0xf] %v7013_v39  ;;  %v4895_v22 = vrot.slane %v9293_v14, 4  ;;  %v4879_v37 = vrot.slane %v9293_v14, 6 }
 0x53e   :  { %v4848_v18 = vpop.f32.mrf.mxu2  ;;  %v9295_v19 = vld [vmem:[#allocation2] sm:$0xff] }
 0x53f   :  { %4856 = vst [vmem:[#allocation2 + $0x10] sm:$0xff] %v4848_v18  ;;  %v4894_v38 = vrot.slane %v9295_v19, 4  ;;  %v4878_v52 = vrot.slane %v9295_v19, 6 }
 0x541   :  { %v4896_v47 = vsel %vm4893_vm3, %v4894_v38, %v4895_v22  ;;  %v4905_v56 = vsub.f32 %v9295_v19, %v4894_v38  ;;  %v4889_v60 = vsub.f32 %v9295_v19, %v4878_v52  ;;  %v4880_v12 = vsel %vm4877_vm4, %v4878_v52, %v4879_v37 }
 0x542   :  { %v4906_v42 = vsub.f32 %v9293_v14, %v4896_v47  ;;  %v4890_v35 = vsub.f32 %v9293_v14, %v4880_v12 }
 0x543   :  { %v4909_v43 = vmul.f32 2.0, %v4905_v56 }
 0x544   :  { %v4910_v31 = vmul.f32 2.0, %v4906_v42 }
 0x545   :  { %v4918_v34 = vrot.slane %v4909_v43, 1 }
 0x546   :  { %v4851_v11 = vpop.f32.mrf.mxu2  ;;  %v7014_v36 = vld [vmem:[#allocation2 + $0x16] ss:$0 sm:$0xff]  ;;  %v4919_v21 = vrot.slane %v4910_v31, 1 }
 0x547   :  { %4857 = vst [vmem:[#allocation2 + $0x18] sm:$0xff] %v4851_v11 }
 0x548   :  { %4867 = vst [vmem:[#allocation2 + $0x17] sm:$0xff] %v7014_v36  ;;  %v4920_v3 = vsel %vm3245_vm2, %v4918_v34, %v4919_v21  ;;  %v5013_v34 = vlaneseq }
 0x549   :  { %4868 = vst [vmem:[#allocation2 + $0x1f] sm:$0x1] %v7014_v36  ;;  %v4929_v33 = vadd.f32 %v4920_v3, %v4889_v60 }
 0x54b   :  { %v4933_v53 = vmul.f32 0.1, %v4929_v33 }
 0x54d   :  { %4937 = vst [vmem:[#allocation3 - $0x3] sm:$0xf8] %v4933_v53 }
 0x54f   :  { %v9305_v2 = vld [vmem:[#allocation2 + $0x10] sm:$0xff] }
 0x550   :  { %v9307_v1 = vld [vmem:[#allocation2 + $0x18] sm:$0xff]  ;;  %v4897_v46 = vrot.slane %v9305_v2, 4  ;;  %v4881_v51 = vrot.slane %v9305_v2, 6 }
 0x551   :  { %v4883_v24 = vrot.slane %v9307_v1, 6  ;;  %v4899_v25 = vrot.slane %v9307_v1, 4 }
 0x552   :  { %v4898_v6 = vsel %vm4893_vm3, %v4895_v22, %v4897_v46  ;;  %v4882_v57 = vsel %vm4877_vm4, %v4879_v37, %v4881_v51  ;;  %v5014_v37 = vand.u32 127, %v5013_v34 }
 0x553   :  { %v4900_v62 = vsel %vm4893_vm3, %v4897_v46, %v4899_v25  ;;  %v4907_v40 = vsub.f32 %v9305_v2, %v4898_v6  ;;  %v4884_v48 = vsel %vm4877_vm4, %v4881_v51, %v4883_v24  ;;  %v4891_v32 = vsub.f32 %v9305_v2, %v4882_v57 }
 0x554   :  { %v4908_v15 = vsub.f32 %v9307_v1, %v4900_v62  ;;  %v7015_v10 = vld [vmem:[#allocation3 + $0x2] ss:$0 sm:$0xff]  ;;  %v4892_v50 = vsub.f32 %v9307_v1, %v4884_v48  ;;  %vm5016_vm5 = vcmp.lt.s32.totalorder %v5014_v37, 26  ;;  %vm5015_vm6 = vcmp.lt.s32.totalorder %v5014_v37, 13 }
 0x555   :  { %v4911_v17 = vmul.f32 2.0, %v4907_v40  ;;  %4946 = vst [vmem:[#allocation3] sm:$0x3] %v7015_v10 }
 0x556   :  { %v4912_v28 = vmul.f32 2.0, %v4908_v15 }
 0x557   :  { %v4921_v13 = vrot.slane %v4911_v17, 1 }
 0x558   :  { %v4923_v55 = vrot.slane %v4912_v28, 1 }
 0x559   :  { %v4922_v0 = vsel %vm3245_vm2, %v4919_v21, %v4921_v13 }
 0x55a   :  { %v4924_v41 = vsel %vm3245_vm2, %v4921_v13, %v4923_v55  ;;  %v4930_v59 = vadd.f32 %v4922_v0, %v4890_v35  ;;  %v4932_v49 = vadd.f32 %v4923_v55, %v4892_v50 }
 0x55b   :  { %v4931_v61 = vadd.f32 %v4924_v41, %v4891_v32 }
 0x55c   :  { %v4934_v4 = vmul.f32 0.1, %v4930_v59  ;;  %v4936_v20 = vmul.f32 0.1, %v4932_v49 }
 0x55d   :  { %v4935_v27 = vmul.f32 0.1, %v4931_v61 }
 0x55e   :  { %4938 = vst [vmem:[#allocation3 + $0x5] sm:$0xff] %v4934_v4 }
 0x55f   :  { %4939 = vst [vmem:[#allocation3 + $0xd] sm:$0xff] %v4935_v27 }
 0x560   :  { %4940 = vst [vmem:[#allocation3 + $0x15] sm:$0x7f] %v4936_v20 }
 0x565   :  { %v4950_v44 = vld [vmem:[#allocation3] sm:$0xff] }
 0x566   :  { %v7016_v8 = vld [vmem:[#allocation3 + $0x14] ss:$0 sm:$0xff]  ;;  %v4951_v45 = vld [vmem:[#allocation3 + $0x8] sm:$0xff]  ;;  %v4973_v30 = vrot.slane %v4950_v44, 4  ;;  %v4958_v39 = vrot.slane %v4950_v44, 6 }
 0x567   :  { %v4974_v16 = vrot.slane %v4951_v45, 4  ;;  %4949 = vst [vmem:[#allocation3 + $0x15] sm:$0x7f] %v7016_v8  ;;  %v4959_v47 = vrot.slane %v4951_v45, 6 }
 0x568   :  { %v4982_v54 = vsub.f32 %v4950_v44, %v4973_v30  ;;  %v4969_v11 = vsub.f32 %v4950_v44, %v4958_v39 }
 0x569   :  { %v4975_v5 = vsel %vm4893_vm3, %v4973_v30, %v4974_v16  ;;  %v4960_v21 = vsel %vm4877_vm4, %v4958_v39, %v4959_v47 }
 0x56a   :  { %v4983_v29 = vsub.f32 %v4951_v45, %v4975_v5  ;;  %v4986_v23 = vmul.f32 2.0, %v4982_v54  ;;  %v4970_v24 = vsub.f32 %v4951_v45, %v4960_v21 }
 0x56c   :  { %v4987_v63 = vmul.f32 2.0, %v4983_v29  ;;  %v4994_v9 = vrot.slane %v4986_v23, 1 }
 0x56e   :  { %v4952_v26 = vld [vmem:[#allocation3 + $0x10] sm:$0xff]  ;;  %v4953_v58 = vld [vmem:[#allocation3 + $0x18] sm:$0xf]  ;;  %v4995_v7 = vrot.slane %v4987_v63, 1 }
 0x56f   :  { %v4961_v18 = vrot.slane %v4952_v26, 6  ;;  %v4963_v38 = vrot.slane %v4953_v58, 6  ;;  %v4976_v22 = vrot.slane %v4952_v26, 4 }
 0x570   :  { %v4996_v31 = vsel %vm3245_vm2, %v4994_v9, %v4995_v7 }
 0x571   :  { %v4977_v56 = vsel %vm4893_vm3, %v4974_v16, %v4976_v22  ;;  %v4985_v42 = vsub.f32 %v4953_v58, %v4976_v22  ;;  %v4964_v52 = vsel %vm4877_vm4, %v4961_v18, %v4963_v38  ;;  %v4962_v60 = vsel %vm4877_vm4, %v4959_v47, %v4961_v18 }
 0x572   :  { %v4984_v43 = vsub.f32 %v4952_v26, %v4977_v56  ;;  %v4972_v33 = vsub.f32 %v4953_v58, %v4964_v52  ;;  %v5005_v46 = vadd.f32 %v4996_v31, %v4969_v11  ;;  %v4971_v25 = vsub.f32 %v4952_v26, %v4962_v60 }
 0x573   :  { %v4989_v36 = vmul.f32 2.0, %v4985_v42 }
 0x574   :  { %v4988_v3 = vmul.f32 2.0, %v4984_v43  ;;  %v5009_v48 = vmul.f32 0.1, %v5005_v46 }
 0x575   :  { %v4999_v53 = vrot.slane %v4989_v36, 1 }
 0x576   :  { %v4997_v51 = vrot.slane %v4988_v3, 1  ;;  %v5021_v13 = vrot.slane %v5009_v48, 1 }
 0x577   :  { %v5008_v6 = vadd.f32 %v4999_v53, %v4972_v33 }
 0x578   :  { %v4998_v62 = vsel %vm3245_vm2, %v4995_v7, %v4997_v51  ;;  %v5000_v40 = vsel %vm3245_vm2, %v4997_v51, %v4999_v53 }
 0x579   :  { %v5006_v15 = vadd.f32 %v4998_v62, %v4970_v24  ;;  %v5007_v12 = vadd.f32 %v5000_v40, %v4971_v25  ;;  %v5012_v17 = vmul.f32 0.1, %v5008_v6 }
 0x57b   :  { %v5010_v10 = vmul.f32 0.1, %v5006_v15  ;;  %v5011_v57 = vmul.f32 0.1, %v5007_v12  ;;  %v5026_v28 = vrot.slane %v5012_v17, 1 }
 0x57d   :  { %v5022_v35 = vrot.slane %v5010_v10, 1  ;;  %v5024_v50 = vrot.slane %v5011_v57, 1  ;;  %v5035_v55 = vsel %vm5016_vm5, %v4953_v58, %v5026_v28 }
 0x57e   :  { %v5045_v8 = vrot.slane %v5035_v55, 6 }
 0x57f   :  { %v5023_v32 = vsel %vm3245_vm2, %v5021_v13, %v5022_v35  ;;  %v5025_v0 = vsel %vm3245_vm2, %v5022_v35, %v5024_v50  ;;  %v5027_v41 = vsel %vm3245_vm2, %v5024_v50, %v5026_v28 }
 0x580   :  { %v5032_v59 = vsel %vm5016_vm5, %v4950_v44, %v5023_v32  ;;  %v5033_v49 = vsel %vm5016_vm5, %v4951_v45, %v5025_v0  ;;  %v5034_v61 = vsel %vm5016_vm5, %v4952_v26, %v5027_v41 }
 0x581   :  { %v5040_v4 = vrot.slane %v5032_v59, 6  ;;  %v5041_v20 = vrot.slane %v5033_v49, 6  ;;  %v5043_v27 = vrot.slane %v5034_v61, 6 }
 0x583   :  { %v5042_v30 = vsel %vm4877_vm4, %v5040_v4, %v5041_v20  ;;  %v5044_v16 = vsel %vm4877_vm4, %v5041_v20, %v5043_v27  ;;  %v5046_v5 = vsel %vm4877_vm4, %v5043_v27, %v5045_v8  ;;  %v5051_v44 = vsel %vm5015_vm6, %v9295_v19, %v5040_v4 }
 0x584   :  { %v5052_v45 = vsel %vm5015_vm6, %v9293_v14, %v5042_v30  ;;  %v5053_v54 = vsel %vm5015_vm6, %v9305_v2, %v5044_v16  ;;  %v5054_v29 = vsel %vm5015_vm6, %v9307_v1, %v5046_v5  ;;  %5055 = vst [vmem:[#allocation10 - $0x4] sm:$0xf0] %v5051_v44 }
 0x585   :  { %5056 = vst [vmem:[#allocation10 + $0x4] sm:$0xff] %v5052_v45 }
 0x586   :  { %5057 = vst [vmem:[#allocation10 + $0xc] sm:$0xff] %v5053_v54 }
 0x587   :  { %5058 = vst [vmem:[#allocation10 + $0x14] sm:$0xf] %v5054_v29 }
 0x588   :  { %5071 = dma.vmem_to_hbm [thread:$0]  %s5064_s2, 384, %s5066_s3, [#allocation6], %s7132_s9, %s7132_s9, %s7133_s10  }
 0x589   :  { %7125 = dma.done.wait [#allocation6], 384  }
 0x58a   :  { %7126 = vsyncadd [#allocation6], 4294966912 }
 0x58b   :  { %5076 = vsyncpa [#allocation5], 1 }
 0x58c   :  { %5077 = vsyncpa [#allocation8], 1 }
 0x58d   :  { %5078 = vsyncpa [#allocation6], 1 }

</bundles_post_ra>
